<compile_context>
chip_gen: v7x
topology: tpu7x:2x2x1
jax: 0.10.0
libtpu: 0.0.40
codegen_flags: <defaults>
</compile_context>

<pallas_src>
import functools

import jax
import jax.numpy as jnp
from jax.experimental import pallas as pl
from jax.experimental.pallas import tpu as pltpu

C_IN = 512   # fixed by the module (Linear(512, 32))
HID = 32     # fixed by the module (Linear(512, 32) / Linear(32, 512))
BN_EPS = 1e-5
LEAKY_SLOPE = 0.01  # nn.LeakyReLU default

_MiB = 1024 * 1024


def _vmem_capacity_bytes():
    """Detected per-core VMEM capacity; conservative 64 MiB (v7x) fallback."""
    try:
        cap = getattr(pltpu.get_tpu_info(), "vmem_capacity_bytes", None)
        if cap:
            return int(cap)
    except Exception:
        pass
    return 64 * _MiB


def _pick_hw_tile(hw, b, itemsize, per_buffer_bytes):
    """Largest lane-aligned HW tile under the per-buffer VMEM budget, keeping
    at least two tiles when possible so both v7x TensorCores get work."""
    max_lanes = max(128, (per_buffer_bytes // (b * C_IN * itemsize)) // 128 * 128)
    if hw < 256:
        return hw                       # single (possibly unaligned) full tile
    half = (hw // 2) // 128 * 128       # >= 128 here
    return max(128, min(max_lanes, half))


# --------------------------------------------------------------------------
# Kernel 1: streamed spatial-sum pooling (HBM-read bound part).
# --------------------------------------------------------------------------
def pool_kernel(x_ref, part_ref, acc_ref, *, hw, hw_tile, tiles_per_split,
                num_splits, total_tiles):
    # Degenerate single-step grid (small / unaligned HW): reduce directly.
    if num_splits == 1 and tiles_per_split == 1:
        part_ref[0] = jnp.sum(x_ref[...].astype(jnp.float32), axis=-1)
        return

    p = pl.program_id(0)      # parallel split (both TCs on v7x)
    k = pl.program_id(1)      # reduction over this split's tiles

    n_chunks = hw_tile // 128                 # hw_tile is lane-aligned here
    covered = num_splits * tiles_per_split * hw_tile
    tile_idx = p * tiles_per_split + k        # nominal global tile index
    start = tile_idx * hw_tile                # nominal element offset in HW

    @pl.when(k == 0)
    def _():
        acc_ref[...] = jnp.zeros_like(acc_ref)

    # Steady-state path: pure VALU per-lane partial sums, no mask, no XLU.
    def plain_accumulate():
        s = x_ref[:, :, 0:128].astype(jnp.float32)
        for j in range(1, n_chunks):
            s = s + x_ref[:, :, j * 128:(j + 1) * 128].astype(jnp.float32)
        acc_ref[...] += s

    # Ragged / phantom tiles only: zero out-of-range lanes (select, not mul).
    def masked_accumulate():
        xt = x_ref[...].astype(jnp.float32)
        offs = start + jax.lax.broadcasted_iota(jnp.int32, xt.shape, 2)
        xt = jnp.where(offs < hw, xt, 0.0)
        s = xt[:, :, 0:128]
        for j in range(1, n_chunks):
            s = s + xt[:, :, j * 128:(j + 1) * 128]
        acc_ref[...] += s

    if covered > hw:
        pl.when(start + hw_tile > hw)(masked_accumulate)
        pl.when(start + hw_tile <= hw)(plain_accumulate)
    else:
        plain_accumulate()

    # One cross-lane (XLU) reduce per split, only at the last tile.
    @pl.when(k == tiles_per_split - 1)
    def _():
        part_ref[0] = jnp.sum(acc_ref[...], axis=-1)


# --------------------------------------------------------------------------
# Kernel 2: combine partial sums + tiny MLP / BN / LeakyReLU / sigmoid / scale.
# Runs once on whole (small) arrays resident in VMEM.
# --------------------------------------------------------------------------
def finalize_kernel(part_ref, w1_ref, b1_ref, gamma_ref, beta_ref, w2_ref,
                    b2_ref, out_ref, *, hw):
    pooled = jnp.sum(part_ref[...], axis=0) * (1.0 / float(hw))   # (B, C) f32

    # Linear(512 -> 32)
    h = jnp.dot(pooled, w1_ref[...], preferred_element_type=jnp.float32) + b1_ref[...]

    # BatchNorm1d(32), training-mode batch statistics over the full batch.
    mu = jnp.mean(h, axis=0, keepdims=True)
    var = jnp.mean((h - mu) ** 2, axis=0, keepdims=True)
    h = (h - mu) * jax.lax.rsqrt(var + BN_EPS) * gamma_ref[...] + beta_ref[...]

    # LeakyReLU (negative_slope = 0.01)
    h = jnp.where(h > 0, h, LEAKY_SLOPE * h)

    # Linear(32 -> 512)
    y = jnp.dot(h, w2_ref[...], preferred_element_type=jnp.float32) + b2_ref[...]

    # Sigmoid
    sig = pl.reciprocal(1.0 + jnp.exp(-y))

    out_ref[...] = (pooled * sig).astype(out_ref.dtype)


def init_params(key):
    """Deterministic synthetic parameters matching PyTorch Linear/BatchNorm init shapes."""
    k1, k2, k3, k4 = jax.random.split(key, 4)
    bound1 = 1.0 / jnp.sqrt(jnp.float32(C_IN))
    bound2 = 1.0 / jnp.sqrt(jnp.float32(HID))
    # Stored pre-transposed as (in, out) so the kernel does plain row-major matmuls.
    w1 = jax.random.uniform(k1, (C_IN, HID), jnp.float32, -bound1, bound1)
    b1 = jax.random.uniform(k2, (1, HID), jnp.float32, -bound1, bound1)
    w2 = jax.random.uniform(k3, (HID, C_IN), jnp.float32, -bound2, bound2)
    b2 = jax.random.uniform(k4, (1, C_IN), jnp.float32, -bound2, bound2)
    gamma = jnp.ones((1, HID), jnp.float32)   # BatchNorm1d weight init
    beta = jnp.zeros((1, HID), jnp.float32)   # BatchNorm1d bias init
    return w1, b1, gamma, beta, w2, b2


def ca_forward(x_nchw, params, hw_tile=None, num_splits=None):
    B, C, H, W = x_nchw.shape
    assert C == C_IN
    HW = H * W
    x = x_nchw.reshape(B, C, HW)              # no dtype cast: DMA native dtype
    itemsize = jnp.dtype(x.dtype).itemsize
    w1, b1, gamma, beta, w2, b2 = params

    vmem_cap = _vmem_capacity_bytes()
    per_buf = 14 * _MiB if vmem_cap >= 100 * _MiB else 8 * _MiB
    if hw_tile is None:
        hw_tile = _pick_hw_tile(HW, B, itemsize, per_buf)
    hw_tile = min(hw_tile, HW)
    assert hw_tile == HW or hw_tile % 128 == 0, \
        "hw_tile must be lane-aligned (multiple of 128) or cover the full H*W"

    total_tiles = pl.cdiv(HW, hw_tile)
    if num_splits is None:
        num_splits = 2 if total_tiles >= 2 else 1
    num_splits = max(1, min(num_splits, total_tiles))
    tiles_per_split = pl.cdiv(total_tiles, num_splits)

    # VMEM budget check: double-buffered x tile + lane-partial scratch + outputs.
    x_buf = B * C_IN * hw_tile * itemsize
    scratch_bytes = B * C_IN * 128 * 4
    part_bytes = num_splits * B * C_IN * 4
    footprint = 2 * x_buf + scratch_bytes + 2 * part_bytes
    assert footprint <= int(0.8 * vmem_cap), (
        f"CA pooling VMEM footprint {footprint / _MiB:.1f} MiB exceeds the budget for "
        f"this chip ({vmem_cap / _MiB:.0f} MiB VMEM); lower hw_tile or tile the batch.")
    # TODO(synk): add a batch grid axis (b_tile) for very large B instead of asserting.
    vmem_limit = int(min(vmem_cap, max(32 * _MiB, footprint + 8 * _MiB)))

    kernel = functools.partial(
        pool_kernel, hw=HW, hw_tile=hw_tile, tiles_per_split=tiles_per_split,
        num_splits=num_splits, total_tiles=total_tiles)

    partials = pl.pallas_call(
        kernel,
        out_shape=jax.ShapeDtypeStruct((num_splits, B, C_IN), jnp.float32),
        grid_spec=pltpu.PrefetchScalarGridSpec(
            num_scalar_prefetch=0,
            grid=(num_splits, tiles_per_split),
            in_specs=[pl.BlockSpec(
                (B, C_IN, hw_tile),
                # Clamp so a phantom tile (from the 2-way split of a ragged tile
                # count) re-reads the last real tile; the in-kernel mask zeroes it.
                lambda p, k, tps=tiles_per_split, tt=total_tiles:
                    (0, 0, jnp.minimum(p * tps + k, tt - 1)))],
            out_specs=pl.BlockSpec((1, B, C_IN), lambda p, k: (p, 0, 0)),
            scratch_shapes=[pltpu.VMEM((B, C_IN, 128), jnp.float32)],
        ),
        compiler_params=pltpu.CompilerParams(
            dimension_semantics=("parallel", "arbitrary"),
            vmem_limit_bytes=vmem_limit),
        cost_estimate=pl.CostEstimate(
            flops=B * C_IN * HW,
            transcendentals=0,
            bytes_accessed=B * C_IN * HW * itemsize + num_splits * B * C_IN * 4),
    )(x)

    out = pl.pallas_call(
        functools.partial(finalize_kernel, hw=HW),
        out_shape=jax.ShapeDtypeStruct((B, C_IN), x_nchw.dtype),
        cost_estimate=pl.CostEstimate(
            flops=4 * B * C_IN * HID,
            transcendentals=B * C_IN,
            bytes_accessed=(num_splits * B * C_IN + 2 * C_IN * HID + 2 * B * C_IN) * 4),
    )(partials, w1, b1, gamma, beta, w2, b2)
    return out


def ca_reference(x_nchw, params):
    """Pure-JAX reference of the PyTorch forward (train-mode BN)."""
    w1, b1, gamma, beta, w2, b2 = params
    B, C, H, W = x_nchw.shape
    pooled = jnp.mean(x_nchw.reshape(B, C, H * W).astype(jnp.float32), axis=-1)
    h = pooled @ w1 + b1
    mu = jnp.mean(h, axis=0, keepdims=True)
    var = jnp.mean((h - mu) ** 2, axis=0, keepdims=True)
    h = (h - mu) / jnp.sqrt(var + BN_EPS) * gamma + beta
    h = jnp.where(h > 0, h, LEAKY_SLOPE * h)
    y = jax.nn.sigmoid(h @ w2 + b2)
    return pooled * y


if __name__ == "__main__":
    key = jax.random.PRNGKey(0)
    kx, kp, kx2, kx3 = jax.random.split(key, 4)
    params = init_params(kp)
    B = 2

    # Case 1: canonical small shape (HW=256 -> two aligned tiles, 2-way split).
    x = jax.random.normal(kx, (B, C_IN, 16, 16), jnp.float32)
    out = jax.block_until_ready(ca_forward(x, params))
    ref = ca_reference(x, params)
    assert out.shape == (B, C_IN)
    assert jnp.allclose(out, ref, atol=1e-4, rtol=1e-4), "mismatch vs reference (case 1)"

    # Case 2: multi-tile with ragged final tile AND a phantom tile from the
    # 2-way split (HW = 576 = 4*128 + 64, hw_tile=128 -> 5 real tiles / 6 slots).
    x2 = jax.random.normal(kx2, (B, C_IN, 24, 24), jnp.float32)
    out2 = jax.block_until_ready(ca_forward(x2, params, hw_tile=128))
    ref2 = ca_reference(x2, params)
    assert jnp.allclose(out2, ref2, atol=1e-4, rtol=1e-4), "mismatch vs reference (case 2)"

    # Case 3: tiny unaligned spatial extent (HW = 49) -> single-step direct path.
    x3 = jax.random.normal(kx3, (B, C_IN, 7, 7), jnp.float32)
    out3 = jax.block_until_ready(ca_forward(x3, params))
    ref3 = ca_reference(x3, params)
    assert jnp.allclose(out3, ref3, atol=1e-4, rtol=1e-4), "mismatch vs reference (case 3)"

    print("KERNEL_OK")
</pallas_src>

<mosaic_0001>
module attributes {stable_mosaic.version = 11 : i64} {
  func.func @pool_kernel(%arg0: i32, %arg1: i32, %arg2: memref<2x512x128xf32, #tpu.memory_space<vmem>>, %arg3: memref<1x2x512xf32, #tpu.memory_space<vmem>>, %arg4: memref<2x512x128xf32, #tpu.memory_space<vmem>>) attributes {dimension_semantics = [#tpu.dimension_semantics<parallel>, #tpu.dimension_semantics<arbitrary>], iteration_bounds = array<i64: 2, 1>, scalar_prefetch = 0 : i64, scratch_operands = 1 : i64, tpu.core_type = #tpu.core_type<tc>, window_params = [{transform_indices = @transform_0, window_bounds = array<i64: 2, 512, 128>}, {transform_indices = @transform_1, window_bounds = array<i64: 1, 2, 512>}]} {
    %c0_i32 = arith.constant 0 : i32
    %0 = arith.cmpi eq, %arg1, %c0_i32 : i32
    %1 = arith.extui %0 : i1 to i32
    %c0_i32_0 = arith.constant 0 : i32
    %2 = arith.cmpi ne, %1, %c0_i32_0 : i32
    scf.if %2 {
      %cst = arith.constant 0.000000e+00 : f32
      %10 = vector.broadcast %cst : f32 to vector<2x512x128xf32>
      %c0_11 = arith.constant 0 : index
      %c0_12 = arith.constant 0 : index
      %c0_13 = arith.constant 0 : index
      %11 = vector.load %arg4[%c0_11, %c0_12, %c0_13] : memref<2x512x128xf32, #tpu.memory_space<vmem>>, vector<2x512x128xf32>
      tpu.vector_store %arg4[%c0_11, %c0_12, %c0_13], %10 {strides = array<i32>} : memref<2x512x128xf32, #tpu.memory_space<vmem>>, vector<2x512x128xf32>,
    } else {
    }
    %c0 = arith.constant 0 : index
    %c0_1 = arith.constant 0 : index
    %c0_2 = arith.constant 0 : index
    %3 = vector.load %arg2[%c0, %c0_1, %c0_2] : memref<2x512x128xf32, #tpu.memory_space<vmem>>, vector<2x512x128xf32>
    %c0_3 = arith.constant 0 : index
    %c0_4 = arith.constant 0 : index
    %c0_5 = arith.constant 0 : index
    %4 = vector.load %arg4[%c0_3, %c0_4, %c0_5] : memref<2x512x128xf32, #tpu.memory_space<vmem>>, vector<2x512x128xf32>
    %5 = arith.addf %4, %3 : vector<2x512x128xf32>
    %c0_6 = arith.constant 0 : index
    %c0_7 = arith.constant 0 : index
    %c0_8 = arith.constant 0 : index
    %6 = vector.load %arg4[%c0_6, %c0_7, %c0_8] : memref<2x512x128xf32, #tpu.memory_space<vmem>>, vector<2x512x128xf32>
    tpu.vector_store %arg4[%c0_6, %c0_7, %c0_8], %5 {strides = array<i32>} : memref<2x512x128xf32, #tpu.memory_space<vmem>>, vector<2x512x128xf32>,
    %c0_i32_9 = arith.constant 0 : i32
    %7 = arith.cmpi eq, %arg1, %c0_i32_9 : i32
    %8 = arith.extui %7 : i1 to i32
    %c0_i32_10 = arith.constant 0 : i32
    %9 = arith.cmpi ne, %8, %c0_i32_10 : i32
    scf.if %9 {
      %c0_11 = arith.constant 0 : index
      %c0_12 = arith.constant 0 : index
      %c0_13 = arith.constant 0 : index
      %10 = vector.load %arg4[%c0_11, %c0_12, %c0_13] : memref<2x512x128xf32, #tpu.memory_space<vmem>>, vector<2x512x128xf32>
      %cst = arith.constant dense<0.000000e+00> : vector<2x512xf32>
      %11 = vector.multi_reduction <add>, %10, %cst [2] : vector<2x512x128xf32> to vector<2x512xf32>
      %c0_14 = arith.constant 0 : index
      %c0_15 = arith.constant 0 : index
      %c0_16 = arith.constant 0 : index
      %12 = vector.load %arg3[%c0_14, %c0_15, %c0_16] : memref<1x2x512xf32, #tpu.memory_space<vmem>>, vector<1x2x512xf32>
      %13 = vector.shape_cast %12 : vector<1x2x512xf32> to vector<2x512xf32>
      %14 = vector.shape_cast %11 : vector<2x512xf32> to vector<1x2x512xf32>
      tpu.vector_store %arg3[%c0_14, %c0_15, %c0_16], %14 {strides = array<i32>} : memref<1x2x512xf32, #tpu.memory_space<vmem>>, vector<1x2x512xf32>,
    } else {
    }
    return
  }
  func.func @transform_0(%arg0: i32, %arg1: i32) -> (i32, i32, i32) {
    %c1_i32 = arith.constant 1 : i32
    %0 = arith.muli %arg0, %c1_i32 : i32
    %1 = arith.addi %0, %arg1 : i32
    %c1_i32_0 = arith.constant 1 : i32
    %2 = arith.minsi %1, %c1_i32_0 : i32
    %c0_i32 = arith.constant 0 : i32
    %c0_i32_1 = arith.constant 0 : i32
    %c0_i32_2 = arith.constant 0 : i32
    return %c0_i32, %c0_i32_1, %2 : i32, i32, i32
  }
  func.func @transform_1(%arg0: i32, %arg1: i32) -> (i32, i32, i32) {
    %c0_i32 = arith.constant 0 : i32
    %c0_i32_0 = arith.constant 0 : i32
    %c0_i32_1 = arith.constant 0 : i32
    return %arg0, %c0_i32, %c0_i32_0 : i32, i32, i32
  }
}

</mosaic_0001>

<bundles_post_ra>
// kernel: tpu_custom_call.1
= control target key start
LH: loop header
LB: loop body
LE: loop exit
PB: predicated region body
PF: predicated region fallthrough
CT: control target
= control target key end

     0   :  { %6 = vsyncpa [#allocation4], 0  ;;  %s11671_s0 = inlined_call_operand.hbm [shape: f32[2,512,256], index: 0, kind: input, shape index: {}]   ;;  %s11672_s1 = inlined_call_operand.hbm [shape: f32[2,2,512], index: 1, kind: output, shape index: {}]  }
   0x1   :  { %8 = vsyncpa [#allocation4 + $0x1], 0 }
   0x2   :  { %9 = vsyncpa [#allocation5], 0 }
   0x3   :  { %11 = vsyncpa [#allocation5 + $0x1], 0  ;;  %s8513_s6 = smov 0   ;;  %s8515_s7 = smov 0  }
   0x4   :  { %s8517_s8 = smov 0   ;;  %s8519_s9 = smov 0  }
   0x5   :  { %s8521_s10 = smov 0   ;;  %s8523_s11 = smov 0  }
   0x6   :  { %s8525_s12 = smov 0   ;;  %s8527_s13 = smov 0  }
   0x7   :  { %s8529_s14 = smov 0  }
   0x8 LB: > { %s8242_s15 = sadd.s32 4294967295, %s8490_s14   ;;  %s8243_s16 = sadd.s32 4294967294, %s8490_s14   ;;  %s8490_s14 = sphi %s8529_s14, %s17_s14   ;;  %s8486_s13 = sphi %s8527_s13, %s12226_s13   ;;  %s8482_s12 = sphi %s8525_s12, %s12225_s12   ;;  %s8478_s11 = sphi %s8523_s11, %s12224_s11   ;;  %s8474_s10 = sphi %s8521_s10, %s12223_s10   ;;  %s8470_s9 = sphi %s8519_s9, %s12222_s9   ;;  %s8466_s8 = sphi %s8517_s8, %s12221_s8   ;;  %s8462_s7 = sphi %s8515_s7, %s12220_s7   ;;  %s8458_s6 = sphi %s8513_s6, %s12219_s6  }
   0x9   : > { %s29_s17 = sadd.s32 1, %s8486_s13  ;;  %p34_p0 = scmp.lt.s32.totalorder %s8486_s13, 1 }
   0xa   : > { %p31_p1 = scmp.ge.s32.totalorder %s29_s17, 2  ;;  %s42_s18 = sadd.s32 1, %s8478_s11 }
   0xb   : > { %s8562_s19 = scalar_select %p34_p0, %s8486_s13, 1 }
   0xc   : > { %s12228_s17 = smov (%p31_p1, %s29_s17), 0  ;;  %p49_p2 = scmp.ne.s32.totalorder %s8478_s11, %s8474_s10 }
   0xd   : > { %p50_p3 = scmp.eq.s32.totalorder %s8490_s14, 0  ;;  %p37_p4 = scmp.lt.s32.totalorder %s12228_s17, 1 }
   0xe   : > { %p55_p5 = scmp.ne.s32.totalorder %s8474_s10, %s8470_s9  ;;  %p56_p7 = scmp.eq.s32.totalorder %s8242_s15, 0 }
   0xf   : > { %p8571_p6 = por %p50_p3, %p49_p2  ;;  %s65_s23 = ssub.s32 %s8486_s13, %s12228_s17 }
  0x10   : > { %s38_s21 = scalar_select %p37_p4, %s12228_s17, 1 }
  0x11   : > { %p8576_p8 = por %p56_p7, %p55_p5  ;;  %p66_p9 = scmp.eq.s32.totalorder %s65_s23, 0 }
  0x12   : > { %s39_s24 = ssub.s32 %s8562_s19, %s38_s21  ;;  %s68_s25 = sadd.s32 1, %s8466_s8 }
  0x13   : > { %p40_p10 = scmp.eq.s32.totalorder %s39_s24, 0  ;;  %p78_p11 = scmp.ne.s32.totalorder %s8466_s8, %s8462_s7 }
  0x14   : > { %s8585_s26 = scalar_select %p66_p9, %s8466_s8, %s68_s25  }
  0x15   : > { %s8588_s27 = scalar_select %p40_p10, %s8478_s11, %s42_s18  }
  0x16   : > { %p79_p12 = scmp.eq.s32.totalorder %s8242_s15, 1  ;;  %p84_p13 = scmp.ne.s32.totalorder %s8462_s7, %s8458_s6 }
  0x17   : > { %p85_p0 = scmp.eq.s32.totalorder %s8243_s16, 1  ;;  %p8269_p4 = scmp.lt.s32.totalorder %s8490_s14, 2 }
  0x18   : > { %p8594_p1 = por %p79_p12, %p78_p11  ;;  %s105_s30 = sand.u32 1, %s8478_s11  }
  0x19   : > { %p8599_p3 = por %p85_p0, %p84_p13  ;;  %s8247_s2 = sshll.u32 %s8562_s19, 7 }
  0x1a   : > { %s11757_s28 = scalar_select %p8594_p1, 1, 0 }
  0x1b   : > { %s11758_s29 = scalar_select %p8599_p3, 1, 0 }
  0x1c   : > { %s8246_s3 = sshll.u32 %s105_s30, 10  ;;  %s8609_s9 = scalar_lea.hbm %s11671_s0, %s8247_s2 }
  0x1d   : > { %s109_s15 = scalar_lea.vmem [#allocation3], %s8246_s3  ;;  %p8613_p5 = pnand %p8269_p4, %p8571_p6 }
  0x1e   : > { %s118_s16 = sshll.u32 %s109_s15, 4  ;;  %s8620_s19 = scalar_lea.sflag [#allocation4], %s105_s30  ;;  %s8617_s16 = int_to_ptr.vmem [resolvable:$true] %s118_s16 }
  0x1f   : > { %s8354_s21 = scalar_lea.hbm %s8609_s9, 16384  ;;  %p8356_p10 = pneg %p8613_p5 }
  0x20   : > { %p8355_p9 = scmp.ne.s32.totalorder %s8609_s9, %s8354_s21  ;;  %s8359_s24 = scalar_lea.hbm %s11671_s0, 32768 }
  0x21   : > { %p8360_p6 = scmp.lt.u32.totalorder %s8609_s9, %s11671_s0  ;;  %p8361_p13 = scmp.lt.u32.totalorder %s8359_s24, %s8354_s21 }
  0x22   : > { %p8357_p11 = pnand %p8356_p10, %p8355_p9  ;;  %p8363_p4 = scmp.lt.u32.totalorder %s8354_s21, %s8609_s9 }
  0x23   : > { %p8362_p0 = por %p8361_p13, %p8360_p6 }
  0x24   : > { %p8358_p12 = pneg %p8357_p11 }
  0x25   : > { %p8364_p2 = por %p8363_p4, %p8362_p0 }
  0x27   : > { %p8365_p7 = pnand %p8364_p2, %p8358_p12 }
  0x29   : > { %8368 = shalt.err (!%p8365_p7)
}
  0x2a   : > { %s8369_s30 = scalar_lea.vmem %s8617_s16, 16384  ;;  %s8492_s3 = smov [#allocation3]  }
  0x2b   : > { %p8370_p9 = scmp.ne.s32.totalorder %s8617_s16, %s8369_s30  ;;  %s8374_s4 = sshll.u32 %s8492_s3, 4  ;;  %s8375_s4 = int_to_ptr.vmem [resolvable:$false] %s8374_s4 }
  0x2c   : > { %s8376_s5 = scalar_lea.vmem %s8375_s4, 32768  ;;  %p8377_p1 = scmp.lt.s32.totalorder %s8617_s16, %s8375_s4 }
  0x2d   : > { %p8372_p11 = pnand %p8370_p9, %p8356_p10  ;;  %p8378_p6 = scmp.lt.s32.totalorder %s8376_s5, %s8369_s30 }
  0x2f   : > { %p8373_p3 = pneg %p8372_p11  ;;  %p8379_p13 = por %p8378_p6, %p8377_p1 }
  0x31   : > { %p8380_p0 = pnand %p8379_p13, %p8373_p3 }
  0x33   : > { %8383 = shalt.err (!%p8380_p0)
}
  0x34   : > { %s8493_s15 = smov 256   ;;  %s8494_s21 = smov 128  }
  0x35   : > { %s8495_s20 = smov 8   ;;  %p126_p2 = scmp.lt.s32.totalorder %s8490_s14, 3 }
  0x36   : > { %8264 = dma.hbm_to_vmem [thread:$0]  (!%p8613_p5), %s8609_s9, 16384, %s8617_s16, %s8620_s19, %s8493_s15, %s8494_s21, %s8495_s20  }
  0x37   : > { %p11760_p7 = scmp.ge.s32.totalorder %s8490_s14, 1 }
  0x39   : > { %p127_p10 = pnand %p11760_p7, %p126_p2 }
  0x3b   : > { %130 = sbr.rel (%p127_p10) target bundleno = 772 (0x304), region = 24 }
  0x42   : > { %s132_s23 = sand.u32 1, %s8474_s10  }
  0x43   : > { %s8249_s24 = sshll.u32 %s132_s23, 10  ;;  %s133_s25 = scalar_lea.sflag [#allocation4], %s132_s23 }
  0x44   : > { %s8652_s2 = scalar_lea.vmem [#allocation3], %s8249_s24 }
  0x45   : > { %8449 = dma.done.wait (%p8576_p8), %s133_s25, 16384  }
  0x46   : > { %8451 = vsyncadd (%p8576_p8), %s133_s25, 4294950912  ;;  %v292_v0 = vld [vmem:[%s8652_s2 + $0x10] sm:$0xff]  ;;  %v290_v1 = vld [vmem:[%s8652_s2] sm:$0xff]  ;;  %vm7472_vm0 = vcmask 130112   ;;  %vm7479_vm1 = vcmask 195712   ;;  %vm7486_vm2 = vcmask 261312  }
  0x47   : > { %937 = vadd.xlane.f32.xlu1 %v292_v0  ;;  %933 = vadd.xlane.f32.xlu0 %v290_v1  ;;  %v293_v2 = vld [vmem:[%s8652_s2 + $0x18] sm:$0xff]  ;;  %v291_v3 = vld [vmem:[%s8652_s2 + $0x8] sm:$0xff]  ;;  %v294_v5 = vld [vmem:[%s8652_s2 + $0x20] sm:$0xff]  ;;  %vm7493_vm3 = vcmask 326912   ;;  %vm7500_vm4 = vcmask 392512   ;;  %vm7507_vm5 = vcmask 458112  }
  0x48   : > { %v295_v4 = vld [vmem:[%s8652_s2 + $0x28] sm:$0xff]  ;;  %v297_v6 = vld [vmem:[%s8652_s2 + $0x38] sm:$0xff]  ;;  %v296_v7 = vld [vmem:[%s8652_s2 + $0x30] sm:$0xff]  ;;  %vm7514_vm6 = vcmask 523712   ;;  %vm7521_vm7 = vcmask 589312   ;;  %vm7528_vm8 = vcmask 654912  }
  0x49   : > { %v299_v8 = vld [vmem:[%s8652_s2 + $0x48] sm:$0xff]  ;;  %v298_v9 = vld [vmem:[%s8652_s2 + $0x40] sm:$0xff]  ;;  %v301_v10 = vld [vmem:[%s8652_s2 + $0x58] sm:$0xff]  ;;  %vm7535_vm9 = vcmask 720512   ;;  %vm7542_vm10 = vcmask 786112   ;;  %vm7549_vm11 = vcmask 851712  }
  0x4a   : > { %v300_v11 = vld [vmem:[%s8652_s2 + $0x50] sm:$0xff]  ;;  %v303_v12 = vld [vmem:[%s8652_s2 + $0x68] sm:$0xff]  ;;  %v302_v13 = vld [vmem:[%s8652_s2 + $0x60] sm:$0xff]  ;;  %vm7556_vm12 = vcmask 917312   ;;  %vm7563_vm13 = vcmask 982912   ;;  %vm7570_vm14 = vcmask 1048512  }
  0x4b   : > { %939 = vadd.xlane.f32.xlu1 %v293_v2  ;;  %935 = vadd.xlane.f32.xlu0 %v291_v3  ;;  %v305_v14 = vld [vmem:[%s8652_s2 + $0x78] sm:$0xff]  ;;  %v304_v15 = vld [vmem:[%s8652_s2 + $0x70] sm:$0xff]  ;;  %v307_v16 = vld [vmem:[%s8652_s2 + $0x88] sm:$0xff]  ;;  %vm8125_vm15 = vcmask 1041409   ;;  %s152_s22 = sand.u32 1, %s8462_s7   ;;  %s8256_s16 = sshll.u32 %s8482_s12, 7 }
  0x4c   : > { %v306_v17 = vld [vmem:[%s8652_s2 + $0x80] sm:$0xff]  ;;  %v309_v18 = vld [vmem:[%s8652_s2 + $0x98] sm:$0xff]  ;;  %v308_v19 = vld [vmem:[%s8652_s2 + $0x90] sm:$0xff]  ;;  %s8250_s9 = sshll.u32 %s152_s22, 3  ;;  %s11614_s4 = scalar_lea.hbm %s11672_s1, %s8256_s16 }
  0x4d   : > { %v311_v20 = vld [vmem:[%s8652_s2 + $0xa8] sm:$0xff]  ;;  %v310_v21 = vld [vmem:[%s8652_s2 + $0xa0] sm:$0xff]  ;;  %v313_v22 = vld [vmem:[%s8652_s2 + $0xb8] sm:$0xff]  ;;  %s154_s18 = scalar_lea.vmem [#allocation6], %s8250_s9  ;;  %s8150_s12 = scalar_lea.sflag [#allocation5], %s152_s22 }
  0x4e   : > { %v312_v23 = vld [vmem:[%s8652_s2 + $0xb0] sm:$0xff]  ;;  %v315_v24 = vld [vmem:[%s8652_s2 + $0xc8] sm:$0xff]  ;;  %v314_v25 = vld [vmem:[%s8652_s2 + $0xc0] sm:$0xff]  ;;  %s8164_s19 = sshll.u32 %s154_s18, 4  ;;  %p12216_p1 = scmp.ne.s32.totalorder %s11757_s28, 0  ;;  %s11616_s19 = int_to_ptr.vmem [resolvable:$true] %s8164_s19 }
  0x4f   : > { %943 = vadd.xlane.f32.xlu1 %v295_v4  ;;  %941 = vadd.xlane.f32.xlu0 %v294_v5  ;;  %v317_v26 = vld [vmem:[%s8652_s2 + $0xd8] sm:$0xff]  ;;  %v316_v27 = vld [vmem:[%s8652_s2 + $0xd0] sm:$0xff]  ;;  %v319_v28 = vld [vmem:[%s8652_s2 + $0xe8] sm:$0xff]  ;;  %s8384_s5 = scalar_lea.vmem %s11616_s19, 128  ;;  %s8502_s15 = smov [#allocation6]  }
  0x50   : > { %v318_v29 = vld [vmem:[%s8652_s2 + $0xe0] sm:$0xff]  ;;  %v321_v30 = vld [vmem:[%s8652_s2 + $0xf8] sm:$0xff]  ;;  %v320_v31 = vld [vmem:[%s8652_s2 + $0xf0] sm:$0xff]  ;;  %p8385_p8 = scmp.ne.s32.totalorder %s11616_s19, %s8384_s5  ;;  %s8388_s21 = sshll.u32 %s8502_s15, 4  ;;  %s8389_s21 = int_to_ptr.vmem [resolvable:$false] %s8388_s21 }
  0x51   : > { %v323_v32 = vld [vmem:[%s8652_s2 + $0x108] sm:$0xff]  ;;  %v322_v33 = vld [vmem:[%s8652_s2 + $0x100] sm:$0xff]  ;;  %v325_v34 = vld [vmem:[%s8652_s2 + $0x118] sm:$0xff]  ;;  %s8390_s20 = scalar_lea.vmem %s8389_s21, 256  ;;  %p8391_p12 = scmp.lt.s32.totalorder %s11616_s19, %s8389_s21 }
  0x52   : > { %v324_v35 = vld [vmem:[%s8652_s2 + $0x110] sm:$0xff]  ;;  %v327_v36 = vld [vmem:[%s8652_s2 + $0x128] sm:$0xff]  ;;  %v326_v37 = vld [vmem:[%s8652_s2 + $0x120] sm:$0xff]  ;;  %p8386_p3 = pnand %p8385_p8, %p12216_p1  ;;  %p8392_p4 = scmp.lt.s32.totalorder %s8390_s20, %s8384_s5 }
  0x53   : > { %947 = vadd.xlane.f32.xlu1 %v297_v6  ;;  %945 = vadd.xlane.f32.xlu0 %v296_v7  ;;  %v329_v38 = vld [vmem:[%s8652_s2 + $0x138] sm:$0xff]  ;;  %v328_v39 = vld [vmem:[%s8652_s2 + $0x130] sm:$0xff]  ;;  %v331_v40 = vld [vmem:[%s8652_s2 + $0x148] sm:$0xff] }
  0x54   : > { %v330_v41 = vld [vmem:[%s8652_s2 + $0x140] sm:$0xff]  ;;  %v333_v42 = vld [vmem:[%s8652_s2 + $0x158] sm:$0xff]  ;;  %v332_v43 = vld [vmem:[%s8652_s2 + $0x150] sm:$0xff]  ;;  %p8387_p5 = pneg %p8386_p3  ;;  %p8393_p9 = por %p8392_p4, %p8391_p12 }
  0x55   : > { %v335_v44 = vld [vmem:[%s8652_s2 + $0x168] sm:$0xff]  ;;  %v334_v45 = vld [vmem:[%s8652_s2 + $0x160] sm:$0xff]  ;;  %v337_v46 = vld [vmem:[%s8652_s2 + $0x178] sm:$0xff] }
  0x56   : > { %v336_v47 = vld [vmem:[%s8652_s2 + $0x170] sm:$0xff]  ;;  %v339_v48 = vld [vmem:[%s8652_s2 + $0x188] sm:$0xff]  ;;  %v338_v49 = vld [vmem:[%s8652_s2 + $0x180] sm:$0xff]  ;;  %p8394_p11 = pnand %p8393_p9, %p8387_p5 }
  0x57   : > { %951 = vadd.xlane.f32.xlu1 %v299_v8  ;;  %949 = vadd.xlane.f32.xlu0 %v298_v9  ;;  %v341_v50 = vld [vmem:[%s8652_s2 + $0x198] sm:$0xff]  ;;  %v340_v51 = vld [vmem:[%s8652_s2 + $0x190] sm:$0xff]  ;;  %v343_v52 = vld [vmem:[%s8652_s2 + $0x1a8] sm:$0xff] }
  0x58   : > { %v342_v53 = vld [vmem:[%s8652_s2 + $0x1a0] sm:$0xff]  ;;  %v345_v54 = vld [vmem:[%s8652_s2 + $0x1b8] sm:$0xff]  ;;  %v344_v55 = vld [vmem:[%s8652_s2 + $0x1b0] sm:$0xff] }
  0x59   : > { %v347_v56 = vld [vmem:[%s8652_s2 + $0x1c8] sm:$0xff]  ;;  %v346_v57 = vld [vmem:[%s8652_s2 + $0x1c0] sm:$0xff]  ;;  %v349_v58 = vld [vmem:[%s8652_s2 + $0x1d8] sm:$0xff] }
  0x5a   : > { %v348_v59 = vld [vmem:[%s8652_s2 + $0x1d0] sm:$0xff]  ;;  %v351_v60 = vld [vmem:[%s8652_s2 + $0x1e8] sm:$0xff]  ;;  %v350_v61 = vld [vmem:[%s8652_s2 + $0x1e0] sm:$0xff] }
  0x5b   : > { %955 = vadd.xlane.f32.xlu1 %v301_v10  ;;  %953 = vadd.xlane.f32.xlu0 %v300_v11  ;;  %v353_v62 = vld [vmem:[%s8652_s2 + $0x1f8] sm:$0xff]  ;;  %v352_v63 = vld [vmem:[%s8652_s2 + $0x1f0] sm:$0xff]  ;;  %v355_v0 = vld [vmem:[%s8652_s2 + $0x208] sm:$0xff] }
  0x5c   : > { %v354_v1 = vld [vmem:[%s8652_s2 + $0x200] sm:$0xff]  ;;  %v357_v2 = vld [vmem:[%s8652_s2 + $0x218] sm:$0xff]  ;;  %v356_v3 = vld [vmem:[%s8652_s2 + $0x210] sm:$0xff] }
  0x5d   : > { %v359_v4 = vld [vmem:[%s8652_s2 + $0x228] sm:$0xff]  ;;  %v358_v5 = vld [vmem:[%s8652_s2 + $0x220] sm:$0xff]  ;;  %v361_v6 = vld [vmem:[%s8652_s2 + $0x238] sm:$0xff] }
  0x5e   : > { %v360_v7 = vld [vmem:[%s8652_s2 + $0x230] sm:$0xff]  ;;  %v363_v9 = vld [vmem:[%s8652_s2 + $0x248] sm:$0xff]  ;;  %v362_v10 = vld [vmem:[%s8652_s2 + $0x240] sm:$0xff] }
  0x5f   : > { %959 = vadd.xlane.f32.xlu1 %v303_v12  ;;  %957 = vadd.xlane.f32.xlu0 %v302_v13  ;;  %v8496_v12 = vmov 0  }
  0x60   : > { %8353 = vset.pattern.permute.xlu1 %v8496_v12  ;;  %8352 = vset.pattern.permute.xlu0 %v8496_v12 }
  0x63   : > { %963 = vadd.xlane.f32.xlu1 %v305_v14  ;;  %961 = vadd.xlane.f32.xlu0 %v304_v15  ;;  %v365_v14 = vld [vmem:[%s8652_s2 + $0x258] sm:$0xff]  ;;  %v364_v15 = vld [vmem:[%s8652_s2 + $0x250] sm:$0xff] }
  0x67   : > { %967 = vadd.xlane.f32.xlu1 %v307_v16  ;;  %965 = vadd.xlane.f32.xlu0 %v306_v17 }
  0x6b   : > { %971 = vadd.xlane.f32.xlu1 %v309_v18  ;;  %969 = vadd.xlane.f32.xlu0 %v308_v19  ;;  %v367_v18 = vld [vmem:[%s8652_s2 + $0x268] sm:$0xff]  ;;  %v366_v19 = vld [vmem:[%s8652_s2 + $0x260] sm:$0xff] }
  0x6f   : > { %975 = vadd.xlane.f32.xlu1 %v311_v20  ;;  %973 = vadd.xlane.f32.xlu0 %v310_v21 }
  0x73   : > { %979 = vadd.xlane.f32.xlu1 %v313_v22  ;;  %977 = vadd.xlane.f32.xlu0 %v312_v23  ;;  %v369_v22 = vld [vmem:[%s8652_s2 + $0x278] sm:$0xff]  ;;  %v368_v23 = vld [vmem:[%s8652_s2 + $0x270] sm:$0xff] }
  0x77   : > { %983 = vadd.xlane.f32.xlu1 %v315_v24  ;;  %981 = vadd.xlane.f32.xlu0 %v314_v25 }
  0x7b   : > { %987 = vadd.xlane.f32.xlu1 %v317_v26  ;;  %985 = vadd.xlane.f32.xlu0 %v316_v27  ;;  %v371_v26 = vld [vmem:[%s8652_s2 + $0x288] sm:$0xff]  ;;  %v370_v27 = vld [vmem:[%s8652_s2 + $0x280] sm:$0xff] }
  0x7f   : > { %991 = vadd.xlane.f32.xlu1 %v319_v28  ;;  %989 = vadd.xlane.f32.xlu0 %v318_v29 }
  0x83   : > { %995 = vadd.xlane.f32.xlu1 %v321_v30  ;;  %993 = vadd.xlane.f32.xlu0 %v320_v31  ;;  %v373_v30 = vld [vmem:[%s8652_s2 + $0x298] sm:$0xff]  ;;  %v372_v31 = vld [vmem:[%s8652_s2 + $0x290] sm:$0xff] }
  0x87   : > { %999 = vadd.xlane.f32.xlu1 %v323_v32  ;;  %997 = vadd.xlane.f32.xlu0 %v322_v33 }
  0x8b   : > { %1003 = vadd.xlane.f32.xlu1 %v325_v34  ;;  %1001 = vadd.xlane.f32.xlu0 %v324_v35  ;;  %v375_v34 = vld [vmem:[%s8652_s2 + $0x2a8] sm:$0xff]  ;;  %v374_v35 = vld [vmem:[%s8652_s2 + $0x2a0] sm:$0xff] }
  0x8f   : > { %1007 = vadd.xlane.f32.xlu1 %v327_v36  ;;  %1005 = vadd.xlane.f32.xlu0 %v326_v37 }
  0x93   : > { %1011 = vadd.xlane.f32.xlu1 %v329_v38  ;;  %1009 = vadd.xlane.f32.xlu0 %v328_v39  ;;  %v377_v38 = vld [vmem:[%s8652_s2 + $0x2b8] sm:$0xff]  ;;  %v376_v39 = vld [vmem:[%s8652_s2 + $0x2b0] sm:$0xff] }
  0x97   : > { %1015 = vadd.xlane.f32.xlu1 %v331_v40  ;;  %1013 = vadd.xlane.f32.xlu0 %v330_v41 }
  0x9b   : > { %1019 = vadd.xlane.f32.xlu1 %v333_v42  ;;  %1017 = vadd.xlane.f32.xlu0 %v332_v43  ;;  %v379_v42 = vld [vmem:[%s8652_s2 + $0x2c8] sm:$0xff]  ;;  %v378_v43 = vld [vmem:[%s8652_s2 + $0x2c0] sm:$0xff] }
  0x9f   : > { %1023 = vadd.xlane.f32.xlu1 %v335_v44  ;;  %1021 = vadd.xlane.f32.xlu0 %v334_v45 }
  0xa3   : > { %1027 = vadd.xlane.f32.xlu1 %v337_v46  ;;  %1025 = vadd.xlane.f32.xlu0 %v336_v47  ;;  %v381_v46 = vld [vmem:[%s8652_s2 + $0x2d8] sm:$0xff]  ;;  %v380_v47 = vld [vmem:[%s8652_s2 + $0x2d0] sm:$0xff] }
  0xa7   : > { %1031 = vadd.xlane.f32.xlu1 %v339_v48  ;;  %1029 = vadd.xlane.f32.xlu0 %v338_v49 }
  0xab   : > { %1035 = vadd.xlane.f32.xlu1 %v341_v50  ;;  %1033 = vadd.xlane.f32.xlu0 %v340_v51  ;;  %v383_v50 = vld [vmem:[%s8652_s2 + $0x2e8] sm:$0xff]  ;;  %v382_v51 = vld [vmem:[%s8652_s2 + $0x2e0] sm:$0xff] }
  0xaf   : > { %1039 = vadd.xlane.f32.xlu1 %v343_v52  ;;  %1037 = vadd.xlane.f32.xlu0 %v342_v53  ;;  %v8497_v53 = vmov 269488144  }
  0xb3   : > { %1043 = vadd.xlane.f32.xlu1 %v345_v54  ;;  %1041 = vadd.xlane.f32.xlu0 %v344_v55  ;;  %v1318_v54 = vunpack.c.l.s4 %v8497_v53  ;;  %v11674_v55 = vlaneseq }
  0xb7   : > { %1047 = vadd.xlane.f32.xlu1 %v347_v56  ;;  %1045 = vadd.xlane.f32.xlu0 %v346_v57  ;;  %v8498_v56 = vmov 842150450  }
  0xb8   : > { %v1325_v57 = vunpack.c.l.s4 %v8498_v56 }
  0xbb   : > { %1051 = vadd.xlane.f32.xlu1 %v349_v58  ;;  %1049 = vadd.xlane.f32.xlu0 %v348_v59  ;;  %v385_v59 = vld [vmem:[%s8652_s2 + $0x2f8] sm:$0xff] }
  0xbf   : > { %1055 = vadd.xlane.f32.xlu1 %v351_v60  ;;  %1053 = vadd.xlane.f32.xlu0 %v350_v61  ;;  %v384_v60 = vld [vmem:[%s8652_s2 + $0x2f0] sm:$0xff] }
  0xc3   : > { %1059 = vadd.xlane.f32.xlu1 %v353_v62  ;;  %1057 = vadd.xlane.f32.xlu0 %v352_v63  ;;  %v8499_v62 = vmov 1414812756  }
  0xc4   : > { %v1332_v63 = vunpack.c.l.s4 %v8499_v62 }
  0xc7   : > { %1063 = vadd.xlane.f32.xlu1 %v355_v0  ;;  %1061 = vadd.xlane.f32.xlu0 %v354_v1  ;;  %v8500_v0 = vmov 1987475062  }
  0xc8   : > { %v1339_v1 = vunpack.c.l.s4 %v8500_v0 }
  0xca   : > { %v1340_v12 = vunpack.c.0.s8 %v1339_v1  ;;  %v393_v1 = vld [vmem:[%s8652_s2 + $0x338] sm:$0xff] }
  0xcb   : > { %1067 = vadd.xlane.f32.xlu1 %v357_v2  ;;  %1065 = vadd.xlane.f32.xlu0 %v356_v3  ;;  %v1319_v2 = vunpack.c.0.s8 %v1318_v54  ;;  %v8803_v3 = vshrl.u32 %v11674_v55, 7 }
  0xcd   : > { %11761 = vst [vmem:[#allocation9_spill] sm:$0xff] %v8803_v3 }
  0xcf   : > { %1071 = vadd.xlane.f32.xlu1 %v359_v4  ;;  %1069 = vadd.xlane.f32.xlu0 %v358_v5  ;;  %v1326_v4 = vunpack.c.0.s8 %v1325_v57 }
  0xd3   : > { %1075 = vadd.xlane.f32.xlu1 %v361_v6  ;;  %1073 = vadd.xlane.f32.xlu0 %v360_v7  ;;  %v387_v6 = vld [vmem:[%s8652_s2 + $0x308] sm:$0xff]  ;;  %v386_v7 = vld [vmem:[%s8652_s2 + $0x300] sm:$0xff] }
  0xd4   : > { %v8730_v8 = vpop.xlane.xlu1 %937  ;;  %v8734_v11 = vpop.xlane.xlu0 %933 }
  0xd7   : > { %1079 = vadd.xlane.f32.xlu1 %v363_v9  ;;  %1077 = vadd.xlane.f32.xlu0 %v362_v10  ;;  %v1333_v10 = vunpack.c.0.s8 %v1332_v63 }
  0xd8   : > { %v8736_v13 = vpop.xlane.xlu1 %939  ;;  %v8740_v16 = vpop.xlane.xlu0 %935 }
  0xdb   : > { %1083 = vadd.xlane.f32.xlu1 %v365_v14  ;;  %1081 = vadd.xlane.f32.xlu0 %v364_v15  ;;  %v8501_v14 = vmov 1983009808  }
  0xdc   : > { %v8742_v17 = vpop.xlane.xlu1 %943  ;;  %v8746_v20 = vpop.xlane.xlu0 %941  ;;  %v4904_v15 = vunpack.c.l.s4 %v8501_v14 }
  0xdf   : > { %1087 = vadd.xlane.f32.xlu1 %v367_v18  ;;  %1085 = vadd.xlane.f32.xlu0 %v366_v19  ;;  %v8812_v18 = vsub.s32 %v1319_v2, %v8803_v3  ;;  %v8815_v19 = vsub.s32 %v1326_v4, %v8803_v3  ;;  %v392_v2 = vld [vmem:[%s8652_s2 + $0x330] sm:$0xff] }
  0xe0   : > { %v8748_v21 = vpop.xlane.xlu1 %947  ;;  %v8752_v24 = vpop.xlane.xlu0 %945 }
  0xe1   : > { %v1330_v53 = vrot.slane %v8734_v11, %v8815_v19  ;;  %v1351_v54 = vrot.slane %v8740_v16, %v8812_v18  ;;  %v1358_v56 = vrot.slane %v8740_v16, %v8815_v19  ;;  %v1463_v14 = vrot.slane %v8742_v17, %v8812_v18 }
  0xe3   : > { %1091 = vadd.xlane.f32.xlu1 %v369_v22  ;;  %1089 = vadd.xlane.f32.xlu0 %v368_v23  ;;  %v389_v23 = vld [vmem:[%s8652_s2 + $0x318] sm:$0xff] }
  0xe4   : > { %v8754_v25 = vpop.xlane.xlu1 %951  ;;  %v8758_v28 = vpop.xlane.xlu0 %949 }
  0xe5   : > { %v1547_v55 = vrot.slane %v8758_v28, %v8812_v18 }
  0xe7   : > { %1095 = vadd.xlane.f32.xlu1 %v371_v26  ;;  %1093 = vadd.xlane.f32.xlu0 %v370_v27  ;;  %v388_v26 = vld [vmem:[%s8652_s2 + $0x310] sm:$0xff] }
  0xe8   : > { %v8760_v29 = vpop.xlane.xlu1 %955  ;;  %v8764_v32 = vpop.xlane.xlu0 %953 }
  0xeb   : > { %1099 = vadd.xlane.f32.xlu1 %v373_v30  ;;  %1097 = vadd.xlane.f32.xlu0 %v372_v31  ;;  %v8824_v30 = vsub.s32 %v1333_v10, %v8803_v3  ;;  %v8827_v31 = vsub.s32 %v1340_v12, %v8803_v3 }
  0xec   : > { %v8766_v33 = vpop.xlane.xlu1 %959  ;;  %v8770_v36 = vpop.xlane.xlu0 %957 }
  0xed   : > { %v1337_v57 = vrot.slane %v8734_v11, %v8824_v30  ;;  %v1365_v62 = vrot.slane %v8740_v16, %v8824_v30  ;;  %v1372_v63 = vrot.slane %v8740_v16, %v8827_v31  ;;  %v1428_v16 = vrot.slane %v8736_v13, %v8827_v31 }
  0xef   : > { %1103 = vadd.xlane.f32.xlu1 %v375_v34  ;;  %1101 = vadd.xlane.f32.xlu0 %v374_v35  ;;  %v4905_v34 = vunpack.c.0.s8 %v4904_v15  ;;  %v1379_v35 = vrot.slane %v8730_v8, %v8812_v18  ;;  %v8882_v15 = vcombine.low %v1351_v54, %v1358_v56  ;;  %v1449_v56 = vrot.slane %v8746_v20, %v8824_v30 }
  0xf0   : > { %v8772_v37 = vpop.xlane.xlu1 %963  ;;  %v8776_v40 = vpop.xlane.xlu0 %961 }
  0xf3   : > { %1107 = vadd.xlane.f32.xlu1 %v377_v38  ;;  %1105 = vadd.xlane.f32.xlu0 %v376_v39  ;;  %v1386_v38 = vrot.slane %v8730_v8, %v8815_v19 }
  0xf4   : > { %v8778_v41 = vpop.xlane.xlu1 %967  ;;  %v8782_v44 = vpop.xlane.xlu0 %965 }
  0xf7   : > { %1111 = vadd.xlane.f32.xlu1 %v379_v42  ;;  %1109 = vadd.xlane.f32.xlu0 %v378_v43  ;;  %v391_v42 = vld [vmem:[%s8652_s2 + $0x328] sm:$0xff]  ;;  %v390_v43 = vld [vmem:[%s8652_s2 + $0x320] sm:$0xff] }
  0xf8   : > { %v8784_v45 = vpop.xlane.xlu1 %971  ;;  %v8788_v48 = vpop.xlane.xlu0 %969 }
  0xfb   : > { %1115 = vadd.xlane.f32.xlu1 %v381_v46  ;;  %1113 = vadd.xlane.f32.xlu0 %v380_v47  ;;  %v1393_v47 = vrot.slane %v8730_v8, %v8824_v30 }
  0xfc   : > { %v8790_v49 = vpop.xlane.xlu1 %975  ;;  %v8794_v52 = vpop.xlane.xlu0 %973 }
  0xff   : > { %1119 = vadd.xlane.f32.xlu1 %v383_v50  ;;  %1117 = vadd.xlane.f32.xlu0 %v382_v51  ;;  %v1400_v50 = vrot.slane %v8730_v8, %v8827_v31  ;;  %v1323_v51 = vrot.slane %v8734_v11, %v8812_v18  ;;  %v8856_v8 = vcombine.low %v1379_v35, %v1386_v38 }
 0x100   : > { %v8796_v58 = vpop.xlane.xlu1 %979  ;;  %v8800_v61 = vpop.xlane.xlu0 %977  ;;  %v1435_v35 = vrot.slane %v8746_v20, %v8812_v18  ;;  %v1442_v38 = vrot.slane %v8746_v20, %v8815_v19 }
 0x101   : > { %v4936_v10 = vcombine.low %v1393_v47, %v1400_v50  ;;  %v8878_v12 = vcombine.low %v1323_v51, %v1330_v53  ;;  %v394_v47 = vld [vmem:[%s8652_s2 + $0x340] sm:$0xff] }
 0x103   : > { %1123 = vadd.xlane.f32.xlu1 %v385_v59  ;;  %1121 = vadd.xlane.f32.xlu0 %v384_v60  ;;  %v8854_v59 = vsub.s32 %v4905_v34, %v8803_v3  ;;  %v1344_v60 = vrot.slane %v8734_v11, %v8827_v31  ;;  %v1421_v11 = vrot.slane %v8736_v13, %v8824_v30 }
 0x104   : > { %v8805_v5 = vpop.xlane.xlu1 %983  ;;  %v8809_v9 = vpop.xlane.xlu0 %981  ;;  %v1484_v34 = vrot.slane %v8742_v17, %v8827_v31  ;;  %v1554_v3 = vrot.slane %v8758_v28, %v8815_v19 }
 0x105   : > { %v8902_v53 = vcombine.low %v1421_v11, %v1428_v16  ;;  %v4943_v54 = vrot.slane %v8856_v8, %v8854_v59  ;;  %v1519_v8 = vrot.slane %v8748_v21, %v8812_v18  ;;  %v397_v11 = vld [vmem:[%s8652_s2 + $0x358] sm:$0xff]  ;;  %v396_v16 = vld [vmem:[%s8652_s2 + $0x350] sm:$0xff] }
 0x107   : > { %1127 = vadd.xlane.f32.xlu1 %v387_v6  ;;  %1125 = vadd.xlane.f32.xlu0 %v386_v7  ;;  %v1407_v6 = vrot.slane %v8736_v13, %v8812_v18  ;;  %v1414_v7 = vrot.slane %v8736_v13, %v8815_v19  ;;  %v4919_v13 = vcombine.low %v1365_v62, %v1372_v63 }
 0x108   : > { %v8817_v22 = vpop.xlane.xlu1 %987  ;;  %v8821_v27 = vpop.xlane.xlu0 %985  ;;  %v1456_v62 = vrot.slane %v8746_v20, %v8827_v31  ;;  %v4950_v63 = vrot.slane %v4936_v10, %v8854_v59  ;;  %v1526_v20 = vrot.slane %v8748_v21, %v8815_v19 }
 0x109   : > { %v8900_v51 = vcombine.low %v1407_v6, %v1414_v7 }
 0x10b   : > { %1131 = vadd.xlane.f32.xlu1 %v389_v23  ;;  %1129 = vadd.xlane.f32.xlu0 %v388_v26  ;;  %v1470_v23 = vrot.slane %v8742_v17, %v8815_v19  ;;  %v1477_v26 = vrot.slane %v8742_v17, %v8824_v30  ;;  %v4902_v17 = vcombine.low %v1337_v57, %v1344_v60 }
 0x10c   : > { %v8833_v39 = vpop.xlane.xlu1 %991  ;;  %v8837_v46 = vpop.xlane.xlu0 %989  ;;  %v4926_v57 = vrot.slane %v8882_v15, %v8854_v59  ;;  %v8923_v60 = vcombine.low %v1435_v35, %v1442_v38  ;;  %v1540_v15 = vrot.slane %v8748_v21, %v8827_v31  ;;  %v1505_v35 = vrot.slane %v8752_v24, %v8824_v30 }
 0x10d   : > { %11762 = vst [vmem:[#allocation10_spill] sm:$0xff] %v8833_v39  ;;  %11763 = vst [vmem:[#allocation11_spill] sm:$0xff] %v8837_v46  ;;  %v8915_v6 = vcombine.low %v1477_v26, %v1484_v34  ;;  %v1498_v26 = vrot.slane %v8752_v24, %v8815_v19  ;;  %v1575_v34 = vrot.slane %v8754_v25, %v8812_v18 }
 0x10e   : > { %v1589_v38 = vrot.slane %v8754_v25, %v8824_v30 }
 0x10f   : > { %1135 = vadd.xlane.f32.xlu1 %v391_v42  ;;  %1133 = vadd.xlane.f32.xlu0 %v390_v43  ;;  %v395_v43 = vld [vmem:[%s8652_s2 + $0x348] sm:$0xff] }
 0x110   : > { %v8864_v0 = vpop.xlane.xlu1 %995  ;;  %v8868_v4 = vpop.xlane.xlu0 %993 }
 0x111   : > { %11764 = vst [vmem:[#allocation12_spill] sm:$0xff] %v8864_v0  ;;  %11765 = vst [vmem:[#allocation13_spill] sm:$0xff] %v8868_v4  ;;  %v8973_v4 = vcombine.low %v4943_v54, %v4950_v63  ;;  %v401_v63 = vld [vmem:[%s8652_s2 + $0x378] sm:$0xff] }
 0x113   : > { %1139 = vadd.xlane.f32.xlu1 %v393_v1  ;;  %1137 = vadd.xlane.f32.xlu0 %v392_v2  ;;  %v4909_v1 = vrot.slane %v8878_v12, %v8854_v59  ;;  %v8913_v2 = vcombine.low %v1463_v14, %v1470_v23  ;;  %v4933_v12 = vrot.slane %v4919_v13, %v8854_v59 }
 0x114   : > { %v8894_v42 = vpop.xlane.xlu1 %999  ;;  %v8898_v50 = vpop.xlane.xlu0 %997  ;;  %v1533_v14 = vrot.slane %v8748_v21, %v8824_v30  ;;  %v1491_v23 = vrot.slane %v8752_v24, %v8812_v18  ;;  %v1582_v13 = vrot.slane %v8754_v25, %v8815_v19  ;;  %v1512_v21 = vrot.slane %v8752_v24, %v8827_v31  ;;  %11771 = vst [vmem:[#allocation19_spill] sm:$0xff] %v8973_v4 }
 0x115   : > { %11766 = vst [vmem:[#allocation14_spill] sm:$0xff] %v8894_v42  ;;  %11767 = vst [vmem:[#allocation15_spill] sm:$0xff] %v8898_v50  ;;  %v1568_v24 = vrot.slane %v8758_v28, %v8827_v31  ;;  %v399_v50 = vld [vmem:[%s8652_s2 + $0x368] sm:$0xff]  ;;  %v8971_v42 = vcombine.low %v1449_v56, %v1456_v62  ;;  %v8985_v56 = vcombine.low %v1547_v55, %v1554_v3 }
 0x116   : > { %v5054_v0 = vcombine.low %v1575_v34, %v1582_v13  ;;  %v8975_v46 = vcombine.low %v1491_v23, %v1498_v26  ;;  %v1645_v23 = vrot.slane %v8760_v29, %v8824_v30  ;;  %v1652_v55 = vrot.slane %v8760_v29, %v8827_v31 }
 0x117   : > { %1143 = vadd.xlane.f32.xlu1 %v395_v43  ;;  %1141 = vadd.xlane.f32.xlu0 %v394_v47  ;;  %v1596_v43 = vrot.slane %v8754_v25, %v8827_v31  ;;  %v4916_v47 = vrot.slane %v4902_v17, %v8854_v59  ;;  %v398_v25 = vld [vmem:[%s8652_s2 + $0x360] sm:$0xff]  ;;  %v8969_v17 = vcombine.low %v1533_v14, %v1540_v15  ;;  %v400_v14 = vld [vmem:[%s8652_s2 + $0x370] sm:$0xff] }
 0x118   : > { %v8925_v7 = vpop.xlane.xlu1 %1003  ;;  %v8929_v10 = vpop.xlane.xlu0 %1001  ;;  %v4967_v3 = vrot.slane %v8902_v53, %v8854_v59  ;;  %v5062_v53 = vrot.slane %v5054_v0, %v8854_v59  ;;  %v1687_v13 = vrot.slane %v8766_v33, %v8812_v18  ;;  %v1666_v0 = vrot.slane %v8770_v36, %v8815_v19 }
 0x119   : > { %11768 = vst [vmem:[#allocation16_spill] sm:$0xff] %v8925_v7  ;;  %11769 = vst [vmem:[#allocation17_spill] sm:$0xff] %v8929_v10  ;;  %v1561_v10 = vrot.slane %v8758_v28, %v8824_v30  ;;  %v8977_v28 = vcombine.low %v1505_v35, %v1512_v21  ;;  %v5055_v39 = vcombine.low %v1589_v38, %v1596_v43  ;;  %v403_v43 = vld [vmem:[%s8652_s2 + $0x388] sm:$0xff] }
 0x11a   : > { %v1694_v35 = vrot.slane %v8766_v33, %v8815_v19  ;;  %v1701_v21 = vrot.slane %v8766_v33, %v8824_v30 }
 0x11b   : > { %1147 = vadd.xlane.f32.xlu1 %v397_v11  ;;  %1145 = vadd.xlane.f32.xlu0 %v396_v16  ;;  %v8967_v16 = vcombine.low %v1519_v8, %v1526_v20  ;;  %v1631_v8 = vrot.slane %v8760_v29, %v8812_v18  ;;  %v1638_v20 = vrot.slane %v8760_v29, %v8815_v19 }
 0x11c   : > { %v8961_v7 = vpop.xlane.xlu1 %1007  ;;  %v8965_v11 = vpop.xlane.xlu0 %1005  ;;  %v8987_v54 = vcombine.low %v1561_v10, %v1568_v24  ;;  %v1617_v10 = vrot.slane %v8764_v32, %v8824_v30  ;;  %v1624_v29 = vrot.slane %v8764_v32, %v8827_v31  ;;  %v5069_v34 = vrot.slane %v5055_v39, %v8854_v59 }
 0x11d   : > { %11770 = vst [vmem:[#allocation18_spill] sm:$0xff] %v8961_v7  ;;  %v8979_v7 = vcombine.low %v4926_v57, %v4933_v12  ;;  %v8995_v57 = vcombine.low %v4909_v1, %v4916_v47  ;;  %v4960_v12 = vrot.slane %v8900_v51, %v8854_v59  ;;  %v1603_v1 = vrot.slane %v8764_v32, %v8812_v18  ;;  %v402_v47 = vld [vmem:[%s8652_s2 + $0x380] sm:$0xff] }
 0x11e   : > { %v1610_v51 = vrot.slane %v8764_v32, %v8815_v19  ;;  %v9015_v26 = vcombine.low %v1631_v8, %v1638_v20  ;;  %v1708_v32 = vrot.slane %v8766_v33, %v8827_v31  ;;  %v1659_v39 = vrot.slane %v8770_v36, %v8812_v18 }
 0x11f   : > { %1151 = vadd.xlane.f32.xlu1 %v399_v50  ;;  %1149 = vadd.xlane.f32.xlu0 %v398_v25  ;;  %11772 = vst [vmem:[#allocation20_spill] sm:$0xff] %v8995_v57  ;;  %v1673_v25 = vrot.slane %v8770_v36, %v8824_v30  ;;  %v1680_v33 = vrot.slane %v8770_v36, %v8827_v31 }
 0x120   : > { %v8989_v62 = vpop.xlane.xlu1 %1011  ;;  %v8993_v15 = vpop.xlane.xlu0 %1009  ;;  %v5089_v8 = vcombine.low %v1645_v23, %v1652_v55  ;;  %v9041_v20 = vcombine.low %v1603_v1, %v1610_v51  ;;  %v1750_v50 = vrot.slane %v8772_v37, %v8815_v19  ;;  %v9053_v36 = vcombine.low %v1687_v13, %v1694_v35 }
 0x121   : > { %v9055_v23 = vcombine.low %v1701_v21, %v1708_v32  ;;  %v9057_v55 = vcombine.low %v1617_v10, %v1624_v29  ;;  %v9067_v57 = vcombine.low %v1659_v39, %v1666_v0  ;;  %v9069_v4 = vcombine.low %v1673_v25, %v1680_v33 }
 0x122   : > { %v5096_v10 = vrot.slane %v9015_v26, %v8854_v59  ;;  %v1715_v29 = vrot.slane %v8776_v40, %v8812_v18  ;;  %v1722_v13 = vrot.slane %v8776_v40, %v8815_v19  ;;  %v5103_v26 = vrot.slane %v5089_v8, %v8854_v59 }
 0x123   : > { %1155 = vadd.xlane.f32.xlu1 %v401_v63  ;;  %1153 = vadd.xlane.f32.xlu0 %v400_v14  ;;  %v1743_v63 = vrot.slane %v8772_v37, %v8812_v18  ;;  %v9045_v14 = vcombine.low %v4960_v12, %v4967_v3  ;;  %v405_v12 = vld [vmem:[%s8652_s2 + $0x398] sm:$0xff]  ;;  %v404_v3 = vld [vmem:[%s8652_s2 + $0x390] sm:$0xff]  ;;  %v1799_v21 = vrot.slane %v8778_v41, %v8812_v18 }
 0x124   : > { %v9027_v38 = vpop.xlane.xlu1 %1015  ;;  %v9031_v24 = vpop.xlane.xlu0 %1013  ;;  %v1806_v32 = vrot.slane %v8778_v41, %v8815_v19  ;;  %v1771_v39 = vrot.slane %v8782_v44, %v8812_v18  ;;  %v1778_v0 = vrot.slane %v8782_v44, %v8815_v19  ;;  %v1785_v25 = vrot.slane %v8782_v44, %v8824_v30 }
 0x125   : > { %11773 = vst [vmem:[#allocation21_spill] sm:$0xff] %v9027_v38  ;;  %11774 = vst [vmem:[#allocation22_spill] sm:$0xff] %v9031_v24  ;;  %v1757_v24 = vrot.slane %v8772_v37, %v8824_v30  ;;  %v1764_v38 = vrot.slane %v8772_v37, %v8827_v31  ;;  %v4984_v37 = vrot.slane %v8971_v42, %v8854_v59 }
 0x126   : > { %11775 = vst [vmem:[#allocation23_spill] sm:$0xff] %v9045_v14  ;;  %v9065_v14 = vcombine.low %v5062_v53, %v5069_v34  ;;  %v1729_v53 = vrot.slane %v8776_v40, %v8824_v30  ;;  %v1736_v34 = vrot.slane %v8776_v40, %v8827_v31  ;;  %v9083_v35 = vcombine.low %v1743_v63, %v1750_v50 }
 0x127   : > { %1159 = vadd.xlane.f32.xlu1 %v403_v43  ;;  %1157 = vadd.xlane.f32.xlu0 %v402_v47  ;;  %v9085_v42 = vcombine.low %v1757_v24, %v1764_v38  ;;  %v1813_v43 = vrot.slane %v8778_v41, %v8824_v30  ;;  %v1820_v40 = vrot.slane %v8778_v41, %v8827_v31  ;;  %v407_v38 = vld [vmem:[%s8652_s2 + $0x3a8] sm:$0xff]  ;;  %v406_v47 = vld [vmem:[%s8652_s2 + $0x3a0] sm:$0xff] }
 0x128   : > { %v9059_v1 = vpop.xlane.xlu1 %1019  ;;  %v9063_v51 = vpop.xlane.xlu0 %1017  ;;  %v1792_v41 = vrot.slane %v8782_v44, %v8827_v31  ;;  %v9110_v33 = vcombine.low %v1715_v29, %v1722_v13  ;;  %v9112_v8 = vcombine.low %v1729_v53, %v1736_v34  ;;  %v1855_v63 = vrot.slane %v8784_v45, %v8812_v18 }
 0x129   : > { %11776 = vst [vmem:[#allocation24_spill] sm:$0xff] %v9063_v51  ;;  %v1876_v44 = vrot.slane %v8784_v45, %v8827_v31  ;;  %v9127_v29 = vcombine.low %v1799_v21, %v1806_v32  ;;  %v9129_v13 = vcombine.low %v1813_v43, %v1820_v40  ;;  %v9141_v51 = vcombine.low %v1771_v39, %v1778_v0  ;;  %v410_v0 = vld [vmem:[%s8652_s2 + $0x3c0] sm:$0xff] }
 0x12a   : > { %v5001_v21 = vrot.slane %v8915_v6, %v8854_v59  ;;  %v5130_v32 = vrot.slane %v9053_v36, %v8854_v59  ;;  %v1827_v43 = vrot.slane %v8788_v48, %v8812_v18  ;;  %v5137_v36 = vrot.slane %v9055_v23, %v8854_v59 }
 0x12b   : > { %1163 = vadd.xlane.f32.xlu1 %v405_v12  ;;  %1161 = vadd.xlane.f32.xlu0 %v404_v3  ;;  %v11779_v12 = vrot.slane %v8923_v60, %v8854_v59  ;;  %v409_v60 = vld [vmem:[%s8652_s2 + $0x3b8] sm:$0xff]  ;;  %11784 = vst [vmem:[#allocation31_spill] sm:$0xff] %v9141_v51  ;;  %v1925_v39 = vrot.slane %v8790_v49, %v8824_v30 }
 0x12c   : > { %v9096_v50 = vpop.xlane.xlu1 %1023  ;;  %v9100_v24 = vpop.xlane.xlu0 %1021  ;;  %v1883_v23 = vrot.slane %v8794_v52, %v8812_v18 }
 0x12d   : > { %11777 = vst [vmem:[#allocation25_spill] sm:$0xff] %v9096_v50  ;;  %11778 = vst [vmem:[#allocation26_spill] sm:$0xff] %v9100_v24  ;;  %v9119_v3 = vcombine.low %v11779_v12, %v4984_v37  ;;  %v1862_v24 = vrot.slane %v8784_v45, %v8815_v19  ;;  %v1869_v50 = vrot.slane %v8784_v45, %v8824_v30  ;;  %v408_v37 = vld [vmem:[%s8652_s2 + $0x3b0] sm:$0xff] }
 0x12e   : > { %v9137_v12 = vcombine.low %v5096_v10, %v5103_v26  ;;  %v9143_v45 = vcombine.low %v1785_v25, %v1792_v41  ;;  %v1834_v10 = vrot.slane %v8788_v48, %v8815_v19  ;;  %v1848_v26 = vrot.slane %v8788_v48, %v8827_v31 }
 0x12f   : > { %11780 = vst [vmem:[#allocation27_spill] sm:$0xff] %v9119_v3  ;;  %1167 = vadd.xlane.f32.xlu1 %v407_v38  ;;  %1165 = vadd.xlane.f32.xlu0 %v406_v47  ;;  %v4994_v3 = vrot.slane %v8913_v2, %v8854_v59  ;;  %v1841_v2 = vrot.slane %v8788_v48, %v8824_v30 }
 0x130   : > { %v9131_v53 = vpop.xlane.xlu1 %1027  ;;  %v9135_v34 = vpop.xlane.xlu0 %1025  ;;  %11783 = vst [vmem:[#allocation30_spill] sm:$0xff] %v9137_v12  ;;  %11785 = vst [vmem:[#allocation32_spill] sm:$0xff] %v9143_v45  ;;  %v9157_v40 = vcombine.low %v1855_v63, %v1862_v24  ;;  %v9159_v6 = vcombine.low %v1869_v50, %v1876_v44  ;;  %v1911_v38 = vrot.slane %v8790_v49, %v8812_v18  ;;  %v411_v50 = vld [vmem:[%s8652_s2 + $0x3c8] sm:$0xff]  ;;  %v413_v45 = vld [vmem:[%s8652_s2 + $0x3d8] sm:$0xff] }
 0x131   : > { %11781 = vst [vmem:[#allocation28_spill] sm:$0xff] %v9131_v53  ;;  %11782 = vst [vmem:[#allocation29_spill] sm:$0xff] %v9135_v34  ;;  %v1918_v47 = vrot.slane %v8790_v49, %v8815_v19  ;;  %v1932_v48 = vrot.slane %v8790_v49, %v8827_v31  ;;  %v1890_v41 = vrot.slane %v8794_v52, %v8815_v19 }
 0x132   : > { %v1897_v63 = vrot.slane %v8794_v52, %v8824_v30  ;;  %v1904_v44 = vrot.slane %v8794_v52, %v8827_v31  ;;  %v1967_v49 = vrot.slane %v8796_v58, %v8812_v18  ;;  %v1981_v34 = vrot.slane %v8796_v58, %v8824_v30 }
 0x133   : > { %1171 = vadd.xlane.f32.xlu1 %v409_v60  ;;  %1169 = vadd.xlane.f32.xlu0 %v408_v37  ;;  %v9187_v60 = vcombine.low %v4994_v3, %v5001_v21  ;;  %v5011_v37 = vrot.slane %v8975_v46, %v8854_v59  ;;  %v1988_v52 = vrot.slane %v8796_v58, %v8827_v31 }
 0x134   : > { %v9171_v24 = vpop.xlane.xlu1 %1031  ;;  %v9175_v25 = vpop.xlane.xlu0 %1029  ;;  %v9199_v53 = vcombine.low %v1911_v38, %v1918_v47  ;;  %v9201_v3 = vcombine.low %v1925_v39, %v1932_v48  ;;  %v9203_v21 = vcombine.low %v1827_v43, %v1834_v10  ;;  %v9205_v46 = vcombine.low %v1841_v2, %v1848_v26 }
 0x135   : > { %11786 = vst [vmem:[#allocation33_spill] sm:$0xff] %v9171_v24  ;;  %11787 = vst [vmem:[#allocation34_spill] sm:$0xff] %v9175_v25  ;;  %v5018_v25 = vrot.slane %v8977_v28, %v8854_v59  ;;  %v1974_v24 = vrot.slane %v8796_v58, %v8815_v19  ;;  %v9213_v12 = vcombine.low %v1883_v23, %v1890_v41  ;;  %v414_v23 = vld [vmem:[%s8652_s2 + $0x3e0] sm:$0xff] }
 0x136   : > { %11788 = vst [vmem:[#allocation35_spill] sm:$0xff] %v9187_v60  ;;  %11789 = vst [vmem:[#allocation36_spill] sm:$0xff] %v9203_v21  ;;  %v412_v60 = vld [vmem:[%s8652_s2 + $0x3d0] sm:$0xff]  ;;  %v9215_v58 = vcombine.low %v1897_v63, %v1904_v44  ;;  %v9217_v38 = vcombine.low %v5130_v32, %v5137_v36  ;;  %v5164_v43 = vrot.slane %v9083_v35, %v8854_v59 }
 0x137   : > { %1175 = vadd.xlane.f32.xlu1 %v411_v50  ;;  %1173 = vadd.xlane.f32.xlu0 %v410_v0  ;;  %11790 = vst [vmem:[#allocation37_spill] sm:$0xff] %v9205_v46  ;;  %11793 = vst [vmem:[#allocation40_spill] sm:$0xff] %v9213_v12  ;;  %v1939_v10 = vrot.slane %v8800_v61, %v8812_v18  ;;  %v1946_v2 = vrot.slane %v8800_v61, %v8815_v19  ;;  %v415_v0 = vld [vmem:[%s8652_s2 + $0x3e8] sm:$0xff] }
 0x138   : > { %v9207_v28 = vpop.xlane.xlu1 %1035  ;;  %v9211_v51 = vpop.xlane.xlu0 %1033  ;;  %11794 = vst [vmem:[#allocation41_spill] sm:$0xff] %v9215_v58  ;;  %v1953_v26 = vrot.slane %v8800_v61, %v8824_v30  ;;  %v1960_v47 = vrot.slane %v8800_v61, %v8827_v31  ;;  %v9229_v39 = vcombine.low %v1967_v49, %v1974_v24  ;;  %v9231_v48 = vcombine.low %v1981_v34, %v1988_v52 }
 0x139   : > { %11791 = vst [vmem:[#allocation38_spill] sm:$0xff] %v9207_v28  ;;  %11792 = vst [vmem:[#allocation39_spill] sm:$0xff] %v9211_v51  ;;  %v9233_v32 = vcombine.low %v5011_v37, %v5018_v25  ;;  %v2023_v35 = vrot.slane %v8805_v5, %v8812_v18  ;;  %v2030_v36 = vrot.slane %v8805_v5, %v8815_v19 }
 0x13a   : > { %v5171_v61 = vrot.slane %v9085_v42, %v8854_v59  ;;  %v5028_v34 = vrot.slane %v8967_v16, %v8854_v59  ;;  %v2044_v24 = vrot.slane %v8805_v5, %v8827_v31  ;;  %v1995_v25 = vrot.slane %v8809_v9, %v8812_v18 }
 0x13b   : > { %1179 = vadd.xlane.f32.xlu1 %v413_v45  ;;  %1177 = vadd.xlane.f32.xlu0 %v412_v60  ;;  %11795 = vst [vmem:[#allocation42_spill] sm:$0xff] %v9233_v32  ;;  %v2037_v45 = vrot.slane %v8805_v5, %v8824_v30  ;;  %v2002_v63 = vrot.slane %v8809_v9, %v8815_v19 }
 0x13c   : > { %v9239_v50 = vpop.xlane.xlu1 %1039  ;;  %v9243_v41 = vpop.xlane.xlu0 %1037  ;;  %v2079_v42 = vrot.slane %v8817_v22, %v8812_v18  ;;  %v2009_v16 = vrot.slane %v8809_v9, %v8824_v30  ;;  %v2016_v44 = vrot.slane %v8809_v9, %v8827_v31  ;;  %v5035_v5 = vrot.slane %v8969_v17, %v8854_v59 }
 0x13d   : > { %11796 = vst [vmem:[#allocation43_spill] sm:$0xff] %v9239_v50  ;;  %11797 = vst [vmem:[#allocation44_spill] sm:$0xff] %v9243_v41  ;;  %v2086_v49 = vrot.slane %v8817_v22, %v8815_v19  ;;  %v2093_v60 = vrot.slane %v8817_v22, %v8824_v30  ;;  %v2100_v37 = vrot.slane %v8817_v22, %v8827_v31  ;;  %v417_v41 = vld [vmem:[%s8652_s2 + $0x3f8] sm:$0xff]  ;;  %v416_v50 = vld [vmem:[%s8652_s2 + $0x3f0] sm:$0xff] }
 0x13e   : > { %v2051_v52 = vrot.slane %v8821_v27, %v8812_v18  ;;  %v2058_v9 = vrot.slane %v8821_v27, %v8815_v19  ;;  %v2065_v17 = vrot.slane %v8821_v27, %v8824_v30  ;;  %v2072_v58 = vrot.slane %v8821_v27, %v8827_v31 }
 0x13f   : > { %1183 = vadd.xlane.f32.xlu1 %v415_v0  ;;  %1181 = vadd.xlane.f32.xlu0 %v414_v23  ;;  %v9285_v22 = vcombine.low %v2023_v35, %v2030_v36  ;;  %v9287_v0 = vcombine.low %v2037_v45, %v2044_v24  ;;  %v9289_v23 = vcombine.low %v1939_v10, %v1946_v2  ;;  %v11805_v35 = vld [vmem:[#allocation10_spill] sm:$0xff] }
 0x140   : > { %v9279_v12 = vpop.xlane.xlu1 %1043  ;;  %v9283_v51 = vpop.xlane.xlu0 %1041  ;;  %v9291_v28 = vcombine.low %v1953_v26, %v1960_v47  ;;  %v9293_v46 = vcombine.low %v1995_v25, %v2002_v63  ;;  %v9295_v21 = vcombine.low %v2009_v16, %v2016_v44  ;;  %v9297_v32 = vcombine.low %v5164_v43, %v5171_v61  ;;  %v11814_v44 = vld [vmem:[#allocation12_spill] sm:$0xff] }
 0x141   : > { %11798 = vst [vmem:[#allocation45_spill] sm:$0xff] %v9279_v12  ;;  %11799 = vst [vmem:[#allocation46_spill] sm:$0xff] %v9283_v51  ;;  %v5198_v27 = vrot.slane %v9127_v29, %v8854_v59  ;;  %v9301_v12 = vcombine.low %v2079_v42, %v2086_v49  ;;  %v2135_v36 = vrot.slane %v11805_v35, %v8812_v18 }
 0x142   : > { %11800 = vst [vmem:[#allocation47_spill] sm:$0xff] %v9289_v23  ;;  %11801 = vst [vmem:[#allocation48_spill] sm:$0xff] %v9291_v28  ;;  %v2142_v10 = vrot.slane %v11805_v35, %v8815_v19  ;;  %v9307_v2 = vcombine.low %v2093_v60, %v2100_v37  ;;  %v9309_v26 = vcombine.low %v2051_v52, %v2058_v9  ;;  %v11815_v52 = vld [vmem:[#allocation13_spill] sm:$0xff] }
 0x143   : > { %11802 = vst [vmem:[#allocation49_spill] sm:$0xff] %v9293_v46  ;;  %11803 = vst [vmem:[#allocation50_spill] sm:$0xff] %v9295_v21  ;;  %1187 = vadd.xlane.f32.xlu1 %v417_v41  ;;  %1185 = vadd.xlane.f32.xlu0 %v416_v50  ;;  %v9311_v47 = vcombine.low %v2065_v17, %v2072_v58  ;;  %v9317_v29 = vcombine.low %v5028_v34, %v5035_v5  ;;  %v11812_v58 = vld [vmem:[#allocation11_spill] sm:$0xff] }
 0x144   : > { %11804 = vst [vmem:[#allocation51_spill] sm:$0xff] %v9301_v12  ;;  %11806 = vst [vmem:[#allocation10_spill] sm:$0xff] %v9307_v2  ;;  %v9313_v43 = vpop.xlane.xlu1 %1047  ;;  %v9315_v61 = vpop.xlane.xlu0 %1045  ;;  %v2149_v45 = vrot.slane %v11805_v35, %v8824_v30  ;;  %v2156_v24 = vrot.slane %v11805_v35, %v8827_v31  ;;  %v5205_v50 = vrot.slane %v9129_v13, %v8854_v59  ;;  %v11819_v46 = vld [vmem:[#allocation15_spill] sm:$0xff] }
 0x145   : > { %11807 = vst [vmem:[#allocation52_spill] sm:$0xff] %v9309_v26  ;;  %11808 = vst [vmem:[#allocation53_spill] sm:$0xff] %v9311_v47  ;;  %v5045_v41 = vrot.slane %v8985_v56, %v8854_v59  ;;  %v2107_v25 = vrot.slane %v11812_v58, %v8812_v18  ;;  %v2114_v63 = vrot.slane %v11812_v58, %v8815_v19 }
 0x146   : > { %11809 = vst [vmem:[#allocation54_spill] sm:$0xff] %v9313_v43  ;;  %11810 = vst [vmem:[#allocation55_spill] sm:$0xff] %v9315_v61  ;;  %v2121_v34 = vrot.slane %v11812_v58, %v8824_v30  ;;  %v2128_v42 = vrot.slane %v11812_v58, %v8827_v31  ;;  %v9335_v16 = vcombine.low %v2135_v36, %v2142_v10  ;;  %v11818_v58 = vld [vmem:[#allocation14_spill] sm:$0xff] }
 0x147   : > { %11811 = vst [vmem:[#allocation56_spill] sm:$0xff] %v9317_v29  ;;  %v2191_v13 = vrot.slane %v11814_v44, %v8812_v18  ;;  %v5052_v56 = vrot.slane %v8987_v54, %v8854_v59  ;;  %v5232_v5 = vrot.slane %v9157_v40, %v8854_v59  ;;  %v2198_v49 = vrot.slane %v11814_v44, %v8815_v19 }
 0x148   : > { %11813 = vst [vmem:[#allocation11_spill] sm:$0xff] %v9335_v16  ;;  %v2205_v60 = vrot.slane %v11814_v44, %v8824_v30  ;;  %v2212_v37 = vrot.slane %v11814_v44, %v8827_v31  ;;  %v2163_v9 = vrot.slane %v11815_v52, %v8812_v18  ;;  %v9351_v17 = vpop.xlane.xlu1 %1051  ;;  %v9353_v35 = vpop.xlane.xlu0 %1049  ;;  %v2170_v54 = vrot.slane %v11815_v52, %v8815_v19 }
 0x149   : > { %11816 = vst [vmem:[#allocation12_spill] sm:$0xff] %v9351_v17  ;;  %11817 = vst [vmem:[#allocation13_spill] sm:$0xff] %v9353_v35  ;;  %v2177_v40 = vrot.slane %v11815_v52, %v8824_v30  ;;  %v2184_v36 = vrot.slane %v11815_v52, %v8827_v31  ;;  %v5239_v10 = vrot.slane %v9159_v6, %v8854_v59 }
 0x14a   : > { %v2247_v44 = vrot.slane %v11818_v58, %v8812_v18  ;;  %v2254_v47 = vrot.slane %v11818_v58, %v8815_v19  ;;  %v2261_v26 = vrot.slane %v11818_v58, %v8824_v30  ;;  %v2268_v21 = vrot.slane %v11818_v58, %v8827_v31 }
 0x14b   : > { %v2219_v35 = vrot.slane %v11819_v46, %v8812_v18  ;;  %v2226_v52 = vrot.slane %v11819_v46, %v8815_v19  ;;  %v2233_v6 = vrot.slane %v11819_v46, %v8824_v30  ;;  %v2240_v17 = vrot.slane %v11819_v46, %v8827_v31 }
 0x14c   : > { %v9379_v28 = vcombine.low %v2149_v45, %v2156_v24  ;;  %v9381_v61 = vcombine.low %v2107_v25, %v2114_v63  ;;  %v9383_v23 = vcombine.low %v2121_v34, %v2128_v42  ;;  %v9385_v43 = vpop.xlane.xlu1 %1055  ;;  %v9387_v58 = vpop.xlane.xlu0 %1053  ;;  %v9389_v51 = vcombine.low %v5198_v27, %v5205_v50 }
 0x14d   : > { %v9391_v16 = vcombine.low %v2191_v13, %v2198_v49  ;;  %v9393_v29 = vcombine.low %v2205_v60, %v2212_v37  ;;  %v9395_v2 = vcombine.low %v2163_v9, %v2170_v54  ;;  %v9397_v12 = vcombine.low %v5045_v41, %v5052_v56  ;;  %v11826_v41 = vld [vmem:[#allocation16_spill] sm:$0xff]  ;;  %v11827_v56 = vld [vmem:[#allocation17_spill] sm:$0xff]  ;;  %v11828_v37 = vld [vmem:[#allocation18_spill] sm:$0xff] }
 0x14e   : > { %11820 = vst [vmem:[#allocation14_spill] sm:$0xff] %v9381_v61  ;;  %11821 = vst [vmem:[#allocation15_spill] sm:$0xff] %v9383_v23  ;;  %v9399_v46 = vcombine.low %v2247_v44, %v2254_v47  ;;  %v9401_v45 = vcombine.low %v2261_v26, %v2268_v21  ;;  %v9403_v24 = vcombine.low %v2177_v40, %v2184_v36 }
 0x14f   : > { %11822 = vst [vmem:[#allocation57_spill] sm:$0xff] %v9395_v2  ;;  %v5079_v25 = vrot.slane %v9041_v20, %v8854_v59  ;;  %v9407_v63 = vcombine.low %v2219_v35, %v2226_v52  ;;  %v9409_v27 = vcombine.low %v2233_v6, %v2240_v17  ;;  %v9411_v50 = vcombine.low %v5232_v5, %v5239_v10  ;;  %v11844_v2 = vld [vmem:[#allocation24_spill] sm:$0xff] }
 0x150   : > { %11823 = vst [vmem:[#allocation58_spill] sm:$0xff] %v9403_v24  ;;  %v5086_v34 = vrot.slane %v9057_v55, %v8854_v59  ;;  %v2303_v47 = vrot.slane %v11826_v41, %v8812_v18  ;;  %v2310_v21 = vrot.slane %v11826_v41, %v8815_v19  ;;  %v2317_v26 = vrot.slane %v11826_v41, %v8824_v30  ;;  %v9423_v42 = vpop.xlane.xlu1 %1059  ;;  %v9425_v13 = vpop.xlane.xlu0 %1057 }
 0x151   : > { %11824 = vst [vmem:[#allocation59_spill] sm:$0xff] %v9407_v63  ;;  %11825 = vst [vmem:[#allocation60_spill] sm:$0xff] %v9409_v27  ;;  %v2324_v20 = vrot.slane %v11826_v41, %v8827_v31  ;;  %v2275_v5 = vrot.slane %v11827_v56, %v8812_v18  ;;  %v2282_v55 = vrot.slane %v11827_v56, %v8815_v19 }
 0x152   : > { %v2289_v49 = vrot.slane %v11827_v56, %v8824_v30  ;;  %v5266_v60 = vrot.slane %v9199_v53, %v8854_v59  ;;  %v2359_v9 = vrot.slane %v11828_v37, %v8812_v18  ;;  %v2366_v17 = vrot.slane %v11828_v37, %v8815_v19 }
 0x153   : > { %v2296_v35 = vrot.slane %v11827_v56, %v8827_v31  ;;  %v5273_v54 = vrot.slane %v9201_v3, %v8854_v59  ;;  %v2373_v40 = vrot.slane %v11828_v37, %v8824_v30  ;;  %v2380_v36 = vrot.slane %v11828_v37, %v8827_v31 }
 0x154   : > { %v2331_v53 = vrot.slane %v8965_v11, %v8812_v18  ;;  %v2338_v10 = vrot.slane %v8965_v11, %v8815_v19  ;;  %v9451_v44 = vcombine.low %v2303_v47, %v2310_v21  ;;  %v9453_v52 = vcombine.low %v2317_v26, %v2324_v20  ;;  %v9459_v41 = vpop.xlane.xlu1 %1063  ;;  %7081 = vperm.xlu1 %8353, %v8979_v7   ;;  %v9462_v56 = vpop.xlane.xlu0 %1061 }
 0x155   : > { %v2345_v6 = vrot.slane %v8965_v11, %v8824_v30  ;;  %v2352_v3 = vrot.slane %v8965_v11, %v8827_v31  ;;  %v9464_v37 = vcombine.low %v2275_v5, %v2282_v55  ;;  %v2415_v47 = vrot.slane %v8989_v62, %v8812_v18 }
 0x156   : > { %v2422_v21 = vrot.slane %v8989_v62, %v8815_v19  ;;  %v9470_v26 = vcombine.low %v5079_v25, %v5086_v34  ;;  %v9472_v20 = vcombine.low %v2289_v49, %v2296_v35  ;;  %v2429_v11 = vrot.slane %v8989_v62, %v8824_v30  ;;  %v11833_v35 = vld [vmem:[#allocation19_spill] sm:$0xff] }
 0x157   : > { %11829 = vst [vmem:[#allocation16_spill] sm:$0xff] %v9464_v37  ;;  %v2436_v7 = vrot.slane %v8989_v62, %v8827_v31  ;;  %v5113_v5 = vrot.slane %v9067_v57, %v8854_v59  ;;  %v9480_v55 = vcombine.low %v2359_v9, %v2366_v17  ;;  %v9482_v37 = vcombine.low %v2373_v40, %v2380_v36  ;;  %v11836_v36 = vld [vmem:[#allocation20_spill] sm:$0xff] }
 0x158   : > { %11830 = vst [vmem:[#allocation17_spill] sm:$0xff] %v9472_v20  ;;  %v9484_v27 = vcombine.low %v2331_v53, %v2338_v10  ;;  %v9486_v63 = vcombine.low %v5266_v60, %v5273_v54  ;;  %v9488_v25 = vcombine.low %v2345_v6, %v2352_v3  ;;  %v2387_v34 = vrot.slane %v8993_v15, %v8812_v18  ;;  %v9492_v49 = vpop.xlane.xlu1 %1067  ;;  %v9495_v62 = vpop.xlane.xlu0 %1065 }
 0x159   : > { %7084 = vperm.xlu1 %8353, %v11833_v35   ;;  %11834 = vst [vmem:[#allocation19_spill] sm:$0xff] %v9495_v62  ;;  %v5120_v57 = vrot.slane %v9069_v4, %v8854_v59  ;;  %v5300_v9 = vrot.slane %v9229_v39, %v8854_v59  ;;  %v9501_v17 = vcombine.low %v2415_v47, %v2422_v21  ;;  %v11838_v4 = vld [vmem:[#allocation21_spill] sm:$0xff]  ;;  %v11839_v21 = vld [vmem:[#allocation22_spill] sm:$0xff] }
 0x15a   : > { %11831 = vst [vmem:[#allocation18_spill] sm:$0xff] %v9484_v27  ;;  %11832 = vst [vmem:[#allocation61_spill] sm:$0xff] %v9488_v25  ;;  %v2394_v60 = vrot.slane %v8993_v15, %v8815_v19  ;;  %v2401_v54 = vrot.slane %v8993_v15, %v8824_v30  ;;  %v2408_v40 = vrot.slane %v8993_v15, %v8827_v31  ;;  %7078 = vperm.xlu0 %8352, %v11836_v36   ;;  %v11841_v36 = vld [vmem:[#allocation23_spill] sm:$0xff] }
 0x15b   : > { %11835 = vst [vmem:[#allocation62_spill] sm:$0xff] %v9501_v17  ;;  %v9510_v53 = vcombine.low %v2429_v11, %v2436_v7  ;;  %v2471_v10 = vrot.slane %v11838_v4, %v8812_v18  ;;  %v5307_v39 = vrot.slane %v9231_v48, %v8854_v59  ;;  %v5147_v6 = vrot.slane %v9110_v33, %v8854_v59 }
 0x15c   : > { %v2478_v3 = vrot.slane %v11838_v4, %v8815_v19  ;;  %v2485_v47 = vrot.slane %v11838_v4, %v8824_v30  ;;  %v2492_v15 = vrot.slane %v11838_v4, %v8827_v31  ;;  %v2443_v11 = vrot.slane %v11839_v21, %v8812_v18  ;;  %v9532_v35 = vpop.xlane.xlu1 %1071  ;;  %v9535_v25 = vpop.xlane.xlu0 %1069 }
 0x15d   : > { %11837 = vst [vmem:[#allocation20_spill] sm:$0xff] %v9510_v53  ;;  %v2450_v7 = vrot.slane %v11839_v21, %v8815_v19  ;;  %v2457_v48 = vrot.slane %v11839_v21, %v8824_v30  ;;  %v2464_v33 = vrot.slane %v11839_v21, %v8827_v31  ;;  %11840 = vst [vmem:[#allocation21_spill] sm:$0xff] %v9532_v35  ;;  %7087 = vperm.xlu1 %8353, %v11841_v36  }
 0x15e   : > { %11842 = vst [vmem:[#allocation22_spill] sm:$0xff] %v9535_v25  ;;  %v5154_v4 = vrot.slane %v9112_v8, %v8854_v59  ;;  %v2527_v27 = vrot.slane %v9059_v1, %v8812_v18  ;;  %v2534_v20 = vrot.slane %v9059_v1, %v8815_v19  ;;  %v2541_v24 = vrot.slane %v9059_v1, %v8824_v30 }
 0x15f   : > { %v2548_v21 = vrot.slane %v9059_v1, %v8827_v31  ;;  %7105 = vperm.xlu0 %8352, %v9065_v14   ;;  %v9548_v36 = vcombine.low %v2387_v34, %v2394_v60  ;;  %v2499_v25 = vrot.slane %v11844_v2, %v8812_v18  ;;  %v2506_v8 = vrot.slane %v11844_v2, %v8815_v19 }
 0x160   : > { %v9554_v53 = vcombine.low %v5113_v5, %v5120_v57  ;;  %v9556_v17 = vcombine.low %v2471_v10, %v2478_v3  ;;  %v9558_v35 = vcombine.low %v2485_v47, %v2492_v15  ;;  %v9560_v62 = vcombine.low %v2401_v54, %v2408_v40  ;;  %v9570_v60 = vpop.xlane.xlu1 %1075  ;;  %v9573_v5 = vpop.xlane.xlu0 %1073  ;;  %v11855_v10 = vld [vmem:[#allocation30_spill] sm:$0xff]  ;;  %v11856_v3 = vld [vmem:[#allocation25_spill] sm:$0xff] }
 0x161   : > { %11843 = vst [vmem:[#allocation23_spill] sm:$0xff] %v9548_v36  ;;  %v9562_v23 = vcombine.low %v5300_v9, %v5307_v39  ;;  %v9564_v1 = vcombine.low %v2443_v11, %v2450_v7  ;;  %v9566_v14 = vcombine.low %v2457_v48, %v2464_v33  ;;  %v2513_v34 = vrot.slane %v11844_v2, %v8824_v30  ;;  %v11851_v36 = vld [vmem:[#allocation27_spill] sm:$0xff] }
 0x162   : > { %11845 = vst [vmem:[#allocation24_spill] sm:$0xff] %v9556_v17  ;;  %11846 = vst [vmem:[#allocation63_spill] sm:$0xff] %v9558_v35  ;;  %7090 = vperm.xlu1 %8353, %v11851_v36   ;;  %v5334_v57 = vrot.slane %v9285_v22, %v8854_v59  ;;  %v9577_v54 = vcombine.low %v2527_v27, %v2534_v20  ;;  %v9579_v9 = vcombine.low %v2541_v24, %v2548_v21  ;;  %v11858_v22 = vld [vmem:[#allocation31_spill] sm:$0xff]  ;;  %v11863_v36 = vld [vmem:[#allocation32_spill] sm:$0xff] }
 0x163   : > { %11847 = vst [vmem:[#allocation64_spill] sm:$0xff] %v9560_v62  ;;  %11848 = vst [vmem:[#allocation65_spill] sm:$0xff] %v9564_v1  ;;  %v2520_v40 = vrot.slane %v11844_v2, %v8827_v31  ;;  %7111 = vperm.xlu0 %8352, %v11855_v10   ;;  %v9584_v39 = vcombine.low %v5147_v6, %v5154_v4  ;;  %v2583_v47 = vrot.slane %v11856_v3, %v8812_v18  ;;  %v11859_v6 = vld [vmem:[#allocation26_spill] sm:$0xff]  ;;  %v11861_v4 = vld [vmem:[#allocation35_spill] sm:$0xff] }
 0x164   : > { %11849 = vst [vmem:[#allocation66_spill] sm:$0xff] %v9566_v14  ;;  %11850 = vst [vmem:[#allocation67_spill] sm:$0xff] %v9570_v60  ;;  %v9588_v15 = vcombine.low %v2499_v25, %v2506_v8  ;;  %v5341_v11 = vrot.slane %v9287_v0, %v8854_v59  ;;  %v5181_v27 = vrot.slane %v11858_v22, %v8854_v59  ;;  %v9608_v33 = vpop.xlane.xlu1 %1079  ;;  %v9611_v21 = vpop.xlane.xlu0 %1077  ;;  %v11864_v10 = vld [vmem:[#allocation28_spill] sm:$0xff] }
 0x165   : > { %11852 = vst [vmem:[#allocation27_spill] sm:$0xff] %v9573_v5  ;;  %11853 = vst [vmem:[#allocation68_spill] sm:$0xff] %v9577_v54  ;;  %v2590_v24 = vrot.slane %v11856_v3, %v8815_v19  ;;  %v2597_v2 = vrot.slane %v11856_v3, %v8824_v30  ;;  %v2604_v20 = vrot.slane %v11856_v3, %v8827_v31  ;;  %v11871_v5 = vld [vmem:[#allocation33_spill] sm:$0xff] }
 0x166   : > { %11854 = vst [vmem:[#allocation69_spill] sm:$0xff] %v9579_v9  ;;  %11857 = vst [vmem:[#allocation30_spill] sm:$0xff] %v9588_v15  ;;  %v2555_v7 = vrot.slane %v11859_v6, %v8812_v18  ;;  %v2562_v25 = vrot.slane %v11859_v6, %v8815_v19  ;;  %v2569_v0 = vrot.slane %v11859_v6, %v8824_v30  ;;  %7093 = vperm.xlu1 %8353, %v11861_v4   ;;  %v11865_v4 = vld [vmem:[#allocation29_spill] sm:$0xff] }
 0x167   : > { %v2576_v48 = vrot.slane %v11859_v6, %v8827_v31  ;;  %11860 = vst [vmem:[#allocation25_spill] sm:$0xff] %v9608_v33  ;;  %11862 = vst [vmem:[#allocation31_spill] sm:$0xff] %v9611_v21  ;;  %v5188_v8 = vrot.slane %v11863_v36, %v8854_v59  ;;  %v2639_v3 = vrot.slane %v11864_v10, %v8812_v18  ;;  %7117 = vperm.xlu0 %8352, %v9217_v38  }
 0x168   : > { %v2646_v22 = vrot.slane %v11864_v10, %v8815_v19  ;;  %v2653_v15 = vrot.slane %v11864_v10, %v8824_v30  ;;  %v2660_v6 = vrot.slane %v11864_v10, %v8827_v31  ;;  %v2611_v14 = vrot.slane %v11865_v4, %v8812_v18  ;;  %v9648_v17 = vpop.xlane.xlu1 %1083 }
 0x169   : > { %v2618_v36 = vrot.slane %v11865_v4, %v8815_v19  ;;  %v2625_v1 = vrot.slane %v11865_v4, %v8824_v30  ;;  %v2632_v62 = vrot.slane %v11865_v4, %v8827_v31  ;;  %v9632_v9 = vcombine.low %v2583_v47, %v2590_v24  ;;  %11872 = vst [vmem:[#allocation33_spill] sm:$0xff] %v9648_v17  ;;  %v11873_v47 = vld [vmem:[#allocation42_spill] sm:$0xff]  ;;  %v9651_v24 = vpop.xlane.xlu0 %1081  ;;  %v11885_v4 = vld [vmem:[#allocation56_spill] sm:$0xff] }
 0x16a   : > { %v9634_v54 = vcombine.low %v2597_v2, %v2604_v20  ;;  %v9636_v21 = vcombine.low %v2513_v34, %v2520_v40  ;;  %v9638_v10 = vcombine.low %v5334_v57, %v5341_v11  ;;  %v9640_v38 = vcombine.low %v2555_v7, %v2562_v25  ;;  %7096 = vperm.xlu1 %8353, %v11873_v47   ;;  %v11877_v11 = vld [vmem:[#allocation51_spill] sm:$0xff]  ;;  %v11880_v25 = vld [vmem:[#allocation10_spill] sm:$0xff] }
 0x16b   : > { %11866 = vst [vmem:[#allocation26_spill] sm:$0xff] %v9632_v9  ;;  %v9642_v33 = vcombine.low %v2569_v0, %v2576_v48  ;;  %v2695_v60 = vrot.slane %v11871_v5, %v8812_v18  ;;  %v2702_v35 = vrot.slane %v11871_v5, %v8815_v19  ;;  %11874 = vst [vmem:[#allocation42_spill] sm:$0xff] %v9651_v24  ;;  %7123 = vperm.xlu0 %8352, %v9297_v32   ;;  %v11881_v48 = vld [vmem:[#allocation36_spill] sm:$0xff] }
 0x16c   : > { %11867 = vst [vmem:[#allocation35_spill] sm:$0xff] %v9634_v54  ;;  %11868 = vst [vmem:[#allocation32_spill] sm:$0xff] %v9636_v21  ;;  %v9653_v34 = vcombine.low %v2639_v3, %v2646_v22  ;;  %v9655_v57 = vcombine.low %v2653_v15, %v2660_v6  ;;  %v9658_v40 = vcombine.low %v5181_v27, %v5188_v8  ;;  %v11882_v27 = vld [vmem:[#allocation34_spill] sm:$0xff]  ;;  %v9684_v6 = vpop.xlane.xlu1 %1087 }
 0x16d   : > { %11869 = vst [vmem:[#allocation28_spill] sm:$0xff] %v9640_v38  ;;  %11870 = vst [vmem:[#allocation29_spill] sm:$0xff] %v9642_v33  ;;  %v5368_v2 = vrot.slane %v11877_v11, %v8854_v59  ;;  %v9662_v20 = vcombine.low %v2611_v14, %v2618_v36  ;;  %v9664_v7 = vcombine.low %v2625_v1, %v2632_v62  ;;  %v9687_v36 = vpop.xlane.xlu0 %1085  ;;  %v11888_v11 = vld [vmem:[#allocation38_spill] sm:$0xff]  ;;  %v11891_v38 = vld [vmem:[#allocation43_spill] sm:$0xff] }
 0x16e   : > { %11875 = vst [vmem:[#allocation70_spill] sm:$0xff] %v9653_v34  ;;  %11876 = vst [vmem:[#allocation71_spill] sm:$0xff] %v9655_v57  ;;  %v5375_v0 = vrot.slane %v11880_v25, %v8854_v59  ;;  %v5215_v3 = vrot.slane %v11881_v48, %v8854_v59  ;;  %v2709_v15 = vrot.slane %v11871_v5, %v8824_v30  ;;  %7099 = vperm.xlu1 %8353, %v11885_v4   ;;  %v11889_v48 = vld [vmem:[#allocation11_spill] sm:$0xff]  ;;  %v11892_v34 = vld [vmem:[#allocation44_spill] sm:$0xff] }
 0x16f   : > { %11878 = vst [vmem:[#allocation51_spill] sm:$0xff] %v9662_v20  ;;  %11879 = vst [vmem:[#allocation72_spill] sm:$0xff] %v9664_v7  ;;  %v2716_v32 = vrot.slane %v11871_v5, %v8827_v31  ;;  %v2667_v8 = vrot.slane %v11882_v27, %v8812_v18  ;;  %v2674_v14 = vrot.slane %v11882_v27, %v8815_v19  ;;  %v11887_v5 = vld [vmem:[#allocation37_spill] sm:$0xff]  ;;  %7129 = vperm.xlu0 %8352, %v9389_v51   ;;  %v11890_v7 = vld [vmem:[#allocation39_spill] sm:$0xff] }
 0x170   : > { %v9678_v62 = vcombine.low %v2695_v60, %v2702_v35  ;;  %v2681_v1 = vrot.slane %v11882_v27, %v8824_v30  ;;  %v2688_v22 = vrot.slane %v11882_v27, %v8827_v31  ;;  %11884 = vst [vmem:[#allocation36_spill] sm:$0xff] %v9684_v6  ;;  %11886 = vst [vmem:[#allocation34_spill] sm:$0xff] %v9687_v36  ;;  %v9724_v54 = vpop.xlane.xlu1 %1091 }
 0x171   : > { %v5222_v47 = vrot.slane %v11887_v5, %v8854_v59  ;;  %v2751_v25 = vrot.slane %v11888_v11, %v8812_v18  ;;  %v2758_v35 = vrot.slane %v11888_v11, %v8815_v19  ;;  %v2765_v60 = vrot.slane %v11888_v11, %v8824_v30  ;;  %11893 = vst [vmem:[#allocation56_spill] sm:$0xff] %v9724_v54 }
 0x172   : > { %11883 = vst [vmem:[#allocation10_spill] sm:$0xff] %v9678_v62  ;;  %v5402_v27 = vrot.slane %v11889_v48, %v8854_v59  ;;  %v2772_v4 = vrot.slane %v11888_v11, %v8827_v31  ;;  %v2723_v5 = vrot.slane %v11890_v7, %v8812_v18  ;;  %v2730_v20 = vrot.slane %v11890_v7, %v8815_v19 }
 0x173   : > { %v2737_v33 = vrot.slane %v11890_v7, %v8824_v30  ;;  %v2807_v21 = vrot.slane %v11891_v38, %v8812_v18  ;;  %v2814_v51 = vrot.slane %v11891_v38, %v8815_v19  ;;  %v2744_v48 = vrot.slane %v11890_v7, %v8827_v31  ;;  %7102 = vperm.xlu1 %8353, %v9397_v12   ;;  %v9727_v7 = vpop.xlane.xlu0 %1089 }
 0x174   : > { %v5409_v11 = vrot.slane %v9379_v28, %v8854_v59  ;;  %v2821_v62 = vrot.slane %v11891_v38, %v8824_v30  ;;  %v2828_v57 = vrot.slane %v11891_v38, %v8827_v31  ;;  %v2779_v36 = vrot.slane %v11892_v34, %v8812_v18  ;;  %11894 = vst [vmem:[#allocation37_spill] sm:$0xff] %v9727_v7 }
 0x175   : > { %v2786_v6 = vrot.slane %v11892_v34, %v8815_v19  ;;  %v9729_v9 = vcombine.low %v2709_v15, %v2716_v32  ;;  %v2793_v28 = vrot.slane %v11892_v34, %v8824_v30  ;;  %v2800_v38 = vrot.slane %v11892_v34, %v8827_v31  ;;  %7135 = vperm.xlu0 %8352, %v9411_v50   ;;  %v11902_v34 = vld [vmem:[#allocation40_spill] sm:$0xff] }
 0x176   : > { %v9736_v24 = vcombine.low %v5368_v2, %v5375_v0  ;;  %v9738_v17 = vcombine.low %v2751_v25, %v2758_v35  ;;  %v9740_v61 = vcombine.low %v2765_v60, %v2772_v4  ;;  %v9742_v54 = vcombine.low %v2667_v8, %v2674_v14  ;;  %v9760_v25 = vpop.xlane.xlu1 %1095  ;;  %v11912_v60 = vld [vmem:[#allocation54_spill] sm:$0xff] }
 0x177   : > { %11895 = vst [vmem:[#allocation38_spill] sm:$0xff] %v9729_v9  ;;  %v9744_v12 = vcombine.low %v2681_v1, %v2688_v22  ;;  %v9746_v15 = vcombine.low %v2723_v5, %v2730_v20  ;;  %v9748_v32 = vcombine.low %v2737_v33, %v2744_v48  ;;  %v9750_v7 = vcombine.low %v5215_v3, %v5222_v47  ;;  %v9763_v8 = vpop.xlane.xlu0 %1093  ;;  %v11908_v33 = vld [vmem:[#allocation45_spill] sm:$0xff] }
 0x178   : > { %11896 = vst [vmem:[#allocation11_spill] sm:$0xff] %v9738_v17  ;;  %11897 = vst [vmem:[#allocation39_spill] sm:$0xff] %v9740_v61  ;;  %v5249_v9 = vrot.slane %v11902_v34, %v8854_v59  ;;  %v9754_v50 = vcombine.low %v2807_v21, %v2814_v51  ;;  %v9756_v2 = vcombine.low %v2821_v62, %v2828_v57  ;;  %7108 = vperm.xlu1 %8353, %v9470_v26   ;;  %v11910_v21 = vld [vmem:[#allocation41_spill] sm:$0xff] }
 0x179   : > { %11898 = vst [vmem:[#allocation43_spill] sm:$0xff] %v9742_v54  ;;  %11899 = vst [vmem:[#allocation44_spill] sm:$0xff] %v9744_v12  ;;  %v9758_v0 = vcombine.low %v2779_v36, %v2786_v6  ;;  %v9765_v20 = vcombine.low %v5402_v27, %v5409_v11  ;;  %v2863_v3 = vrot.slane %v11908_v33, %v8812_v18  ;;  %7141 = vperm.xlu0 %8352, %v9486_v63   ;;  %v11911_v6 = vld [vmem:[#allocation46_spill] sm:$0xff]  ;;  %v11915_v11 = vld [vmem:[#allocation47_spill] sm:$0xff] }
 0x17a   : > { %11900 = vst [vmem:[#allocation73_spill] sm:$0xff] %v9746_v15  ;;  %11901 = vst [vmem:[#allocation74_spill] sm:$0xff] %v9748_v32  ;;  %v9769_v14 = vcombine.low %v2793_v28, %v2800_v38  ;;  %v5256_v57 = vrot.slane %v11910_v21, %v8854_v59  ;;  %v5436_v62 = vrot.slane %v9391_v16, %v8854_v59  ;;  %v9798_v51 = vpop.xlane.xlu1 %1099  ;;  %v11916_v38 = vld [vmem:[#allocation55_spill] sm:$0xff] }
 0x17b   : > { %11903 = vst [vmem:[#allocation40_spill] sm:$0xff] %v9754_v50  ;;  %11904 = vst [vmem:[#allocation75_spill] sm:$0xff] %v9756_v2  ;;  %v2870_v26 = vrot.slane %v11908_v33, %v8815_v19  ;;  %v2877_v1 = vrot.slane %v11908_v33, %v8824_v30  ;;  %v2884_v22 = vrot.slane %v11908_v33, %v8827_v31  ;;  %v9801_v48 = vpop.xlane.xlu0 %1097 }
 0x17c   : > { %11905 = vst [vmem:[#allocation76_spill] sm:$0xff] %v9758_v0  ;;  %11906 = vst [vmem:[#allocation77_spill] sm:$0xff] %v9760_v25  ;;  %v2835_v36 = vrot.slane %v11911_v6, %v8812_v18  ;;  %v2842_v63 = vrot.slane %v11911_v6, %v8815_v19  ;;  %v2849_v47 = vrot.slane %v11911_v6, %v8824_v30  ;;  %7114 = vperm.xlu1 %8353, %v9554_v53   ;;  %v11918_v0 = vld [vmem:[#allocation12_spill] sm:$0xff] }
 0x17d   : > { %11907 = vst [vmem:[#allocation78_spill] sm:$0xff] %v9763_v8  ;;  %11909 = vst [vmem:[#allocation45_spill] sm:$0xff] %v9769_v14  ;;  %v2856_v16 = vrot.slane %v11911_v6, %v8827_v31  ;;  %v5443_v35 = vrot.slane %v9393_v29, %v8854_v59  ;;  %v2919_v27 = vrot.slane %v11912_v60, %v8812_v18  ;;  %7147 = vperm.xlu0 %8352, %v9562_v23   ;;  %v11917_v6 = vld [vmem:[#allocation48_spill] sm:$0xff] }
 0x17e   : > { %v2926_v4 = vrot.slane %v11912_v60, %v8815_v19  ;;  %v2933_v5 = vrot.slane %v11912_v60, %v8824_v30  ;;  %11913 = vst [vmem:[#allocation41_spill] sm:$0xff] %v9798_v51  ;;  %11914 = vst [vmem:[#allocation46_spill] sm:$0xff] %v9801_v48  ;;  %v5283_v28 = vrot.slane %v11915_v11, %v8854_v59  ;;  %v9838_v48 = vpop.xlane.xlu1 %1103 }
 0x17f   : > { %v2940_v29 = vrot.slane %v11912_v60, %v8827_v31  ;;  %v2891_v34 = vrot.slane %v11916_v38, %v8812_v18  ;;  %v2898_v33 = vrot.slane %v11916_v38, %v8815_v19  ;;  %v2905_v21 = vrot.slane %v11916_v38, %v8824_v30  ;;  %11920 = vst [vmem:[#allocation54_spill] sm:$0xff] %v9838_v48  ;;  %v9841_v51 = vpop.xlane.xlu0 %1101 }
 0x180   : > { %v2912_v53 = vrot.slane %v11916_v38, %v8827_v31  ;;  %v5290_v11 = vrot.slane %v11917_v6, %v8854_v59  ;;  %v5470_v60 = vrot.slane %v9399_v46, %v8854_v59  ;;  %v5477_v14 = vrot.slane %v9401_v45, %v8854_v59  ;;  %v11919_v6 = vld [vmem:[#allocation13_spill] sm:$0xff]  ;;  %7120 = vperm.xlu1 %8353, %v9584_v39  }
 0x181   : > { %v2975_v32 = vrot.slane %v11918_v0, %v8812_v18  ;;  %v2982_v15 = vrot.slane %v11918_v0, %v8815_v19  ;;  %v2989_v23 = vrot.slane %v11918_v0, %v8824_v30  ;;  %v2996_v38 = vrot.slane %v11918_v0, %v8827_v31  ;;  %7153 = vperm.xlu0 %8352, %v9638_v10  }
 0x182   : > { %v2947_v12 = vrot.slane %v11919_v6, %v8812_v18  ;;  %v2954_v46 = vrot.slane %v11919_v6, %v8815_v19  ;;  %v2961_v45 = vrot.slane %v11919_v6, %v8824_v30  ;;  %v2968_v54 = vrot.slane %v11919_v6, %v8827_v31 }
 0x183   : > { %v9843_v2 = vcombine.low %v2863_v3, %v2870_v26  ;;  %v9845_v0 = vcombine.low %v2877_v1, %v2884_v22  ;;  %v9847_v50 = vcombine.low %v2835_v36, %v2842_v63  ;;  %v5257_v8 = vcombine.low %v5249_v9, %v5256_v57  ;;  %v9868_v9 = vpop.xlane.xlu1 %1107  ;;  %v9871_v10 = vpop.xlane.xlu0 %1105  ;;  %v11926_v36 = vld [vmem:[#allocation50_spill] sm:$0xff] }
 0x184   : > { %v9850_v61 = vcombine.low %v2919_v27, %v2926_v4  ;;  %v9852_v17 = vcombine.low %v2933_v5, %v2940_v29  ;;  %v9854_v6 = vcombine.low %v2849_v47, %v2856_v16  ;;  %v5444_v48 = vcombine.low %v5436_v62, %v5443_v35  ;;  %7126 = vperm.xlu1 %8353, %v9658_v40  }
 0x185   : > { %v9856_v25 = vcombine.low %v2975_v32, %v2982_v15  ;;  %v9858_v39 = vcombine.low %v2989_v23, %v2996_v38  ;;  %v9860_v3 = vcombine.low %v2891_v34, %v2898_v33  ;;  %v9862_v26 = vcombine.low %v2905_v21, %v2912_v53  ;;  %7159 = vperm.xlu0 %8352, %v9736_v24  }
 0x186   : > { %v9864_v1 = vcombine.low %v2947_v12, %v2954_v46  ;;  %v9866_v22 = vcombine.low %v2961_v45, %v2968_v54  ;;  %v5291_v57 = vcombine.low %v5283_v28, %v5290_v11  ;;  %v9873_v62 = vcombine.low %v5470_v60, %v5477_v14  ;;  %v11925_v54 = vld [vmem:[#allocation49_spill] sm:$0xff] }
 0x187   : > { %11921 = vst [vmem:[#allocation47_spill] sm:$0xff] %v9860_v3  ;;  %11922 = vst [vmem:[#allocation55_spill] sm:$0xff] %v9862_v26  ;;  %v3031_v15 = vrot.slane %v9385_v43, %v8812_v18  ;;  %v3038_v32 = vrot.slane %v9385_v43, %v8815_v19  ;;  %v5317_v12 = vrot.slane %v11925_v54, %v8854_v59  ;;  %v9908_v34 = vpop.xlane.xlu1 %1111  ;;  %v11929_v54 = vld [vmem:[#allocation52_spill] sm:$0xff]  ;;  %v11992_v26 = vld [vmem:[#allocation70_spill] sm:$0xff] }
 0x188   : > { %11923 = vst [vmem:[#allocation48_spill] sm:$0xff] %v9864_v1  ;;  %11924 = vst [vmem:[#allocation12_spill] sm:$0xff] %v9866_v22  ;;  %v5324_v63 = vrot.slane %v11926_v36, %v8854_v59  ;;  %v3045_v40 = vrot.slane %v9385_v43, %v8824_v30  ;;  %v3052_v14 = vrot.slane %v9385_v43, %v8827_v31  ;;  %7132 = vperm.xlu1 %8353, %v9750_v7   ;;  %v11971_v1 = vld [vmem:[#allocation31_spill] sm:$0xff] }
 0x189   : > { %v3003_v47 = vrot.slane %v9387_v58, %v8812_v18  ;;  %v3010_v16 = vrot.slane %v9387_v58, %v8815_v19  ;;  %v3017_v24 = vrot.slane %v9387_v58, %v8824_v30  ;;  %v3024_v35 = vrot.slane %v9387_v58, %v8827_v31  ;;  %v9911_v58 = vpop.xlane.xlu0 %1109  ;;  %7165 = vperm.xlu0 %8352, %v9765_v20  }
 0x18a   : > { %v5504_v27 = vrot.slane %v9451_v44, %v8854_v59  ;;  %v5511_v4 = vrot.slane %v9453_v52, %v8854_v59  ;;  %v3087_v43 = vrot.slane %v9423_v42, %v8812_v18  ;;  %v3094_v5 = vrot.slane %v9423_v42, %v8815_v19 }
 0x18b   : > { %v3101_v28 = vrot.slane %v9423_v42, %v8824_v30  ;;  %v3108_v29 = vrot.slane %v9423_v42, %v8827_v31  ;;  %v3059_v44 = vrot.slane %v9425_v13, %v8812_v18  ;;  %v3066_v52 = vrot.slane %v9425_v13, %v8815_v19 }
 0x18c   : > { %v3073_v33 = vrot.slane %v9425_v13, %v8824_v30  ;;  %v3080_v21 = vrot.slane %v9425_v13, %v8827_v31  ;;  %v9922_v42 = vcombine.low %v3031_v15, %v3038_v32  ;;  %v9924_v53 = vcombine.low %v3045_v40, %v3052_v14  ;;  %v9942_v15 = vpop.xlane.xlu1 %1115  ;;  %7138 = vperm.xlu1 %8353, %v5257_v8   ;;  %v11932_v40 = vld [vmem:[#allocation53_spill] sm:$0xff] }
 0x18d   : > { %v9926_v7 = vcombine.low %v3003_v47, %v3010_v16  ;;  %v5325_v11 = vcombine.low %v5317_v12, %v5324_v63  ;;  %v3143_v60 = vrot.slane %v9459_v41, %v8812_v18  ;;  %v3150_v23 = vrot.slane %v9459_v41, %v8815_v19  ;;  %v9944_v32 = vpop.xlane.xlu0 %1113  ;;  %7171 = vperm.xlu0 %8352, %v5444_v48  }
 0x18e   : > { %v3157_v38 = vrot.slane %v9459_v41, %v8824_v30  ;;  %v3164_v13 = vrot.slane %v9459_v41, %v8827_v31  ;;  %v9936_v20 = vcombine.low %v3087_v43, %v3094_v5  ;;  %v9938_v46 = vcombine.low %v3101_v28, %v3108_v29  ;;  %v11935_v28 = vld [vmem:[#allocation14_spill] sm:$0xff] }
 0x18f   : > { %11927 = vst [vmem:[#allocation13_spill] sm:$0xff] %v9926_v7  ;;  %v9940_v45 = vcombine.low %v3017_v24, %v3024_v35  ;;  %v5351_v12 = vrot.slane %v11929_v54, %v8854_v59  ;;  %v9948_v36 = vcombine.low %v3059_v44, %v3066_v52  ;;  %v9950_v63 = vcombine.low %v3073_v33, %v3080_v21  ;;  %v11936_v44 = vld [vmem:[#allocation15_spill] sm:$0xff] }
 0x190   : > { %v5512_v41 = vcombine.low %v5504_v27, %v5511_v4  ;;  %v5358_v14 = vrot.slane %v11932_v40, %v8854_v59  ;;  %v3115_v47 = vrot.slane %v9462_v56, %v8812_v18  ;;  %v3122_v8 = vrot.slane %v9462_v56, %v8815_v19  ;;  %7144 = vperm.xlu1 %8353, %v5291_v57   ;;  %v11937_v21 = vld [vmem:[#allocation19_spill] sm:$0xff]  ;;  %v11938_v40 = vld [vmem:[#allocation21_spill] sm:$0xff] }
 0x191   : > { %11928 = vst [vmem:[#allocation49_spill] sm:$0xff] %v9940_v45  ;;  %11930 = vst [vmem:[#allocation50_spill] sm:$0xff] %v9948_v36  ;;  %v5538_v16 = vrot.slane %v9480_v55, %v8854_v59  ;;  %v5545_v24 = vrot.slane %v9482_v37, %v8854_v59  ;;  %v9962_v35 = vcombine.low %v3143_v60, %v3150_v23  ;;  %v9974_v55 = vpop.xlane.xlu1 %1119  ;;  %v9976_v37 = vpop.xlane.xlu0 %1117  ;;  %7177 = vperm.xlu0 %8352, %v9873_v62  }
 0x192   : > { %11931 = vst [vmem:[#allocation52_spill] sm:$0xff] %v9950_v63  ;;  %v9964_v43 = vcombine.low %v3157_v38, %v3164_v13  ;;  %v3129_v48 = vrot.slane %v9462_v56, %v8824_v30  ;;  %v3136_v27 = vrot.slane %v9462_v56, %v8827_v31  ;;  %v3199_v4 = vrot.slane %v9492_v49, %v8812_v18 }
 0x193   : > { %v3206_v5 = vrot.slane %v9492_v49, %v8815_v19  ;;  %11933 = vst [vmem:[#allocation53_spill] sm:$0xff] %v9974_v55  ;;  %11934 = vst [vmem:[#allocation79_spill] sm:$0xff] %v9976_v37  ;;  %v5385_v29 = vrot.slane %v11935_v28, %v8854_v59  ;;  %v5392_v52 = vrot.slane %v11936_v44, %v8854_v59  ;;  %v11993_v37 = vld [vmem:[#allocation71_spill] sm:$0xff] }
 0x194   : > { %v3213_v56 = vrot.slane %v9492_v49, %v8824_v30  ;;  %v3220_v33 = vrot.slane %v9492_v49, %v8827_v31  ;;  %v3171_v60 = vrot.slane %v11937_v21, %v8812_v18  ;;  %v3178_v57 = vrot.slane %v11937_v21, %v8815_v19  ;;  %7150 = vperm.xlu1 %8353, %v5325_v11   ;;  %v11949_v11 = vld [vmem:[#allocation22_spill] sm:$0xff] }
 0x195   : > { %v3185_v23 = vrot.slane %v11937_v21, %v8824_v30  ;;  %v3192_v38 = vrot.slane %v11937_v21, %v8827_v31  ;;  %v5359_v13 = vcombine.low %v5351_v12, %v5358_v14  ;;  %v5546_v54 = vcombine.low %v5538_v16, %v5545_v24  ;;  %v10007_v45 = vpop.xlane.xlu1 %1123  ;;  %v10009_v12 = vpop.xlane.xlu0 %1121  ;;  %v11943_v14 = vld [vmem:[#allocation62_spill] sm:$0xff]  ;;  %v11944_v24 = vld [vmem:[#allocation20_spill] sm:$0xff]  ;;  %7183 = vperm.xlu0 %8352, %v5512_v41  }
 0x196   : > { %v3255_v28 = vrot.slane %v11938_v40, %v8812_v18  ;;  %v3262_v49 = vrot.slane %v11938_v40, %v8815_v19  ;;  %v3269_v44 = vrot.slane %v11938_v40, %v8824_v30  ;;  %v3276_v62 = vrot.slane %v11938_v40, %v8827_v31  ;;  %11941 = vst [vmem:[#allocation19_spill] sm:$0xff] %v10007_v45 }
 0x197   : > { %v10003_v63 = vcombine.low %v3115_v47, %v3122_v8  ;;  %v10005_v36 = vcombine.low %v3129_v48, %v3136_v27  ;;  %11942 = vst [vmem:[#allocation21_spill] sm:$0xff] %v10009_v12  ;;  %v5572_v16 = vrot.slane %v11943_v14, %v8854_v59  ;;  %v5579_v21 = vrot.slane %v11944_v24, %v8854_v59  ;;  %v11950_v14 = vld [vmem:[#allocation57_spill] sm:$0xff] }
 0x198   : > { %v10015_v7 = vcombine.low %v3199_v4, %v3206_v5  ;;  %v10017_v22 = vcombine.low %v3213_v56, %v3220_v33  ;;  %v10019_v40 = vcombine.low %v3171_v60, %v3178_v57  ;;  %v5393_v47 = vcombine.low %v5385_v29, %v5392_v52  ;;  %7156 = vperm.xlu1 %8353, %v5359_v13   ;;  %v11955_v33 = vld [vmem:[#allocation58_spill] sm:$0xff]  ;;  %v11956_v57 = vld [vmem:[#allocation24_spill] sm:$0xff] }
 0x199   : > { %11939 = vst [vmem:[#allocation14_spill] sm:$0xff] %v10003_v63  ;;  %11940 = vst [vmem:[#allocation15_spill] sm:$0xff] %v10005_v36  ;;  %v10021_v8 = vcombine.low %v3185_v23, %v3192_v38  ;;  %v3227_v48 = vrot.slane %v11949_v11, %v8812_v18  ;;  %v3234_v27 = vrot.slane %v11949_v11, %v8815_v19  ;;  %v10037_v29 = vpop.xlane.xlu1 %1127  ;;  %v10039_v52 = vpop.xlane.xlu0 %1125  ;;  %v11957_v38 = vld [vmem:[#allocation63_spill] sm:$0xff]  ;;  %7189 = vperm.xlu0 %8352, %v5546_v54   ;;  %v11963_v54 = vld [vmem:[#allocation60_spill] sm:$0xff] }
 0x19a   : > { %11945 = vst [vmem:[#allocation62_spill] sm:$0xff] %v10015_v7  ;;  %11946 = vst [vmem:[#allocation20_spill] sm:$0xff] %v10017_v22  ;;  %v5419_v36 = vrot.slane %v11950_v14, %v8854_v59  ;;  %v10029_v24 = vcombine.low %v3255_v28, %v3262_v49  ;;  %v10031_v4 = vcombine.low %v3269_v44, %v3276_v62  ;;  %v11958_v49 = vld [vmem:[#allocation67_spill] sm:$0xff] }
 0x19b   : > { %11947 = vst [vmem:[#allocation80_spill] sm:$0xff] %v10019_v40  ;;  %11948 = vst [vmem:[#allocation81_spill] sm:$0xff] %v10021_v8  ;;  %v3241_v5 = vrot.slane %v11949_v11, %v8824_v30  ;;  %v3248_v41 = vrot.slane %v11949_v11, %v8827_v31  ;;  %v5580_v56 = vcombine.low %v5572_v16, %v5579_v21  ;;  %v11959_v21 = vld [vmem:[#allocation27_spill] sm:$0xff] }
 0x19c   : > { %11951 = vst [vmem:[#allocation22_spill] sm:$0xff] %v10029_v24  ;;  %11952 = vst [vmem:[#allocation57_spill] sm:$0xff] %v10031_v4  ;;  %v5426_v60 = vrot.slane %v11955_v33, %v8854_v59  ;;  %v5606_v23 = vrot.slane %v11956_v57, %v8854_v59  ;;  %v5613_v28 = vrot.slane %v11957_v38, %v8854_v59  ;;  %v11962_v40 = vld [vmem:[#allocation59_spill] sm:$0xff]  ;;  %7162 = vperm.xlu1 %8353, %v5393_v47  }
 0x19d   : > { %11953 = vst [vmem:[#allocation82_spill] sm:$0xff] %v10037_v29  ;;  %11954 = vst [vmem:[#allocation83_spill] sm:$0xff] %v10039_v52  ;;  %v3311_v44 = vrot.slane %v11958_v49, %v8812_v18  ;;  %v3318_v62 = vrot.slane %v11958_v49, %v8815_v19  ;;  %v3325_v13 = vrot.slane %v11958_v49, %v8824_v30  ;;  %v11964_v52 = vld [vmem:[#allocation25_spill] sm:$0xff]  ;;  %7195 = vperm.xlu0 %8352, %v5580_v56   ;;  %v11972_v56 = vld [vmem:[#allocation68_spill] sm:$0xff] }
 0x19e   : > { %v3332_v16 = vrot.slane %v11958_v49, %v8827_v31  ;;  %v3283_v11 = vrot.slane %v11959_v21, %v8812_v18  ;;  %v3290_v14 = vrot.slane %v11959_v21, %v8815_v19  ;;  %v3297_v33 = vrot.slane %v11959_v21, %v8824_v30 }
 0x19f   : > { %v3304_v57 = vrot.slane %v11959_v21, %v8827_v31  ;;  %v10063_v38 = vcombine.low %v3227_v48, %v3234_v27  ;;  %v10065_v8 = vcombine.low %v3241_v5, %v3248_v41  ;;  %v5453_v49 = vrot.slane %v11962_v40, %v8854_v59  ;;  %v10079_v27 = vpop.xlane.xlu1 %1131  ;;  %v10081_v5 = vpop.xlane.xlu0 %1129 }
 0x1a0   : > { %v5460_v63 = vrot.slane %v11963_v54, %v8854_v59  ;;  %v3367_v29 = vrot.slane %v11964_v52, %v8812_v18  ;;  %v3374_v4 = vrot.slane %v11964_v52, %v8815_v19  ;;  %v3381_v24 = vrot.slane %v11964_v52, %v8824_v30  ;;  %11965 = vst [vmem:[#allocation63_spill] sm:$0xff] %v10079_v27 }
 0x1a1   : > { %11960 = vst [vmem:[#allocation58_spill] sm:$0xff] %v10063_v38  ;;  %11961 = vst [vmem:[#allocation24_spill] sm:$0xff] %v10065_v8  ;;  %v3388_v48 = vrot.slane %v11964_v52, %v8827_v31  ;;  %v10083_v40 = vcombine.low %v3311_v44, %v3318_v62  ;;  %v10085_v41 = vcombine.low %v3325_v13, %v3332_v16 }
 0x1a2   : > { %11966 = vst [vmem:[#allocation67_spill] sm:$0xff] %v10081_v5  ;;  %v5427_v21 = vcombine.low %v5419_v36, %v5426_v60  ;;  %v5614_v54 = vcombine.low %v5606_v23, %v5613_v28  ;;  %v10087_v8 = vcombine.low %v3283_v11, %v3290_v14  ;;  %v10089_v38 = vcombine.low %v3297_v33, %v3304_v57  ;;  %v11973_v60 = vld [vmem:[#allocation69_spill] sm:$0xff]  ;;  %v11978_v14 = vld [vmem:[#allocation16_spill] sm:$0xff] }
 0x1a3   : > { %11967 = vst [vmem:[#allocation27_spill] sm:$0xff] %v10083_v40  ;;  %11968 = vst [vmem:[#allocation59_spill] sm:$0xff] %v10085_v41  ;;  %v3339_v12 = vrot.slane %v11971_v1, %v8812_v18  ;;  %v3346_v52 = vrot.slane %v11971_v1, %v8815_v19  ;;  %v3353_v47 = vrot.slane %v11971_v1, %v8824_v30  ;;  %v10107_v13 = vpop.xlane.xlu1 %1135  ;;  %v10109_v11 = vpop.xlane.xlu0 %1133 }
 0x1a4   : > { %11969 = vst [vmem:[#allocation60_spill] sm:$0xff] %v10087_v8  ;;  %11970 = vst [vmem:[#allocation25_spill] sm:$0xff] %v10089_v38  ;;  %v3360_v44 = vrot.slane %v11971_v1, %v8827_v31  ;;  %v5640_v36 = vrot.slane %v11972_v56, %v8854_v59  ;;  %v5647_v23 = vrot.slane %v11973_v60, %v8854_v59  ;;  %7168 = vperm.xlu1 %8353, %v5427_v21   ;;  %v11979_v1 = vld [vmem:[#allocation33_spill] sm:$0xff]  ;;  %v11982_v8 = vld [vmem:[#allocation26_spill] sm:$0xff] }
 0x1a5   : > { %v10103_v28 = vcombine.low %v3367_v29, %v3374_v4  ;;  %v10105_v62 = vcombine.low %v3381_v24, %v3388_v48  ;;  %11976 = vst [vmem:[#allocation69_spill] sm:$0xff] %v10107_v13  ;;  %v5461_v16 = vcombine.low %v5453_v49, %v5460_v63  ;;  %11977 = vst [vmem:[#allocation84_spill] sm:$0xff] %v10109_v11  ;;  %7201 = vperm.xlu0 %8352, %v5614_v54   ;;  %v11980_v63 = vld [vmem:[#allocation42_spill] sm:$0xff]  ;;  %v11981_v21 = vld [vmem:[#allocation17_spill] sm:$0xff] }
 0x1a6   : > { %v5487_v33 = vrot.slane %v11978_v14, %v8854_v59  ;;  %v3423_v57 = vrot.slane %v11979_v1, %v8812_v18  ;;  %v3430_v56 = vrot.slane %v11979_v1, %v8815_v19  ;;  %v3437_v4 = vrot.slane %v11979_v1, %v8824_v30  ;;  %v11983_v54 = vld [vmem:[#allocation35_spill] sm:$0xff]  ;;  %v11984_v13 = vld [vmem:[#allocation36_spill] sm:$0xff] }
 0x1a7   : > { %11974 = vst [vmem:[#allocation31_spill] sm:$0xff] %v10103_v28  ;;  %11975 = vst [vmem:[#allocation68_spill] sm:$0xff] %v10105_v62  ;;  %v3444_v24 = vrot.slane %v11979_v1, %v8827_v31  ;;  %v3395_v29 = vrot.slane %v11980_v63, %v8812_v18  ;;  %v3402_v49 = vrot.slane %v11980_v63, %v8815_v19 }
 0x1a8   : > { %v3409_v48 = vrot.slane %v11980_v63, %v8824_v30  ;;  %v5494_v60 = vrot.slane %v11981_v21, %v8854_v59  ;;  %v3416_v14 = vrot.slane %v11980_v63, %v8827_v31  ;;  %v5648_v38 = vcombine.low %v5640_v36, %v5647_v23  ;;  %v10143_v63 = vpop.xlane.xlu1 %1139  ;;  %7174 = vperm.xlu1 %8353, %v5461_v16   ;;  %v10145_v36 = vpop.xlane.xlu0 %1137  ;;  %v11989_v16 = vld [vmem:[#allocation18_spill] sm:$0xff] }
 0x1a9   : > { %v5674_v1 = vrot.slane %v11982_v8, %v8854_v59  ;;  %v5681_v11 = vrot.slane %v11983_v54, %v8854_v59  ;;  %v3479_v5 = vrot.slane %v11984_v13, %v8812_v18  ;;  %v3486_v62 = vrot.slane %v11984_v13, %v8815_v19  ;;  %11985 = vst [vmem:[#allocation16_spill] sm:$0xff] %v10143_v63  ;;  %v11987_v8 = vld [vmem:[#allocation34_spill] sm:$0xff] }
 0x1aa   : > { %v3493_v28 = vrot.slane %v11984_v13, %v8824_v30  ;;  %v3500_v21 = vrot.slane %v11984_v13, %v8827_v31  ;;  %11986 = vst [vmem:[#allocation33_spill] sm:$0xff] %v10145_v36  ;;  %v3451_v23 = vrot.slane %v11987_v8, %v8812_v18  ;;  %v3458_v54 = vrot.slane %v11987_v8, %v8815_v19  ;;  %v11990_v36 = vld [vmem:[#allocation61_spill] sm:$0xff] }
 0x1ab   : > { %v3465_v27 = vrot.slane %v11987_v8, %v8824_v30  ;;  %v3472_v41 = vrot.slane %v11987_v8, %v8827_v31  ;;  %7207 = vperm.xlu0 %8352, %v5648_v38   ;;  %v10155_v40 = vcombine.low %v3339_v12, %v3346_v52  ;;  %v5495_v13 = vcombine.low %v5487_v33, %v5494_v60 }
 0x1ac   : > { %v5521_v63 = vrot.slane %v11989_v16, %v8854_v59  ;;  %v5528_v45 = vrot.slane %v11990_v36, %v8854_v59  ;;  %v10161_v22 = vcombine.low %v3353_v47, %v3360_v44  ;;  %v5682_v7 = vcombine.low %v5674_v1, %v5681_v11  ;;  %v10175_v33 = vpop.xlane.xlu1 %1143  ;;  %v10177_v47 = vpop.xlane.xlu0 %1141 }
 0x1ad   : > { %11988 = vst [vmem:[#allocation42_spill] sm:$0xff] %v10155_v40  ;;  %v5708_v3 = vrot.slane %v11992_v26, %v8854_v59  ;;  %v5715_v55 = vrot.slane %v11993_v37, %v8854_v59  ;;  %v10167_v8 = vcombine.low %v3423_v57, %v3430_v56  ;;  %v10169_v12 = vcombine.low %v3437_v4, %v3444_v24  ;;  %v11999_v57 = vld [vmem:[#allocation56_spill] sm:$0xff]  ;;  %v12000_v24 = vld [vmem:[#allocation23_spill] sm:$0xff] }
 0x1ae   : > { %11991 = vst [vmem:[#allocation17_spill] sm:$0xff] %v10161_v22  ;;  %v10171_v38 = vcombine.low %v3395_v29, %v3402_v49  ;;  %v10173_v52 = vcombine.low %v3409_v48, %v3416_v14  ;;  %7180 = vperm.xlu1 %8353, %v5495_v13   ;;  %11996 = vst [vmem:[#allocation36_spill] sm:$0xff] %v10177_v47  ;;  %v10179_v44 = vcombine.low %v3479_v5, %v3486_v62  ;;  %v12001_v49 = vld [vmem:[#allocation64_spill] sm:$0xff]  ;;  %v12002_v62 = vld [vmem:[#allocation10_spill] sm:$0xff] }
 0x1af   : > { %v10181_v11 = vcombine.low %v3493_v28, %v3500_v21  ;;  %v10183_v26 = vcombine.low %v3451_v23, %v3458_v54  ;;  %v10185_v37 = vcombine.low %v3465_v27, %v3472_v41  ;;  %7213 = vperm.xlu0 %8352, %v5682_v7   ;;  %v3535_v56 = vrot.slane %v11999_v57, %v8812_v18  ;;  %v12003_v27 = vld [vmem:[#allocation38_spill] sm:$0xff]  ;;  %v12004_v14 = vld [vmem:[#allocation37_spill] sm:$0xff] }
 0x1b0   : > { %11994 = vst [vmem:[#allocation26_spill] sm:$0xff] %v10171_v38  ;;  %11995 = vst [vmem:[#allocation35_spill] sm:$0xff] %v10173_v52  ;;  %v5529_v4 = vcombine.low %v5521_v63, %v5528_v45  ;;  %v5555_v29 = vrot.slane %v12000_v24, %v8854_v59  ;;  %v5562_v48 = vrot.slane %v12001_v49, %v8854_v59  ;;  %v10207_v63 = vpop.xlane.xlu1 %1147  ;;  %v12009_v49 = vld [vmem:[#allocation66_spill] sm:$0xff] }
 0x1b1   : > { %11997 = vst [vmem:[#allocation34_spill] sm:$0xff] %v10183_v26  ;;  %11998 = vst [vmem:[#allocation18_spill] sm:$0xff] %v10185_v37  ;;  %v3542_v5 = vrot.slane %v11999_v57, %v8815_v19  ;;  %v5716_v28 = vcombine.low %v5708_v3, %v5715_v55  ;;  %v5742_v60 = vrot.slane %v12002_v62, %v8854_v59  ;;  %v10209_v3 = vpop.xlane.xlu0 %1145  ;;  %v12007_v55 = vld [vmem:[#allocation77_spill] sm:$0xff]  ;;  %v12010_v26 = vld [vmem:[#allocation11_spill] sm:$0xff] }
 0x1b2   : > { %v5749_v7 = vrot.slane %v12003_v27, %v8854_v59  ;;  %v3549_v41 = vrot.slane %v11999_v57, %v8824_v30  ;;  %v3556_v45 = vrot.slane %v11999_v57, %v8827_v31  ;;  %v3507_v1 = vrot.slane %v12004_v14, %v8812_v18  ;;  %12005 = vst [vmem:[#allocation61_spill] sm:$0xff] %v10207_v63  ;;  %v12012_v38 = vld [vmem:[#allocation78_spill] sm:$0xff] }
 0x1b3   : > { %v3514_v21 = vrot.slane %v12004_v14, %v8815_v19  ;;  %7186 = vperm.xlu1 %8353, %v5529_v4   ;;  %12006 = vst [vmem:[#allocation70_spill] sm:$0xff] %v10209_v3  ;;  %v3591_v36 = vrot.slane %v12007_v55, %v8812_v18  ;;  %v3598_v23 = vrot.slane %v12007_v55, %v8815_v19  ;;  %v12008_v4 = vld [vmem:[#allocation65_spill] sm:$0xff]  ;;  %v12016_v63 = vld [vmem:[#allocation30_spill] sm:$0xff] }
 0x1b4   : > { %v3521_v54 = vrot.slane %v12004_v14, %v8824_v30  ;;  %v3528_v13 = vrot.slane %v12004_v14, %v8827_v31  ;;  %7219 = vperm.xlu0 %8352, %v5716_v28   ;;  %v3605_v16 = vrot.slane %v12007_v55, %v8824_v30  ;;  %v5563_v57 = vcombine.low %v5555_v29, %v5562_v48  ;;  %v12011_v14 = vld [vmem:[#allocation39_spill] sm:$0xff] }
 0x1b5   : > { %v5589_v24 = vrot.slane %v12008_v4, %v8854_v59  ;;  %v5596_v62 = vrot.slane %v12009_v49, %v8854_v59  ;;  %v3612_v27 = vrot.slane %v12007_v55, %v8827_v31  ;;  %v5750_v37 = vcombine.low %v5742_v60, %v5749_v7  ;;  %v10239_v55 = vpop.xlane.xlu1 %1151  ;;  %v10241_v60 = vpop.xlane.xlu0 %1149 }
 0x1b6   : > { %v5776_v52 = vrot.slane %v12010_v26, %v8854_v59  ;;  %v5783_v28 = vrot.slane %v12011_v14, %v8854_v59  ;;  %v3563_v3 = vrot.slane %v12012_v38, %v8812_v18  ;;  %v3570_v29 = vrot.slane %v12012_v38, %v8815_v19  ;;  %12013 = vst [vmem:[#allocation71_spill] sm:$0xff] %v10239_v55  ;;  %v12017_v55 = vld [vmem:[#allocation32_spill] sm:$0xff] }
 0x1b7   : > { %v3577_v48 = vrot.slane %v12012_v38, %v8824_v30  ;;  %v3584_v4 = vrot.slane %v12012_v38, %v8827_v31  ;;  %7192 = vperm.xlu1 %8353, %v5563_v57   ;;  %12014 = vst [vmem:[#allocation56_spill] sm:$0xff] %v10241_v60  ;;  %v10243_v26 = vcombine.low %v3535_v56, %v3542_v5  ;;  %v12018_v5 = vld [vmem:[#allocation40_spill] sm:$0xff]  ;;  %v12029_v60 = vld [vmem:[#allocation51_spill] sm:$0xff] }
 0x1b8   : > { %v10245_v7 = vcombine.low %v3549_v41, %v3556_v45  ;;  %v10247_v49 = vcombine.low %v3507_v1, %v3514_v21  ;;  %v10249_v14 = vcombine.low %v3521_v54, %v3528_v13  ;;  %7225 = vperm.xlu0 %8352, %v5750_v37   ;;  %v10251_v22 = vcombine.low %v3591_v36, %v3598_v23  ;;  %v12019_v45 = vld [vmem:[#allocation75_spill] sm:$0xff]  ;;  %v12020_v37 = vld [vmem:[#allocation41_spill] sm:$0xff] }
 0x1b9   : > { %v5597_v40 = vcombine.low %v5589_v24, %v5596_v62  ;;  %v5623_v38 = vrot.slane %v12016_v63, %v8854_v59  ;;  %v5630_v57 = vrot.slane %v12017_v55, %v8854_v59  ;;  %v10257_v47 = vcombine.low %v3605_v16, %v3612_v27  ;;  %v10271_v54 = vpop.xlane.xlu1 %1155  ;;  %v12025_v24 = vld [vmem:[#allocation46_spill] sm:$0xff] }
 0x1ba   : > { %12015 = vst [vmem:[#allocation23_spill] sm:$0xff] %v10249_v14  ;;  %v5784_v56 = vcombine.low %v5776_v52, %v5783_v28  ;;  %v5810_v41 = vrot.slane %v12018_v5, %v8854_v59  ;;  %v5817_v1 = vrot.slane %v12019_v45, %v8854_v59  ;;  %v3647_v21 = vrot.slane %v12020_v37, %v8812_v18  ;;  %v10273_v52 = vpop.xlane.xlu0 %1153 }
 0x1bb   : > { %v3654_v36 = vrot.slane %v12020_v37, %v8815_v19  ;;  %v10267_v23 = vcombine.low %v3563_v3, %v3570_v29  ;;  %v10269_v63 = vcombine.low %v3577_v48, %v3584_v4  ;;  %12023 = vst [vmem:[#allocation38_spill] sm:$0xff] %v10271_v54  ;;  %7198 = vperm.xlu1 %8353, %v5597_v40   ;;  %12024 = vst [vmem:[#allocation37_spill] sm:$0xff] %v10273_v52  ;;  %v12026_v40 = vld [vmem:[#allocation28_spill] sm:$0xff]  ;;  %v12027_v48 = vld [vmem:[#allocation29_spill] sm:$0xff] }
 0x1bc   : > { %v3661_v13 = vrot.slane %v12020_v37, %v8824_v30  ;;  %v3668_v16 = vrot.slane %v12020_v37, %v8827_v31  ;;  %v3619_v62 = vrot.slane %v12025_v24, %v8812_v18  ;;  %v3626_v3 = vrot.slane %v12025_v24, %v8815_v19  ;;  %7231 = vperm.xlu0 %8352, %v5784_v56   ;;  %v12028_v37 = vld [vmem:[#allocation54_spill] sm:$0xff] }
 0x1bd   : > { %12021 = vst [vmem:[#allocation64_spill] sm:$0xff] %v10267_v23  ;;  %12022 = vst [vmem:[#allocation10_spill] sm:$0xff] %v10269_v63  ;;  %v3633_v27 = vrot.slane %v12025_v24, %v8824_v30  ;;  %v5631_v28 = vcombine.low %v5623_v38, %v5630_v57  ;;  %v5657_v29 = vrot.slane %v12026_v40, %v8854_v59  ;;  %v12030_v63 = vld [vmem:[#allocation72_spill] sm:$0xff] }
 0x1be   : > { %v5664_v4 = vrot.slane %v12027_v48, %v8854_v59  ;;  %v3640_v55 = vrot.slane %v12025_v24, %v8827_v31  ;;  %v5818_v5 = vcombine.low %v5810_v41, %v5817_v1  ;;  %v5844_v45 = vrot.slane %v9843_v2, %v8854_v59  ;;  %v10303_v24 = vpop.xlane.xlu1 %1159  ;;  %v10305_v41 = vpop.xlane.xlu0 %1157 }
 0x1bf   : > { %v5851_v56 = vrot.slane %v9845_v0, %v8854_v59  ;;  %v3703_v54 = vrot.slane %v12028_v37, %v8812_v18  ;;  %v3710_v38 = vrot.slane %v12028_v37, %v8815_v19  ;;  %v3717_v57 = vrot.slane %v12028_v37, %v8824_v30  ;;  %7204 = vperm.xlu1 %8353, %v5631_v28  }
 0x1c0   : > { %v3724_v40 = vrot.slane %v12028_v37, %v8827_v31  ;;  %v10307_v2 = vcombine.low %v3647_v21, %v3654_v36  ;;  %v10309_v0 = vcombine.low %v3661_v13, %v3668_v16  ;;  %v3675_v1 = vrot.slane %v9841_v51, %v8812_v18  ;;  %7237 = vperm.xlu0 %8352, %v5818_v5  }
 0x1c1   : > { %v3682_v48 = vrot.slane %v9841_v51, %v8815_v19  ;;  %v3689_v52 = vrot.slane %v9841_v51, %v8824_v30  ;;  %v5665_v37 = vcombine.low %v5657_v29, %v5664_v4  ;;  %v5691_v28 = vrot.slane %v12029_v60, %v8854_v59 }
 0x1c2   : > { %v5698_v21 = vrot.slane %v12030_v63, %v8854_v59  ;;  %v3696_v36 = vrot.slane %v9841_v51, %v8827_v31  ;;  %v5852_v13 = vcombine.low %v5844_v45, %v5851_v56  ;;  %v5878_v16 = vrot.slane %v9850_v61, %v8854_v59  ;;  %v10335_v4 = vpop.xlane.xlu1 %1163  ;;  %v10337_v63 = vpop.xlane.xlu0 %1161  ;;  %v12035_v45 = vld [vmem:[#allocation44_spill] sm:$0xff] }
 0x1c3   : > { %v5885_v5 = vrot.slane %v9852_v17, %v8854_v59  ;;  %v10327_v23 = vcombine.low %v3703_v54, %v3710_v38  ;;  %v10329_v14 = vcombine.low %v3717_v57, %v3724_v40  ;;  %v10331_v29 = vcombine.low %v3619_v62, %v3626_v3  ;;  %7210 = vperm.xlu1 %8353, %v5665_v37  }
 0x1c4   : > { %v10333_v60 = vcombine.low %v3633_v27, %v3640_v55  ;;  %v3759_v51 = vrot.slane %v9868_v9, %v8812_v18  ;;  %v3766_v61 = vrot.slane %v9868_v9, %v8815_v19  ;;  %v3773_v17 = vrot.slane %v9868_v9, %v8824_v30  ;;  %7243 = vperm.xlu0 %8352, %v5852_v13   ;;  %v12034_v27 = vld [vmem:[#allocation43_spill] sm:$0xff] }
 0x1c5   : > { %12031 = vst [vmem:[#allocation77_spill] sm:$0xff] %v10331_v29  ;;  %v3780_v54 = vrot.slane %v9868_v9, %v8827_v31  ;;  %v10347_v62 = vcombine.low %v3675_v1, %v3682_v48  ;;  %v5699_v3 = vcombine.low %v5691_v28, %v5698_v21  ;;  %v5725_v55 = vrot.slane %v12034_v27, %v8854_v59  ;;  %v12039_v27 = vld [vmem:[#allocation74_spill] sm:$0xff] }
 0x1c6   : > { %12032 = vst [vmem:[#allocation65_spill] sm:$0xff] %v10333_v60  ;;  %v5732_v56 = vrot.slane %v12035_v45, %v8854_v59  ;;  %v10353_v38 = vcombine.low %v3689_v52, %v3696_v36  ;;  %v5886_v57 = vcombine.low %v5878_v16, %v5885_v5  ;;  %v5912_v40 = vrot.slane %v9856_v25, %v8854_v59  ;;  %v10367_v28 = vpop.xlane.xlu1 %1167  ;;  %v10369_v21 = vpop.xlane.xlu0 %1165  ;;  %v12038_v5 = vld [vmem:[#allocation73_spill] sm:$0xff] }
 0x1c7   : > { %12033 = vst [vmem:[#allocation66_spill] sm:$0xff] %v10347_v62  ;;  %v5919_v37 = vrot.slane %v9858_v39, %v8854_v59  ;;  %v3731_v9 = vrot.slane %v9871_v10, %v8812_v18  ;;  %v3738_v1 = vrot.slane %v9871_v10, %v8815_v19  ;;  %v3745_v48 = vrot.slane %v9871_v10, %v8824_v30  ;;  %v12044_v62 = vld [vmem:[#allocation76_spill] sm:$0xff]  ;;  %v12045_v60 = vld [vmem:[#allocation45_spill] sm:$0xff] }
 0x1c8   : > { %12036 = vst [vmem:[#allocation11_spill] sm:$0xff] %v10353_v38  ;;  %v3752_v52 = vrot.slane %v9871_v10, %v8827_v31  ;;  %7216 = vperm.xlu1 %8353, %v5699_v3   ;;  %12037 = vst [vmem:[#allocation39_spill] sm:$0xff] %v10369_v21  ;;  %v10371_v25 = vcombine.low %v3759_v51, %v3766_v61  ;;  %v10373_v39 = vcombine.low %v3773_v17, %v3780_v54  ;;  %v12079_v21 = vld [vmem:[#allocation27_spill] sm:$0xff] }
 0x1c9   : > { %v3815_v36 = vrot.slane %v9908_v34, %v8812_v18  ;;  %v3822_v13 = vrot.slane %v9908_v34, %v8815_v19  ;;  %7249 = vperm.xlu0 %8352, %v5886_v57   ;;  %v3829_v16 = vrot.slane %v9908_v34, %v8824_v30  ;;  %v5733_v10 = vcombine.low %v5725_v55, %v5732_v56 }
 0x1ca   : > { %v5759_v3 = vrot.slane %v12038_v5, %v8854_v59  ;;  %v5766_v51 = vrot.slane %v12039_v27, %v8854_v59  ;;  %v3836_v61 = vrot.slane %v9908_v34, %v8827_v31  ;;  %v5920_v17 = vcombine.low %v5912_v40, %v5919_v37  ;;  %v10399_v34 = vpop.xlane.xlu1 %1171  ;;  %v10401_v40 = vpop.xlane.xlu0 %1169 }
 0x1cb   : > { %v5946_v54 = vrot.slane %v9922_v42, %v8854_v59  ;;  %v5953_v45 = vrot.slane %v9924_v53, %v8854_v59  ;;  %v3787_v57 = vrot.slane %v9911_v58, %v8812_v18  ;;  %v3794_v55 = vrot.slane %v9911_v58, %v8815_v19  ;;  %12040 = vst [vmem:[#allocation78_spill] sm:$0xff] %v10399_v34 }
 0x1cc   : > { %v3801_v56 = vrot.slane %v9911_v58, %v8824_v30  ;;  %v3808_v5 = vrot.slane %v9911_v58, %v8827_v31  ;;  %7222 = vperm.xlu1 %8353, %v5733_v10   ;;  %12041 = vst [vmem:[#allocation30_spill] sm:$0xff] %v10401_v40  ;;  %v10403_v42 = vcombine.low %v3731_v9, %v3738_v1  ;;  %v12078_v40 = vld [vmem:[#allocation49_spill] sm:$0xff] }
 0x1cd   : > { %v10405_v53 = vcombine.low %v3745_v48, %v3752_v52  ;;  %v3871_v37 = vrot.slane %v9942_v15, %v8812_v18  ;;  %v3878_v27 = vrot.slane %v9942_v15, %v8815_v19  ;;  %7255 = vperm.xlu0 %8352, %v5920_v17   ;;  %v3885_v38 = vrot.slane %v9942_v15, %v8824_v30 }
 0x1ce   : > { %12042 = vst [vmem:[#allocation32_spill] sm:$0xff] %v10403_v42  ;;  %v5767_v58 = vcombine.low %v5759_v3, %v5766_v51  ;;  %v5793_v10 = vrot.slane %v12044_v62, %v8854_v59  ;;  %v5800_v9 = vrot.slane %v12045_v60, %v8854_v59  ;;  %v3892_v1 = vrot.slane %v9942_v15, %v8827_v31  ;;  %v10431_v51 = vpop.xlane.xlu1 %1175  ;;  %v10433_v60 = vpop.xlane.xlu0 %1173 }
 0x1cf   : > { %12043 = vst [vmem:[#allocation40_spill] sm:$0xff] %v10405_v53  ;;  %v5954_v48 = vcombine.low %v5946_v54, %v5953_v45  ;;  %v5980_v52 = vrot.slane %v9936_v20, %v8854_v59  ;;  %v5987_v17 = vrot.slane %v9938_v46, %v8854_v59  ;;  %v10423_v53 = vcombine.low %v3815_v36, %v3822_v13 }
 0x1d0   : > { %v10425_v42 = vcombine.low %v3829_v16, %v3836_v61  ;;  %v10427_v3 = vcombine.low %v3787_v57, %v3794_v55  ;;  %v10429_v62 = vcombine.low %v3801_v56, %v3808_v5  ;;  %12049 = vst [vmem:[#allocation28_spill] sm:$0xff] %v10431_v51  ;;  %7228 = vperm.xlu1 %8353, %v5767_v58   ;;  %12050 = vst [vmem:[#allocation29_spill] sm:$0xff] %v10433_v60  ;;  %v12058_v58 = vld [vmem:[#allocation79_spill] sm:$0xff]  ;;  %v12073_v51 = vld [vmem:[#allocation82_spill] sm:$0xff] }
 0x1d1   : > { %v3843_v15 = vrot.slane %v9944_v32, %v8812_v18  ;;  %v3850_v20 = vrot.slane %v9944_v32, %v8815_v19  ;;  %v3857_v46 = vrot.slane %v9944_v32, %v8824_v30  ;;  %v3864_v36 = vrot.slane %v9944_v32, %v8827_v31  ;;  %7261 = vperm.xlu0 %8352, %v5954_v48   ;;  %v12053_v32 = vld [vmem:[#allocation53_spill] sm:$0xff] }
 0x1d2   : > { %12046 = vst [vmem:[#allocation75_spill] sm:$0xff] %v10425_v42  ;;  %12047 = vst [vmem:[#allocation41_spill] sm:$0xff] %v10427_v3  ;;  %v10443_v13 = vcombine.low %v3871_v37, %v3878_v27  ;;  %v5801_v16 = vcombine.low %v5793_v10, %v5800_v9  ;;  %v5827_v61 = vrot.slane %v9847_v50, %v8854_v59  ;;  %v10465_v27 = vpop.xlane.xlu0 %1177  ;;  %v12072_v3 = vld [vmem:[#allocation57_spill] sm:$0xff] }
 0x1d3   : > { %12048 = vst [vmem:[#allocation46_spill] sm:$0xff] %v10429_v62  ;;  %v5834_v54 = vrot.slane %v9854_v6, %v8854_v59  ;;  %v10449_v45 = vcombine.low %v3885_v38, %v3892_v1  ;;  %v5988_v57 = vcombine.low %v5980_v52, %v5987_v17  ;;  %v6014_v55 = vrot.slane %v9962_v35, %v8854_v59  ;;  %v10463_v38 = vpop.xlane.xlu1 %1179  ;;  %v12059_v52 = vld [vmem:[#allocation47_spill] sm:$0xff] }
 0x1d4   : > { %12051 = vst [vmem:[#allocation54_spill] sm:$0xff] %v10443_v13  ;;  %v6021_v56 = vrot.slane %v9964_v43, %v8854_v59  ;;  %v3927_v5 = vrot.slane %v12053_v32, %v8812_v18  ;;  %v3934_v37 = vrot.slane %v12053_v32, %v8815_v19  ;;  %v3941_v50 = vrot.slane %v12053_v32, %v8824_v30 }
 0x1d5   : > { %12052 = vst [vmem:[#allocation51_spill] sm:$0xff] %v10449_v45  ;;  %v3948_v6 = vrot.slane %v12053_v32, %v8827_v31  ;;  %12054 = vst [vmem:[#allocation72_spill] sm:$0xff] %v10463_v38  ;;  %7234 = vperm.xlu1 %8353, %v5801_v16   ;;  %v10467_v35 = vcombine.low %v3843_v15, %v3850_v20  ;;  %v10469_v43 = vcombine.low %v3857_v46, %v3864_v36  ;;  %v12060_v16 = vld [vmem:[#allocation55_spill] sm:$0xff]  ;;  %v12061_v36 = vld [vmem:[#allocation62_spill] sm:$0xff] }
 0x1d6   : > { %12055 = vst [vmem:[#allocation43_spill] sm:$0xff] %v10465_v27  ;;  %v3899_v10 = vrot.slane %v12058_v58, %v8812_v18  ;;  %v3906_v9 = vrot.slane %v12058_v58, %v8815_v19  ;;  %7267 = vperm.xlu0 %8352, %v5988_v57   ;;  %v3913_v1 = vrot.slane %v12058_v58, %v8824_v30  ;;  %v12062_v27 = vld [vmem:[#allocation20_spill] sm:$0xff] }
 0x1d7   : > { %12056 = vst [vmem:[#allocation44_spill] sm:$0xff] %v10467_v35  ;;  %12057 = vst [vmem:[#allocation73_spill] sm:$0xff] %v10469_v43  ;;  %v5835_v48 = vcombine.low %v5827_v61, %v5834_v54  ;;  %v5861_v17 = vrot.slane %v12059_v52, %v8854_v59  ;;  %v5868_v15 = vrot.slane %v12060_v16, %v8854_v59  ;;  %v12065_v61 = vld [vmem:[#allocation19_spill] sm:$0xff]  ;;  %v10495_v16 = vpop.xlane.xlu1 %1183  ;;  %v12071_v35 = vld [vmem:[#allocation22_spill] sm:$0xff] }
 0x1d8   : > { %v3920_v20 = vrot.slane %v12058_v58, %v8827_v31  ;;  %v6022_v46 = vcombine.low %v6014_v55, %v6021_v56  ;;  %v6048_v32 = vrot.slane %v12061_v36, %v8854_v59  ;;  %v6055_v57 = vrot.slane %v12062_v27, %v8854_v59  ;;  %12066 = vst [vmem:[#allocation45_spill] sm:$0xff] %v10495_v16  ;;  %v10497_v55 = vpop.xlane.xlu0 %1181 }
 0x1d9   : > { %v10487_v38 = vcombine.low %v3927_v5, %v3934_v37  ;;  %v10489_v60 = vcombine.low %v3941_v50, %v3948_v6  ;;  %v3983_v54 = vrot.slane %v12065_v61, %v8812_v18  ;;  %v3990_v52 = vrot.slane %v12065_v61, %v8815_v19  ;;  %7240 = vperm.xlu1 %8353, %v5835_v48   ;;  %v12068_v37 = vld [vmem:[#allocation21_spill] sm:$0xff]  ;;  %v12069_v48 = vld [vmem:[#allocation48_spill] sm:$0xff] }
 0x1da   : > { %12067 = vst [vmem:[#allocation53_spill] sm:$0xff] %v10497_v55  ;;  %v3997_v56 = vrot.slane %v12065_v61, %v8824_v30  ;;  %v4004_v5 = vrot.slane %v12065_v61, %v8827_v31  ;;  %v3955_v50 = vrot.slane %v12068_v37, %v8812_v18  ;;  %v3962_v6 = vrot.slane %v12068_v37, %v8815_v19  ;;  %v12070_v55 = vld [vmem:[#allocation12_spill] sm:$0xff] }
 0x1db   : > { %12063 = vst [vmem:[#allocation74_spill] sm:$0xff] %v10487_v38  ;;  %12064 = vst [vmem:[#allocation76_spill] sm:$0xff] %v10489_v60  ;;  %7273 = vperm.xlu0 %8352, %v6022_v46   ;;  %v3969_v27 = vrot.slane %v12068_v37, %v8824_v30  ;;  %v5869_v58 = vcombine.low %v5861_v17, %v5868_v15  ;;  %v5895_v36 = vrot.slane %v12069_v48, %v8854_v59 }
 0x1dc   : > { %v5902_v16 = vrot.slane %v12070_v55, %v8854_v59  ;;  %v3976_v61 = vrot.slane %v12068_v37, %v8827_v31  ;;  %v6056_v43 = vcombine.low %v6048_v32, %v6055_v57  ;;  %v6082_v62 = vrot.slane %v12071_v35, %v8854_v59  ;;  %v10527_v37 = vpop.xlane.xlu1 %1187  ;;  %v12075_v35 = vld [vmem:[#allocation83_spill] sm:$0xff] }
 0x1dd   : > { %v6089_v46 = vrot.slane %v12072_v3, %v8854_v59  ;;  %v4039_v60 = vrot.slane %v12073_v51, %v8812_v18  ;;  %v4046_v17 = vrot.slane %v12073_v51, %v8815_v19  ;;  %v4053_v15 = vrot.slane %v12073_v51, %v8824_v30  ;;  %12074 = vst [vmem:[#allocation79_spill] sm:$0xff] %v10527_v37 }
 0x1de   : > { %v4060_v55 = vrot.slane %v12073_v51, %v8827_v31  ;;  %7246 = vperm.xlu1 %8353, %v5869_v58   ;;  %v4011_v32 = vrot.slane %v12075_v35, %v8812_v18  ;;  %v4018_v3 = vrot.slane %v12075_v35, %v8815_v19  ;;  %v4025_v57 = vrot.slane %v12075_v35, %v8824_v30  ;;  %v10539_v51 = vpop.xlane.xlu0 %1185  ;;  %v12077_v58 = vld [vmem:[#allocation13_spill] sm:$0xff] }
 0x1df   : > { %v4032_v48 = vrot.slane %v12075_v35, %v8827_v31  ;;  %7279 = vperm.xlu0 %8352, %v6056_v43   ;;  %v10537_v38 = vcombine.low %v3899_v10, %v3906_v9  ;;  %v5903_v29 = vcombine.low %v5895_v36, %v5902_v16  ;;  %12076 = vst [vmem:[#allocation47_spill] sm:$0xff] %v10539_v51  ;;  %v12080_v35 = vld [vmem:[#allocation59_spill] sm:$0xff] }
 0x1e0   : > { %v5929_v37 = vrot.slane %v12077_v58, %v8854_v59  ;;  %v5936_v34 = vrot.slane %v12078_v40, %v8854_v59  ;;  %v10545_v45 = vcombine.low %v3913_v1, %v3920_v20  ;;  %v6090_v13 = vcombine.low %v6082_v62, %v6089_v46  ;;  %v10559_v58 = vpop.permute.xlu1 %7081  ;;  %v12086_v20 = vld [vmem:[#allocation63_spill] sm:$0xff]  ;;  %v12090_v46 = vld [vmem:[#allocation68_spill] sm:$0xff] }
 0x1e1   : > { %v6116_v42 = vrot.slane %v12079_v21, %v8854_v59  ;;  %v6123_v43 = vrot.slane %v12080_v35, %v8854_v59  ;;  %v10551_v10 = vcombine.low %v3983_v54, %v3990_v52  ;;  %v10553_v9 = vcombine.low %v3997_v56, %v4004_v5  ;;  %12083 = vst [vmem:[#allocation20_spill] sm:$0xff] %v10559_v58  ;;  %v12087_v56 = vld [vmem:[#allocation50_spill] sm:$0xff] }
 0x1e2   : > { %v10555_v16 = vcombine.low %v3955_v50, %v3962_v6  ;;  %v10557_v36 = vcombine.low %v3969_v27, %v3976_v61  ;;  %7252 = vperm.xlu1 %8353, %v5903_v29   ;;  %v10561_v40 = vcombine.low %v4039_v60, %v4046_v17  ;;  %v10563_v62 = vcombine.low %v4053_v15, %v4060_v55  ;;  %v12088_v50 = vld [vmem:[#allocation52_spill] sm:$0xff]  ;;  %v12089_v27 = vld [vmem:[#allocation31_spill] sm:$0xff] }
 0x1e3   : > { %v10565_v1 = vcombine.low %v4011_v32, %v4018_v3  ;;  %v10567_v21 = vcombine.low %v4025_v57, %v4032_v48  ;;  %7285 = vperm.xlu0 %8352, %v6090_v13   ;;  %v4095_v54 = vrot.slane %v12086_v20, %v8812_v18  ;;  %v5937_v52 = vcombine.low %v5929_v37, %v5936_v34  ;;  %v12091_v15 = vld [vmem:[#allocation67_spill] sm:$0xff]  ;;  %v12094_v3 = vld [vmem:[#allocation69_spill] sm:$0xff] }
 0x1e4   : > { %12081 = vst [vmem:[#allocation55_spill] sm:$0xff] %v10555_v16  ;;  %12082 = vst [vmem:[#allocation62_spill] sm:$0xff] %v10557_v36  ;;  %v5963_v5 = vrot.slane %v12087_v56, %v8854_v59  ;;  %v5970_v6 = vrot.slane %v12088_v50, %v8854_v59  ;;  %v4102_v29 = vrot.slane %v12086_v20, %v8815_v19  ;;  %v10589_v32 = vpop.permute.xlu1 %7084  ;;  %v12100_v36 = vld [vmem:[#allocation80_spill] sm:$0xff] }
 0x1e5   : > { %12084 = vst [vmem:[#allocation19_spill] sm:$0xff] %v10565_v1  ;;  %12085 = vst [vmem:[#allocation21_spill] sm:$0xff] %v10567_v21  ;;  %v6124_v60 = vcombine.low %v6116_v42, %v6123_v43  ;;  %v6150_v61 = vrot.slane %v12089_v27, %v8854_v59  ;;  %v6157_v13 = vrot.slane %v12090_v46, %v8854_v59  ;;  %v10591_v42 = vpop.permute.xlu0 %7078  ;;  %v12096_v27 = vld [vmem:[#allocation15_spill] sm:$0xff] }
 0x1e6   : > { %v4109_v17 = vrot.slane %v12086_v20, %v8824_v30  ;;  %v4116_v34 = vrot.slane %v12086_v20, %v8827_v31  ;;  %v4067_v55 = vrot.slane %v12091_v15, %v8812_v18  ;;  %v4074_v37 = vrot.slane %v12091_v15, %v8815_v19  ;;  %12092 = vst [vmem:[#allocation48_spill] sm:$0xff] %v10589_v32 }
 0x1e7   : > { %7258 = vperm.xlu1 %8353, %v5937_v52   ;;  %12093 = vst [vmem:[#allocation12_spill] sm:$0xff] %v10591_v42  ;;  %v4151_v57 = vrot.slane %v12094_v3, %v8812_v18  ;;  %v4158_v48 = vrot.slane %v12094_v3, %v8815_v19  ;;  %v4081_v35 = vrot.slane %v12091_v15, %v8824_v30  ;;  %v12095_v52 = vld [vmem:[#allocation14_spill] sm:$0xff] }
 0x1e8   : > { %v4088_v43 = vrot.slane %v12091_v15, %v8827_v31  ;;  %7291 = vperm.xlu0 %8352, %v6124_v60   ;;  %v4165_v20 = vrot.slane %v12094_v3, %v8824_v30  ;;  %v5971_v56 = vcombine.low %v5963_v5, %v5970_v6  ;;  %v5997_v50 = vrot.slane %v12095_v52, %v8854_v59  ;;  %v12097_v15 = vld [vmem:[#allocation84_spill] sm:$0xff] }
 0x1e9   : > { %v6004_v46 = vrot.slane %v12096_v27, %v8854_v59  ;;  %v4172_v32 = vrot.slane %v12094_v3, %v8827_v31  ;;  %v6158_v58 = vcombine.low %v6150_v61, %v6157_v13  ;;  %v6184_v42 = vrot.slane %v10167_v8, %v8854_v59  ;;  %v10621_v3 = vpop.permute.xlu1 %7087  ;;  %v10623_v61 = vpop.permute.xlu0 %7105 }
 0x1ea   : > { %v6191_v60 = vrot.slane %v10169_v12, %v8854_v59  ;;  %v4123_v51 = vrot.slane %v12097_v15, %v8812_v18  ;;  %v4130_v5 = vrot.slane %v12097_v15, %v8815_v19  ;;  %v4137_v6 = vrot.slane %v12097_v15, %v8824_v30  ;;  %12098 = vst [vmem:[#allocation22_spill] sm:$0xff] %v10621_v3  ;;  %v12101_v3 = vld [vmem:[#allocation81_spill] sm:$0xff] }
 0x1eb   : > { %v4144_v52 = vrot.slane %v12097_v15, %v8827_v31  ;;  %7264 = vperm.xlu1 %8353, %v5971_v56   ;;  %12099 = vst [vmem:[#allocation57_spill] sm:$0xff] %v10623_v61  ;;  %v10625_v8 = vcombine.low %v4095_v54, %v4102_v29  ;;  %v10627_v12 = vcombine.low %v4109_v17, %v4116_v34 }
 0x1ec   : > { %v10629_v13 = vcombine.low %v4067_v55, %v4074_v37  ;;  %v10631_v27 = vcombine.low %v4081_v35, %v4088_v43  ;;  %7297 = vperm.xlu0 %8352, %v6158_v58   ;;  %v10633_v21 = vcombine.low %v4151_v57, %v4158_v48  ;;  %v6005_v1 = vcombine.low %v5997_v50, %v6004_v46  ;;  %v12102_v58 = vld [vmem:[#allocation16_spill] sm:$0xff] }
 0x1ed   : > { %v6031_v15 = vrot.slane %v12100_v36, %v8854_v59  ;;  %v6038_v56 = vrot.slane %v12101_v3, %v8854_v59  ;;  %v10639_v16 = vcombine.low %v4165_v20, %v4172_v32  ;;  %v6192_v54 = vcombine.low %v6184_v42, %v6191_v60  ;;  %v10653_v57 = vpop.permute.xlu1 %7090  ;;  %v10655_v32 = vpop.permute.xlu0 %7111  ;;  %v12107_v42 = vld [vmem:[#allocation33_spill] sm:$0xff]  ;;  %v12109_v50 = vld [vmem:[#allocation24_spill] sm:$0xff] }
 0x1ee   : > { %v6218_v29 = vrot.slane %v10179_v44, %v8854_v59  ;;  %v6225_v17 = vrot.slane %v10181_v11, %v8854_v59  ;;  %v4207_v34 = vrot.slane %v12102_v58, %v8812_v18  ;;  %v4214_v55 = vrot.slane %v12102_v58, %v8815_v19  ;;  %12105 = vst [vmem:[#allocation13_spill] sm:$0xff] %v10653_v57 }
 0x1ef   : > { %v10649_v37 = vcombine.low %v4123_v51, %v4130_v5  ;;  %v10651_v36 = vcombine.low %v4137_v6, %v4144_v52  ;;  %7270 = vperm.xlu1 %8353, %v6005_v1   ;;  %12106 = vst [vmem:[#allocation49_spill] sm:$0xff] %v10655_v32  ;;  %v4221_v44 = vrot.slane %v12102_v58, %v8824_v30  ;;  %v12108_v1 = vld [vmem:[#allocation58_spill] sm:$0xff] }
 0x1f0   : > { %v4228_v11 = vrot.slane %v12102_v58, %v8827_v31  ;;  %v4179_v48 = vrot.slane %v12107_v42, %v8812_v18  ;;  %v4186_v51 = vrot.slane %v12107_v42, %v8815_v19  ;;  %7303 = vperm.xlu0 %8352, %v6192_v54   ;;  %v4193_v35 = vrot.slane %v12107_v42, %v8824_v30 }
 0x1f1   : > { %12103 = vst [vmem:[#allocation82_spill] sm:$0xff] %v10649_v37  ;;  %12104 = vst [vmem:[#allocation83_spill] sm:$0xff] %v10651_v36  ;;  %v6039_v43 = vcombine.low %v6031_v15, %v6038_v56  ;;  %v6065_v20 = vrot.slane %v12108_v1, %v8854_v59  ;;  %v6072_v46 = vrot.slane %v12109_v50, %v8854_v59  ;;  %v10685_v58 = vpop.permute.xlu1 %7093 }
 0x1f2   : > { %v4200_v60 = vrot.slane %v12107_v42, %v8827_v31  ;;  %v6226_v5 = vcombine.low %v6218_v29, %v6225_v17  ;;  %v6252_v6 = vrot.slane %v10243_v26, %v8854_v59  ;;  %v6259_v52 = vrot.slane %v10245_v7, %v8854_v59  ;;  %12110 = vst [vmem:[#allocation27_spill] sm:$0xff] %v10685_v58  ;;  %v10687_v29 = vpop.permute.xlu0 %7117  ;;  %v12112_v26 = vld [vmem:[#allocation36_spill] sm:$0xff] }
 0x1f3   : > { %v4263_v3 = vrot.slane %v10175_v33, %v8812_v18  ;;  %v4270_v15 = vrot.slane %v10175_v33, %v8815_v19  ;;  %v4277_v56 = vrot.slane %v10175_v33, %v8824_v30  ;;  %v4284_v54 = vrot.slane %v10175_v33, %v8827_v31  ;;  %7276 = vperm.xlu1 %8353, %v6039_v43   ;;  %v12113_v43 = vld [vmem:[#allocation60_spill] sm:$0xff] }
 0x1f4   : > { %12111 = vst [vmem:[#allocation59_spill] sm:$0xff] %v10687_v29  ;;  %v4235_v7 = vrot.slane %v12112_v26, %v8812_v18  ;;  %v4242_v17 = vrot.slane %v12112_v26, %v8815_v19  ;;  %v4249_v42 = vrot.slane %v12112_v26, %v8824_v30  ;;  %v4256_v1 = vrot.slane %v12112_v26, %v8827_v31  ;;  %v12114_v29 = vld [vmem:[#allocation25_spill] sm:$0xff] }
 0x1f5   : > { %7309 = vperm.xlu0 %8352, %v6226_v5   ;;  %v10697_v50 = vcombine.low %v4207_v34, %v4214_v55  ;;  %v6073_v33 = vcombine.low %v6065_v20, %v6072_v46  ;;  %v6099_v32 = vrot.slane %v12113_v43, %v8854_v59  ;;  %v6106_v61 = vrot.slane %v12114_v29, %v8854_v59  ;;  %v10717_v46 = vpop.permute.xlu1 %7096 }
 0x1f6   : > { %v10703_v58 = vcombine.low %v4221_v44, %v4228_v11  ;;  %v6260_v57 = vcombine.low %v6252_v6, %v6259_v52  ;;  %v6286_v36 = vrot.slane %v10251_v22, %v8854_v59  ;;  %v6293_v37 = vrot.slane %v10257_v47, %v8854_v59  ;;  %12116 = vst [vmem:[#allocation50_spill] sm:$0xff] %v10717_v46  ;;  %v10719_v44 = vpop.permute.xlu0 %7123  ;;  %v12141_v11 = vld [vmem:[#allocation64_spill] sm:$0xff] }
 0x1f7   : > { %v10709_v26 = vcombine.low %v4263_v3, %v4270_v15  ;;  %v10711_v34 = vcombine.low %v4277_v56, %v4284_v54  ;;  %v10713_v55 = vcombine.low %v4179_v48, %v4186_v51  ;;  %v10715_v20 = vcombine.low %v4193_v35, %v4200_v60  ;;  %7282 = vperm.xlu1 %8353, %v6073_v33   ;;  %v12122_v35 = vld [vmem:[#allocation42_spill] sm:$0xff]  ;;  %v12123_v3 = vld [vmem:[#allocation17_spill] sm:$0xff] }
 0x1f8   : > { %12117 = vst [vmem:[#allocation52_spill] sm:$0xff] %v10719_v44  ;;  %v10723_v22 = vcombine.low %v4235_v7, %v4242_v17  ;;  %v10725_v6 = vcombine.low %v4249_v42, %v4256_v1  ;;  %v12121_v47 = vlaneseq  ;;  %v6107_v51 = vcombine.low %v6099_v32, %v6106_v61 }
 0x1f9   : > { %12115 = vst [vmem:[#allocation63_spill] sm:$0xff] %v10715_v20  ;;  %7315 = vperm.xlu0 %8352, %v6260_v57   ;;  %v6133_v60 = vrot.slane %v12122_v35, %v8854_v59  ;;  %v6140_v15 = vrot.slane %v12123_v3, %v8854_v59  ;;  %v6294_v29 = vcombine.low %v6286_v36, %v6293_v37  ;;  %v10750_v1 = vpop.permute.xlu1 %7099  ;;  %v12127_v35 = vld [vmem:[#allocation35_spill] sm:$0xff] }
 0x1fa   : > { %12119 = vst [vmem:[#allocation31_spill] sm:$0xff] %v10723_v22  ;;  %12120 = vst [vmem:[#allocation68_spill] sm:$0xff] %v10725_v6  ;;  %v10728_v52 = vand.u32 127, %v12121_v47  ;;  %v6320_v7 = vrot.slane %v10307_v2, %v8854_v59  ;;  %v6327_v57 = vrot.slane %v10309_v0, %v8854_v59  ;;  %v4487_v17 = vrot.slane %v10303_v24, %v8812_v18  ;;  %v10752_v37 = vpop.permute.xlu0 %7129  ;;  %v12126_v47 = vld [vmem:[#allocation26_spill] sm:$0xff]  ;;  %v12152_v6 = vld [vmem:[#allocation76_spill] sm:$0xff] }
 0x1fb   : > { %v4494_v61 = vrot.slane %v10303_v24, %v8815_v19  ;;  %v4501_v32 = vrot.slane %v10303_v24, %v8824_v30  ;;  %v4508_v42 = vrot.slane %v10303_v24, %v8827_v31  ;;  %12125 = vst [vmem:[#allocation67_spill] sm:$0xff] %v10750_v1  ;;  %7288 = vperm.xlu1 %8353, %v6107_v51  }
 0x1fc   : > { %v4459_v2 = vrot.slane %v10305_v41, %v8812_v18  ;;  %v4466_v0 = vrot.slane %v10305_v41, %v8815_v19  ;;  %v4473_v36 = vrot.slane %v10305_v41, %v8824_v30  ;;  %v7467_v33 = vadd.s32 4294967288, %v10728_v52 }
 0x1fd   : > { %7321 = vperm.xlu0 %8352, %v6294_v29   ;;  %v4480_v24 = vrot.slane %v10305_v41, %v8827_v31  ;;  %v6141_v43 = vcombine.low %v6133_v60, %v6140_v15  ;;  %v6167_v51 = vrot.slane %v12126_v47, %v8854_v59  ;;  %v6174_v3 = vrot.slane %v12127_v35, %v8854_v59  ;;  %v10781_v35 = vpop.permute.xlu1 %7102  ;;  %v12130_v41 = vld [vmem:[#allocation9_spill] sm:$0xff] }
 0x1fe   : > { %v6328_v48 = vcombine.low %v6320_v7, %v6327_v57  ;;  %v6354_v54 = vrot.slane %v10327_v23, %v8854_v59  ;;  %v6361_v29 = vrot.slane %v10329_v14, %v8854_v59  ;;  %v10777_v15 = vcombine.low %v4487_v17, %v4494_v61  ;;  %12128 = vst [vmem:[#allocation69_spill] sm:$0xff] %v10781_v35  ;;  %v10783_v7 = vpop.permute.xlu0 %7135 }
 0x1ff   : > { %v10779_v47 = vcombine.low %v4501_v32, %v4508_v42  ;;  %7294 = vperm.xlu1 %8353, %v6141_v43   ;;  %v4543_v23 = vrot.slane %v10335_v4, %v8812_v18  ;;  %v4550_v14 = vrot.slane %v10335_v4, %v8815_v19  ;;  %v10789_v57 = vcombine.low %v4459_v2, %v4466_v0  ;;  %v12132_v32 = vld [vmem:[#allocation34_spill] sm:$0xff] }
 0x200   : > { %v10792_v5 = vsub.s32 %v7467_v33, %v12130_v41  ;;  %v10794_v17 = vcombine.low %v4473_v36, %v4480_v24  ;;  %v6175_v61 = vcombine.low %v6167_v51, %v6174_v3  ;;  %v6201_v42 = vrot.slane %v12132_v32, %v8854_v59  ;;  %v12133_v43 = vld [vmem:[#allocation18_spill] sm:$0xff] }
 0x201   : > { %12129 = vst [vmem:[#allocation14_spill] sm:$0xff] %v10789_v57  ;;  %7327 = vperm.xlu0 %8352, %v6328_v48   ;;  %v6208_v60 = vrot.slane %v12133_v43, %v8854_v59  ;;  %v4557_v44 = vrot.slane %v10335_v4, %v8824_v30  ;;  %v6362_v35 = vcombine.low %v6354_v54, %v6361_v29  ;;  %v10814_v51 = vpop.permute.xlu1 %7108 }
 0x202   : > { %12131 = vst [vmem:[#allocation15_spill] sm:$0xff] %v10794_v17  ;;  %v6388_v2 = vrot.slane %v10371_v25, %v8854_v59  ;;  %v6395_v0 = vrot.slane %v10373_v39, %v8854_v59  ;;  %v4564_v48 = vrot.slane %v10335_v4, %v8827_v31  ;;  %v4515_v36 = vrot.slane %v10337_v63, %v8812_v18  ;;  %v10816_v54 = vpop.permute.xlu0 %7141 }
 0x203   : > { %v4522_v33 = vrot.slane %v10337_v63, %v8815_v19  ;;  %v4529_v24 = vrot.slane %v10337_v63, %v8824_v30  ;;  %12134 = vst [vmem:[#allocation84_spill] sm:$0xff] %v10814_v51  ;;  %7300 = vperm.xlu1 %8353, %v6175_v61   ;;  %v10818_v25 = vcombine.low %v4543_v23, %v4550_v14  ;;  %v12135_v23 = vld [vmem:[#allocation23_spill] sm:$0xff] }
 0x204   : > { %v4599_v39 = vrot.slane %v10367_v28, %v8812_v18  ;;  %v4606_v4 = vrot.slane %v10367_v28, %v8815_v19  ;;  %v4536_v3 = vrot.slane %v10337_v63, %v8827_v31  ;;  %v4613_v29 = vrot.slane %v10367_v28, %v8824_v30  ;;  %v12136_v63 = vld [vmem:[#allocation75_spill] sm:$0xff] }
 0x205   : > { %7333 = vperm.xlu0 %8352, %v6362_v35   ;;  %v6209_v32 = vcombine.low %v6201_v42, %v6208_v60  ;;  %v6235_v61 = vrot.slane %v10247_v49, %v8854_v59  ;;  %v6242_v14 = vrot.slane %v12135_v23, %v8854_v59  ;;  %v4620_v43 = vrot.slane %v10367_v28, %v8827_v31  ;;  %v12137_v60 = vld [vmem:[#allocation39_spill] sm:$0xff]  ;;  %v10845_v56 = vpop.permute.xlu1 %7114 }
 0x206   : > { %v6396_v51 = vcombine.low %v6388_v2, %v6395_v0  ;;  %v6422_v1 = vrot.slane %v10423_v53, %v8854_v59  ;;  %v6429_v35 = vrot.slane %v12136_v63, %v8854_v59  ;;  %v10838_v46 = vcombine.low %v4557_v44, %v4564_v48  ;;  %12138 = vst [vmem:[#allocation80_spill] sm:$0xff] %v10845_v56  ;;  %v10847_v28 = vpop.permute.xlu0 %7147 }
 0x207   : > { %v4571_v42 = vrot.slane %v12137_v60, %v8812_v18  ;;  %v4578_v49 = vrot.slane %v12137_v60, %v8815_v19  ;;  %v7474_v23 = vadd.s32 4294967280, %v10728_v52  ;;  %7306 = vperm.xlu1 %8353, %v6209_v32   ;;  %v10849_v2 = vcombine.low %v4515_v36, %v4522_v33  ;;  %v12142_v32 = vld [vmem:[#allocation10_spill] sm:$0xff] }
 0x208   : > { %v10851_v53 = vcombine.low %v4529_v24, %v4536_v3  ;;  %v4585_v44 = vrot.slane %v12137_v60, %v8824_v30  ;;  %v4592_v0 = vrot.slane %v12137_v60, %v8827_v31  ;;  %v10857_v48 = vcombine.low %v4599_v39, %v4606_v4  ;;  %v12143_v24 = vld [vmem:[#allocation54_spill] sm:$0xff] }
 0x209   : > { %12139 = vst [vmem:[#allocation81_spill] sm:$0xff] %v10849_v2  ;;  %7339 = vperm.xlu0 %8352, %v6396_v51   ;;  %v6243_v63 = vcombine.low %v6235_v61, %v6242_v14  ;;  %v6269_v56 = vrot.slane %v12141_v11, %v8854_v59  ;;  %v6276_v17 = vrot.slane %v12142_v32, %v8854_v59  ;;  %v12145_v51 = vld [vmem:[#allocation78_spill] sm:$0xff]  ;;  %v12150_v32 = vld [vmem:[#allocation65_spill] sm:$0xff] }
 0x20a   : > { %12140 = vst [vmem:[#allocation16_spill] sm:$0xff] %v10851_v53  ;;  %v10863_v36 = vcombine.low %v4613_v29, %v4620_v43  ;;  %v6430_v33 = vcombine.low %v6422_v1, %v6429_v35  ;;  %v6456_v3 = vrot.slane %v12143_v24, %v8854_v59  ;;  %v12144_v53 = vld [vmem:[#allocation51_spill] sm:$0xff]  ;;  %v4655_v39 = vrot.slane %v12145_v51, %v8812_v18  ;;  %v10878_v29 = vpop.permute.xlu1 %7120  ;;  %v10880_v1 = vpop.permute.xlu0 %7153  ;;  %v12148_v35 = vld [vmem:[#allocation30_spill] sm:$0xff] }
 0x20b   : > { %v6463_v2 = vrot.slane %v12144_v53, %v8854_v59  ;;  %v4662_v4 = vrot.slane %v12145_v51, %v8815_v19  ;;  %v10873_v61 = vcombine.low %v4571_v42, %v4578_v49  ;;  %v10876_v11 = vsub.s32 %v7474_v23, %v12130_v41  ;;  %12147 = vst [vmem:[#allocation58_spill] sm:$0xff] %v10878_v29  ;;  %v12149_v53 = vld [vmem:[#allocation77_spill] sm:$0xff] }
 0x20c   : > { %7312 = vperm.xlu1 %8353, %v6243_v63   ;;  %v4669_v14 = vrot.slane %v12145_v51, %v8824_v30  ;;  %v4676_v43 = vrot.slane %v12145_v51, %v8827_v31  ;;  %v4627_v60 = vrot.slane %v12148_v35, %v8812_v18  ;;  %v4634_v42 = vrot.slane %v12148_v35, %v8815_v19 }
 0x20d   : > { %12146 = vst [vmem:[#allocation33_spill] sm:$0xff] %v10873_v61  ;;  %7345 = vperm.xlu0 %8352, %v6430_v33   ;;  %v4641_v49 = vrot.slane %v12148_v35, %v8824_v30  ;;  %v6277_v23 = vcombine.low %v6269_v56, %v6276_v17  ;;  %v6303_v63 = vrot.slane %v12149_v53, %v8854_v59  ;;  %v12151_v61 = vld [vmem:[#allocation74_spill] sm:$0xff] }
 0x20e   : > { %v6310_v24 = vrot.slane %v12150_v32, %v8854_v59  ;;  %v4648_v51 = vrot.slane %v12148_v35, %v8827_v31  ;;  %v6464_v29 = vcombine.low %v6456_v3, %v6463_v2  ;;  %v6490_v57 = vrot.slane %v12151_v61, %v8854_v59  ;;  %v7127_v17 = vpop.permute.xlu1 %7126  ;;  %v10910_v53 = vpop.permute.xlu0 %7159  ;;  %v12155_v35 = vld [vmem:[#allocation11_spill] sm:$0xff] }
 0x20f   : > { %v6497_v33 = vrot.slane %v12152_v6, %v8854_v59  ;;  %v10902_v22 = vcombine.low %v4655_v39, %v4662_v4  ;;  %v10904_v20 = vcombine.low %v4585_v44, %v4592_v0  ;;  %v10908_v56 = vsub.s32 %v10728_v52, %v12130_v41  ;;  %v12154_v39 = vld [vmem:[#allocation66_spill] sm:$0xff] }
 0x210   : > { %7318 = vperm.xlu1 %8353, %v6277_v23   ;;  %v10912_v2 = vcombine.low %v4669_v14, %v4676_v43  ;;  %v10914_v3 = vcombine.low %v4627_v60, %v4634_v42  ;;  %v7481_v61 = vadd.s32 4294967272, %v10728_v52  ;;  %v7488_v6 = vadd.s32 4294967264, %v10728_v52 }
 0x211   : > { %7351 = vperm.xlu0 %8352, %v6464_v29   ;;  %v7575_v44 = vrot.slane %v7127_v17, %v10908_v56  ;;  %v6311_v0 = vcombine.low %v6303_v63, %v6310_v24  ;;  %v6337_v4 = vrot.slane %v12154_v39, %v8854_v59  ;;  %v6344_v23 = vrot.slane %v12155_v35, %v8854_v59  ;;  %v12157_v29 = vld [vmem:[#allocation28_spill] sm:$0xff] }
 0x212   : > { %12153 = vst [vmem:[#allocation24_spill] sm:$0xff] %v10914_v3  ;;  %v10923_v32 = vcombine.low %v4641_v49, %v4648_v51  ;;  %v6498_v14 = vcombine.low %v6490_v57, %v6497_v33  ;;  %v6524_v43 = vrot.slane %v10551_v10, %v8854_v59  ;;  %v6531_v60 = vrot.slane %v10553_v9, %v8854_v59  ;;  %v7133_v17 = vpop.permute.xlu1 %7132  ;;  %v10934_v49 = vpop.permute.xlu0 %7165 }
 0x213   : > { %v7495_v63 = vadd.s32 4294967256, %v10728_v52  ;;  %v7579_v24 = vrot.slane %v10752_v37, %v10792_v5  ;;  %v10937_v57 = vsub.s32 %v7481_v61, %v12130_v41  ;;  %v10940_v10 = vsub.s32 %v7488_v6, %v12130_v41  ;;  %v12158_v37 = vld [vmem:[#allocation32_spill] sm:$0xff] }
 0x214   : > { %12156 = vst [vmem:[#allocation36_spill] sm:$0xff] %v10923_v32  ;;  %7324 = vperm.xlu1 %8353, %v6311_v0   ;;  %v7502_v9 = vadd.s32 4294967248, %v10728_v52  ;;  %v7584_v51 = vrot.slane %v7133_v17, %v10876_v11  ;;  %v6345_v39 = vcombine.low %v6337_v4, %v6344_v23  ;;  %v6371_v35 = vrot.slane %v12158_v37, %v8854_v59  ;;  %v12159_v0 = vld [vmem:[#allocation40_spill] sm:$0xff]  ;;  %v12160_v17 = vld [vmem:[#allocation41_spill] sm:$0xff] }
 0x215   : > { %7357 = vperm.xlu0 %8352, %v6498_v14   ;;  %v7580_v33 = vsel %vm7472_vm0, %v7579_v24, %v7575_v44  ;;  %v6378_v42 = vrot.slane %v12159_v0, %v8854_v59  ;;  %v6532_v32 = vcombine.low %v6524_v43, %v6531_v60  ;;  %v6558_v6 = vrot.slane %v10561_v40, %v8854_v59 }
 0x216   : > { %v7585_v61 = vsel %vm7479_vm1, %v7584_v51, %v7580_v33  ;;  %v6565_v3 = vrot.slane %v10563_v62, %v8854_v59  ;;  %v10955_v44 = vsub.s32 %v7495_v63, %v12130_v41  ;;  %v7589_v4 = vrot.slane %v10783_v7, %v10937_v57  ;;  %v7139_v23 = vpop.permute.xlu1 %7138  ;;  %v10959_v14 = vpop.permute.xlu0 %7171  ;;  %v12161_v51 = vld [vmem:[#allocation46_spill] sm:$0xff] }
 0x217   : > { %v10962_v43 = vsub.s32 %v7502_v9, %v12130_v41  ;;  %v7509_v40 = vadd.s32 4294967240, %v10728_v52  ;;  %v7516_v60 = vadd.s32 4294967232, %v10728_v52  ;;  %v7594_v62 = vrot.slane %v7139_v23, %v10940_v10 }
 0x218   : > { %7330 = vperm.xlu1 %8353, %v6345_v39   ;;  %v7590_v63 = vsel %vm7486_vm2, %v7589_v4, %v7585_v61  ;;  %v6379_v24 = vcombine.low %v6371_v35, %v6378_v42  ;;  %v6405_v7 = vrot.slane %v12160_v17, %v8854_v59  ;;  %v6412_v33 = vrot.slane %v12161_v51, %v8854_v59 }
 0x219   : > { %7363 = vperm.xlu0 %8352, %v6532_v32   ;;  %v7595_v39 = vsel %vm7493_vm3, %v7594_v62, %v7590_v63  ;;  %v6566_v9 = vcombine.low %v6558_v6, %v6565_v3  ;;  %v6592_v37 = vrot.slane %v10625_v8, %v8854_v59  ;;  %v6599_v0 = vrot.slane %v10627_v12, %v8854_v59  ;;  %v12163_v63 = vld [vmem:[#allocation73_spill] sm:$0xff] }
 0x21a   : > { %v7523_v32 = vadd.s32 4294967224, %v10728_v52  ;;  %v7599_v42 = vrot.slane %v10816_v54, %v10955_v44  ;;  %v7145_v35 = vpop.permute.xlu1 %7144  ;;  %v10980_v61 = vpop.permute.xlu0 %7177  ;;  %v10983_v4 = vsub.s32 %v7509_v40, %v12130_v41  ;;  %v10986_v3 = vsub.s32 %v7516_v60, %v12130_v41  ;;  %v12162_v54 = vld [vmem:[#allocation44_spill] sm:$0xff] }
 0x21b   : > { %v7530_v8 = vadd.s32 4294967216, %v10728_v52  ;;  %v7604_v12 = vrot.slane %v7145_v35, %v10962_v43  ;;  %v6413_v23 = vcombine.low %v6405_v7, %v6412_v33  ;;  %v6439_v62 = vrot.slane %v12162_v54, %v8854_v59 }
 0x21c   : > { %7336 = vperm.xlu1 %8353, %v6379_v24   ;;  %v7600_v6 = vsel %vm7500_vm4, %v7599_v42, %v7595_v39  ;;  %v6446_v24 = vrot.slane %v12163_v63, %v8854_v59  ;;  %v6600_v17 = vcombine.low %v6592_v37, %v6599_v0  ;;  %v6626_v60 = vrot.slane %v10633_v21, %v8854_v59 }
 0x21d   : > { %7369 = vperm.xlu0 %8352, %v6566_v9   ;;  %v7605_v40 = vsel %vm7507_vm5, %v7604_v12, %v7600_v6  ;;  %v6633_v51 = vrot.slane %v10639_v16, %v8854_v59  ;;  %v11001_v9 = vsub.s32 %v7523_v32, %v12130_v41  ;;  %v7537_v7 = vadd.s32 4294967208, %v10728_v52 }
 0x21e   : > { %v7609_v33 = vrot.slane %v10847_v28, %v10983_v4  ;;  %v7151_v39 = vpop.permute.xlu1 %7150  ;;  %v11006_v42 = vpop.permute.xlu0 %7183  ;;  %v11009_v37 = vsub.s32 %v7530_v8, %v12130_v41  ;;  %v7544_v21 = vadd.s32 4294967200, %v10728_v52  ;;  %v6447_v32 = vcombine.low %v6439_v62, %v6446_v24 }
 0x21f   : > { %v7614_v16 = vrot.slane %v7151_v39, %v10986_v3  ;;  %v6473_v35 = vrot.slane %v10537_v38, %v8854_v59  ;;  %v6480_v28 = vrot.slane %v10545_v45, %v8854_v59  ;;  %v6634_v6 = vcombine.low %v6626_v60, %v6633_v51  ;;  %v12164_v60 = vld [vmem:[#allocation55_spill] sm:$0xff] }
 0x220   : > { %7342 = vperm.xlu1 %8353, %v6413_v23   ;;  %v7610_v0 = vsel %vm7514_vm6, %v7609_v33, %v7605_v40  ;;  %v6660_v8 = vrot.slane %v10697_v50, %v8854_v59  ;;  %v6667_v23 = vrot.slane %v10703_v58, %v8854_v59  ;;  %v11024_v54 = vsub.s32 %v7537_v7, %v12130_v41 }
 0x221   : > { %7375 = vperm.xlu0 %8352, %v6600_v17   ;;  %v7615_v12 = vsel %vm7521_vm7, %v7614_v16, %v7610_v0  ;;  %v7551_v62 = vadd.s32 4294967192, %v10728_v52  ;;  %v7619_v38 = vrot.slane %v10880_v1, %v11001_v9  ;;  %v11032_v24 = vsub.s32 %v7544_v21, %v12130_v41  ;;  %v12165_v1 = vld [vmem:[#allocation62_spill] sm:$0xff] }
 0x222   : > { %v7157_v63 = vpop.permute.xlu1 %7156  ;;  %v11029_v45 = vpop.permute.xlu0 %7189  ;;  %v7558_v50 = vadd.s32 4294967184, %v10728_v52  ;;  %v6481_v17 = vcombine.low %v6473_v35, %v6480_v28  ;;  %v6507_v51 = vrot.slane %v12164_v60, %v8854_v59  ;;  %v6514_v7 = vrot.slane %v12165_v1, %v8854_v59 }
 0x223   : > { %v7624_v58 = vrot.slane %v7157_v63, %v11009_v37  ;;  %v7620_v40 = vsel %vm7528_vm8, %v7619_v38, %v7615_v12  ;;  %v6668_v39 = vcombine.low %v6660_v8, %v6667_v23  ;;  %v6694_v21 = vrot.slane %v10709_v26, %v8854_v59  ;;  %v12167_v23 = vld [vmem:[#allocation21_spill] sm:$0xff] }
 0x224   : > { %7348 = vperm.xlu1 %8353, %v6447_v32   ;;  %v6701_v16 = vrot.slane %v10711_v34, %v8854_v59  ;;  %v4718_v0 = vrot.slane %v12157_v29, %v8815_v19  ;;  %v11049_v32 = vsub.s32 %v7551_v62, %v12130_v41  ;;  %v7565_v35 = vadd.s32 4294967176, %v10728_v52  ;;  %v12166_v34 = vld [vmem:[#allocation19_spill] sm:$0xff] }
 0x225   : > { %7381 = vperm.xlu0 %8352, %v6634_v6   ;;  %v7625_v33 = vsel %vm7535_vm9, %v7624_v58, %v7620_v40  ;;  %v7629_v28 = vrot.slane %v10910_v53, %v11024_v54  ;;  %v6541_v8 = vrot.slane %v12166_v34, %v8854_v59  ;;  %v6548_v62 = vrot.slane %v12167_v23, %v8854_v59 }
 0x226   : > { %v7163_v12 = vpop.permute.xlu1 %7162  ;;  %v11054_v6 = vpop.permute.xlu0 %7195  ;;  %v11062_v52 = vsub.s32 %v7558_v50, %v12130_v41  ;;  %v6515_v38 = vcombine.low %v6507_v51, %v6514_v7  ;;  %v6702_v58 = vcombine.low %v6694_v21, %v6701_v16  ;;  %v6830_v40 = vrot.slane %v10777_v15, %v8854_v59 }
 0x227   : > { %v7634_v26 = vrot.slane %v7163_v12, %v11032_v24  ;;  %v7630_v53 = vsel %vm7542_vm10, %v7629_v28, %v7625_v33  ;;  %v4725_v60 = vrot.slane %v12157_v29, %v8824_v30  ;;  %v11073_v1 = vsub.s32 %v7565_v35, %v12130_v41  ;;  %v12168_v12 = vld [vmem:[#allocation29_spill] sm:$0xff] }
 0x228   : > { %7354 = vperm.xlu1 %8353, %v6481_v17   ;;  %v6837_v17 = vrot.slane %v10779_v47, %v8854_v59  ;;  %v7639_v50 = vrot.slane %v10934_v49, %v11049_v32  ;;  %v6549_v47 = vcombine.low %v6541_v8, %v6548_v62  ;;  %v6582_v49 = vrot.slane %v10631_v27, %v8854_v59 }
 0x229   : > { %7387 = vperm.xlu0 %8352, %v6668_v39   ;;  %v7635_v63 = vsel %vm7549_vm11, %v7634_v26, %v7630_v53  ;;  %v7649_v33 = vrot.slane %v10959_v14, %v11073_v1  ;;  %v6575_v39 = vrot.slane %v10629_v13, %v8854_v59  ;;  %v6864_v35 = vrot.slane %v10818_v25, %v8854_v59 }
 0x22a   : > { %v7169_v51 = vpop.permute.xlu1 %7168  ;;  %v11077_v7 = vpop.permute.xlu0 %7201  ;;  %v7640_v41 = vsel %vm7556_vm12, %v7639_v50, %v7635_v63  ;;  %v6838_v16 = vcombine.low %v6830_v40, %v6837_v17  ;;  %v6871_v28 = vrot.slane %v10838_v46, %v8854_v59  ;;  %v4732_v14 = vrot.slane %v12157_v29, %v8827_v31  ;;  %v12171_v17 = vld [vmem:[#allocation83_spill] sm:$0xff] }
 0x22b   : > { %v7644_v15 = vrot.slane %v7169_v51, %v11062_v52  ;;  %v4683_v26 = vrot.slane %v12168_v12, %v8812_v18  ;;  %v4690_v13 = vrot.slane %v12168_v12, %v8815_v19  ;;  %v4697_v25 = vrot.slane %v12168_v12, %v8824_v30 }
 0x22c   : > { %7360 = vperm.xlu1 %8353, %v6515_v38   ;;  %v4704_v46 = vrot.slane %v12168_v12, %v8827_v31  ;;  %v7658_v23 = vrot.slane %v10980_v61, %v10792_v5  ;;  %v12169_v53 = vrot.slane %v12157_v29, %v8812_v18  ;;  %v6583_v63 = vcombine.low %v6575_v39, %v6582_v49  ;;  %v12172_v29 = vld [vmem:[#allocation72_spill] sm:$0xff]  ;;  %v12173_v39 = vld [vmem:[#allocation43_spill] sm:$0xff] }
 0x22d   : > { %7393 = vperm.xlu0 %8352, %v6702_v58   ;;  %v7645_v21 = vsel %vm7563_vm13, %v7644_v15, %v7640_v41  ;;  %v12170_v58 = vld [vmem:[#allocation82_spill] sm:$0xff]  ;;  %v6616_v50 = vrot.slane %v12171_v17, %v8854_v59  ;;  %v6872_v15 = vcombine.low %v6864_v35, %v6871_v28  ;;  %v6898_v61 = vrot.slane %v10857_v48, %v8854_v59 }
 0x22e   : > { %v11099_v27 = vsel %vm7570_vm14, %v7649_v33, %v7645_v21  ;;  %v7175_v34 = vpop.permute.xlu1 %7174  ;;  %v11101_v8 = vpop.permute.xlu0 %7207  ;;  %v11113_v38 = vcombine.low %v12169_v53, %v4718_v0  ;;  %v6609_v40 = vrot.slane %v12170_v58, %v8854_v59  ;;  %v6959_v33 = vcombine.low %v4725_v60, %v4732_v14 }
 0x22f   : > { %v7654_v62 = vrot.slane %v7175_v34, %v10908_v56  ;;  %v4767_v0 = vrot.slane %v12172_v29, %v8812_v18  ;;  %v4774_v41 = vrot.slane %v12172_v29, %v8815_v19  ;;  %v4739_v49 = vrot.slane %v12173_v39, %v8812_v18 }
 0x230   : > { %7366 = vperm.xlu1 %8353, %v6549_v47   ;;  %v6905_v47 = vrot.slane %v10863_v36, %v8854_v59  ;;  %v4746_v48 = vrot.slane %v12173_v39, %v8815_v19  ;;  %v4753_v36 = vrot.slane %v12173_v39, %v8824_v30  ;;  %v4760_v60 = vrot.slane %v12173_v39, %v8827_v31 }
 0x231   : > { %7417 = vperm.xlu0 %8352, %v6838_v16   ;;  %v7659_v51 = vsel %vm7472_vm0, %v7658_v23, %v7654_v62  ;;  %v7668_v28 = vrot.slane %v11006_v42, %v10937_v57  ;;  %v6617_v14 = vcombine.low %v6609_v40, %v6616_v50  ;;  %v6643_v34 = vrot.slane %v10713_v55, %v8854_v59  ;;  %v12174_v23 = vld [vmem:[#allocation63_spill] sm:$0xff] }
 0x232   : > { %v7181_v21 = vpop.permute.xlu1 %7180  ;;  %v11130_v16 = vpop.permute.xlu0 %7213  ;;  %v6650_v62 = vrot.slane %v12174_v23, %v8854_v59  ;;  %v6932_v58 = vrot.slane %v10902_v22, %v8854_v59  ;;  %v6939_v17 = vrot.slane %v10912_v2, %v8854_v59  ;;  %v4788_v42 = vrot.slane %v12172_v29, %v8827_v31 }
 0x233   : > { %v7663_v35 = vrot.slane %v7181_v21, %v10876_v11  ;;  %v11154_v40 = vcombine.low %v4683_v26, %v4690_v13  ;;  %v6975_v22 = vcombine.low %v4739_v49, %v4746_v48  ;;  %v7678_v39 = vrot.slane %v11029_v45, %v10955_v44  ;;  %v12175_v26 = vld [vmem:[#allocation31_spill] sm:$0xff]  ;;  %v12177_v48 = vld [vmem:[#allocation45_spill] sm:$0xff] }
 0x234   : > { %7372 = vperm.xlu1 %8353, %v6583_v63   ;;  %v6906_v63 = vcombine.low %v6898_v61, %v6905_v47  ;;  %v11159_v61 = vcombine.low %v4767_v0, %v4774_v41  ;;  %v6976_v47 = vcombine.low %v4753_v36, %v4760_v60  ;;  %v6651_v21 = vcombine.low %v6643_v34, %v6650_v62  ;;  %v12178_v45 = vld [vmem:[#allocation53_spill] sm:$0xff] }
 0x235   : > { %7423 = vperm.xlu0 %8352, %v6872_v15   ;;  %v7664_v53 = vsel %vm7479_vm1, %v7663_v35, %v7659_v51  ;;  %v4781_v15 = vrot.slane %v12172_v29, %v8824_v30  ;;  %v6677_v13 = vrot.slane %v12175_v26, %v8854_v59  ;;  %v12176_v29 = vld [vmem:[#allocation68_spill] sm:$0xff]  ;;  %v6966_v0 = vrot.slane %v11113_v38, %v8854_v59 }
 0x236   : > { %v7187_v55 = vpop.permute.xlu1 %7186  ;;  %v7669_v50 = vsel %vm7486_vm2, %v7668_v28, %v7664_v53  ;;  %v11157_v51 = vpop.permute.xlu0 %7219  ;;  %v6684_v35 = vrot.slane %v12176_v29, %v8854_v59  ;;  %v6973_v41 = vrot.slane %v6959_v33, %v8854_v59  ;;  %v4823_v36 = vrot.slane %v12177_v48, %v8812_v18 }
 0x237   : > { %v7673_v2 = vrot.slane %v7187_v55, %v10940_v10  ;;  %v6993_v49 = vcombine.low %v4781_v15, %v4788_v42  ;;  %v4795_v60 = vrot.slane %v12178_v45, %v8812_v18  ;;  %v4802_v53 = vrot.slane %v12178_v45, %v8815_v19  ;;  %v12179_v15 = vld [vmem:[#allocation14_spill] sm:$0xff]  ;;  %v12180_v55 = vld [vmem:[#allocation15_spill] sm:$0xff] }
 0x238   : > { %7378 = vperm.xlu1 %8353, %v6617_v14   ;;  %v6940_v14 = vcombine.low %v6932_v58, %v6939_v17  ;;  %v4809_v38 = vrot.slane %v12178_v45, %v8824_v30  ;;  %v4816_v33 = vrot.slane %v12178_v45, %v8827_v31  ;;  %v7688_v58 = vrot.slane %v11054_v6, %v10983_v4 }
 0x239   : > { %7429 = vperm.xlu0 %8352, %v6906_v63   ;;  %v7674_v28 = vsel %vm7493_vm3, %v7673_v2, %v7669_v50  ;;  %v6685_v17 = vcombine.low %v6677_v13, %v6684_v35  ;;  %v6813_v42 = vrot.slane %v12179_v15, %v8854_v59  ;;  %v6820_v50 = vrot.slane %v12180_v55, %v8854_v59 }
 0x23a   : > { %v7193_v34 = vpop.permute.xlu1 %7192  ;;  %v7679_v23 = vsel %vm7500_vm4, %v7678_v39, %v7674_v28  ;;  %v11177_v62 = vpop.permute.xlu0 %7225  ;;  %v6974_v39 = vcombine.low %v6966_v0, %v6973_v41  ;;  %v6990_v26 = vrot.slane %v6976_v47, %v8854_v59  ;;  %v4830_v29 = vrot.slane %v12177_v48, %v8815_v19 }
 0x23b   : > { %v7683_v63 = vrot.slane %v7193_v34, %v10962_v43  ;;  %v4837_v6 = vrot.slane %v12177_v48, %v8824_v30  ;;  %v4844_v13 = vrot.slane %v12177_v48, %v8827_v31  ;;  %v7009_v47 = vcombine.low %v4795_v60, %v4802_v53  ;;  %v12181_v34 = vld [vmem:[#allocation81_spill] sm:$0xff] }
 0x23c   : > { %7384 = vperm.xlu1 %8353, %v6651_v21   ;;  %v6983_v21 = vrot.slane %v6975_v22, %v8854_v59  ;;  %v11210_v22 = vcombine.low %v4697_v25, %v4704_v46  ;;  %v7010_v0 = vcombine.low %v4809_v38, %v4816_v33  ;;  %v7698_v48 = vrot.slane %v11077_v7, %v11001_v9  ;;  %v12183_v38 = vld [vmem:[#allocation47_spill] sm:$0xff] }
 0x23d   : > { %7435 = vperm.xlu0 %8352, %v6940_v14   ;;  %v7684_v2 = vsel %vm7507_vm5, %v7683_v63, %v7679_v23  ;;  %v6821_v45 = vcombine.low %v6813_v42, %v6820_v50  ;;  %v6847_v23 = vrot.slane %v12181_v34, %v8854_v59  ;;  %v12182_v63 = vld [vmem:[#allocation16_spill] sm:$0xff]  ;;  %v7000_v25 = vrot.slane %v11159_v61, %v8854_v59 }
 0x23e   : > { %v7199_v35 = vpop.permute.xlu1 %7198  ;;  %v7689_v28 = vsel %vm7514_vm6, %v7688_v58, %v7684_v2  ;;  %v11202_v14 = vpop.permute.xlu0 %7231  ;;  %v6854_v58 = vrot.slane %v12182_v63, %v8854_v59  ;;  %v6991_v12 = vcombine.low %v6983_v21, %v6990_v26  ;;  %v7007_v46 = vrot.slane %v6993_v49, %v8854_v59 }
 0x23f   : > { %v7693_v41 = vrot.slane %v7199_v35, %v10986_v3  ;;  %v7026_v60 = vcombine.low %v4823_v36, %v4830_v29  ;;  %v7027_v53 = vcombine.low %v4837_v6, %v4844_v13  ;;  %v4851_v7 = vrot.slane %v12183_v38, %v8812_v18 }
 0x240   : > { %7390 = vperm.xlu1 %8353, %v6685_v17   ;;  %v4858_v55 = vrot.slane %v12183_v38, %v8815_v19  ;;  %v4865_v50 = vrot.slane %v12183_v38, %v8824_v30  ;;  %v4872_v61 = vrot.slane %v12183_v38, %v8827_v31  ;;  %v7708_v36 = vrot.slane %v11101_v8, %v11024_v54 }
 0x241   : > { %7441 = vperm.xlu0 %8352, %v6974_v39   ;;  %v7694_v17 = vsel %vm7521_vm7, %v7693_v41, %v7689_v28  ;;  %v6855_v2 = vcombine.low %v6847_v23, %v6854_v58  ;;  %v12184_v39 = vld [vmem:[#allocation33_spill] sm:$0xff]  ;;  %v6888_v26 = vrot.slane %v10904_v20, %v8854_v59  ;;  %v7008_v6 = vcombine.low %v7000_v25, %v7007_v46  ;;  %v12185_v28 = vld [vmem:[#allocation79_spill] sm:$0xff]  ;;  %v12187_v46 = vld [vmem:[#allocation36_spill] sm:$0xff] }
 0x242   : > { %v7205_v33 = vpop.permute.xlu1 %7204  ;;  %v7699_v15 = vsel %vm7528_vm8, %v7698_v48, %v7694_v17  ;;  %v11226_v42 = vpop.permute.xlu0 %7237  ;;  %v6881_v21 = vrot.slane %v12184_v39, %v8854_v59  ;;  %v7017_v13 = vrot.slane %v7009_v47, %v8854_v59  ;;  %v7024_v35 = vrot.slane %v7010_v0, %v8854_v59 }
 0x243   : > { %v7703_v49 = vrot.slane %v7205_v33, %v11009_v37  ;;  %v4879_v41 = vrot.slane %v12185_v28, %v8812_v18  ;;  %v4886_v8 = vrot.slane %v12185_v28, %v8815_v19  ;;  %v4893_v48 = vrot.slane %v12185_v28, %v8824_v30 }
 0x244   : > { %7414 = vperm.xlu1 %8353, %v6821_v45   ;;  %v4900_v47 = vrot.slane %v12185_v28, %v8827_v31  ;;  %v7043_v23 = vcombine.low %v4851_v7, %v4858_v55  ;;  %v7044_v0 = vcombine.low %v4865_v50, %v4872_v61  ;;  %v7718_v58 = vrot.slane %v11130_v16, %v11049_v32  ;;  %v12188_v55 = vld [vmem:[#allocation61_spill] sm:$0xff]  ;;  %v12189_v61 = vld [vmem:[#allocation70_spill] sm:$0xff] }
 0x245   : > { %7444 = vperm.xlu0 %8352, %v6991_v12   ;;  %v7704_v29 = vsel %vm7535_vm9, %v7703_v49, %v7699_v15  ;;  %v6889_v17 = vcombine.low %v6881_v21, %v6888_v26  ;;  %v12186_v12 = vld [vmem:[#allocation24_spill] sm:$0xff]  ;;  %v6922_v38 = vrot.slane %v12187_v46, %v8854_v59  ;;  %v7025_v15 = vcombine.low %v7017_v13, %v7024_v35 }
 0x246   : > { %v7211_v45 = vpop.permute.xlu1 %7210  ;;  %v7709_v34 = vsel %vm7542_vm10, %v7708_v36, %v7704_v29  ;;  %v11251_v20 = vpop.permute.xlu0 %7243  ;;  %v6915_v25 = vrot.slane %v12186_v12, %v8854_v59  ;;  %v7034_v49 = vrot.slane %v7026_v60, %v8854_v59  ;;  %v7041_v7 = vrot.slane %v7027_v53, %v8854_v59 }
 0x247   : > { %v7713_v63 = vrot.slane %v7211_v45, %v11032_v24  ;;  %v4333_v50 = vrot.slane %v12188_v55, %v8824_v30  ;;  %v4340_v16 = vrot.slane %v12188_v55, %v8827_v31  ;;  %v12190_v36 = vrot.slane %v12189_v61, %v8815_v19 }
 0x248   : > { %7420 = vperm.xlu1 %8353, %v6855_v2   ;;  %v12191_v2 = vrot.slane %v12189_v61, %v8812_v18  ;;  %v12192_v53 = vrot.slane %v12189_v61, %v8827_v31  ;;  %v12193_v29 = vrot.slane %v12189_v61, %v8824_v30  ;;  %v7060_v13 = vcombine.low %v4879_v41, %v4886_v8 }
 0x249   : > { %7447 = vperm.xlu0 %8352, %v7008_v6   ;;  %v7714_v33 = vsel %vm7549_vm11, %v7713_v63, %v7709_v34  ;;  %v7061_v35 = vcombine.low %v4893_v48, %v4900_v47  ;;  %v7728_v45 = vrot.slane %v11157_v51, %v11073_v1  ;;  %v6923_v34 = vcombine.low %v6915_v25, %v6922_v38  ;;  %v12196_v47 = vld [vmem:[#allocation56_spill] sm:$0xff] }
 0x24a   : > { %v6703_v39 = vcombine.low %v12191_v2, %v12190_v36  ;;  %v7217_v21 = vpop.permute.xlu1 %7216  ;;  %v7719_v26 = vsel %vm7556_vm12, %v7718_v58, %v7714_v33  ;;  %v11276_v60 = vpop.permute.xlu0 %7249  ;;  %v6704_v6 = vcombine.low %v12193_v29, %v12192_v53  ;;  %v6949_v63 = vrot.slane %v11154_v40, %v8854_v59  ;;  %v12197_v29 = vld [vmem:[#allocation71_spill] sm:$0xff] }
 0x24b   : > { %v7723_v28 = vrot.slane %v7217_v21, %v11062_v52  ;;  %v6956_v58 = vrot.slane %v11210_v22, %v8854_v59  ;;  %v7042_v12 = vcombine.low %v7034_v49, %v7041_v7  ;;  %v7051_v46 = vrot.slane %v7043_v23, %v8854_v59 }
 0x24c   : > { %7426 = vperm.xlu1 %8353, %v6889_v17   ;;  %v7058_v41 = vrot.slane %v7044_v0, %v8854_v59  ;;  %v12194_v8 = vrot.slane %v12188_v55, %v8815_v19  ;;  %v12195_v51 = vrot.slane %v12188_v55, %v8812_v18  ;;  %v4347_v40 = vrot.slane %v12196_v47, %v8812_v18 }
 0x24d   : > { %7450 = vperm.xlu0 %8352, %v7025_v15   ;;  %v7724_v17 = vsel %vm7563_vm13, %v7723_v28, %v7719_v26  ;;  %v4354_v22 = vrot.slane %v12196_v47, %v8815_v19  ;;  %v4361_v0 = vrot.slane %v12196_v47, %v8824_v30  ;;  %v4368_v33 = vrot.slane %v12196_v47, %v8827_v31 }
 0x24e   : > { %v6720_v48 = vcombine.low %v12195_v51, %v12194_v8  ;;  %v11305_v25 = vsel %vm7570_vm14, %v7728_v45, %v7724_v17  ;;  %v7223_v38 = vpop.permute.xlu1 %7222  ;;  %v11307_v23 = vpop.permute.xlu0 %7255  ;;  %v7737_v15 = vrot.slane %v11177_v62, %v10792_v5  ;;  %v6721_v7 = vcombine.low %v4333_v50, %v4340_v16  ;;  %v12198_v51 = vld [vmem:[#allocation37_spill] sm:$0xff] }
 0x24f   : > { %v7733_v49 = vrot.slane %v7223_v38, %v10908_v56  ;;  %v6957_v55 = vcombine.low %v6949_v63, %v6956_v58  ;;  %v6711_v61 = vrot.slane %v6703_v39, %v8854_v59  ;;  %v6718_v36 = vrot.slane %v6704_v6, %v8854_v59 }
 0x250   : > { %7432 = vperm.xlu1 %8353, %v6923_v34   ;;  %v7059_v21 = vcombine.low %v7051_v46, %v7058_v41  ;;  %v7068_v26 = vrot.slane %v7060_v13, %v8854_v59  ;;  %v7075_v53 = vrot.slane %v7061_v35, %v8854_v59  ;;  %v4375_v28 = vrot.slane %v12197_v29, %v8812_v18 }
 0x251   : > { %7453 = vperm.xlu0 %8352, %v7042_v12   ;;  %v7738_v2 = vsel %vm7472_vm0, %v7737_v15, %v7733_v49  ;;  %v4382_v62 = vrot.slane %v12197_v29, %v8815_v19  ;;  %v4389_v50 = vrot.slane %v12197_v29, %v8824_v30  ;;  %v4396_v16 = vrot.slane %v12197_v29, %v8827_v31 }
 0x252   : > { %v7229_v39 = vpop.permute.xlu1 %7228  ;;  %v11329_v6 = vpop.permute.xlu0 %7261  ;;  %v6737_v45 = vcombine.low %v4347_v40, %v4354_v22  ;;  %v6738_v13 = vcombine.low %v4361_v0, %v4368_v33  ;;  %v7747_v34 = vrot.slane %v11202_v14, %v10937_v57  ;;  %v6719_v63 = vcombine.low %v6711_v61, %v6718_v36  ;;  %v12199_v36 = vld [vmem:[#allocation38_spill] sm:$0xff] }
 0x253   : > { %v7742_v35 = vrot.slane %v7229_v39, %v10876_v11  ;;  %v6728_v58 = vrot.slane %v6720_v48, %v8854_v59  ;;  %v6735_v17 = vrot.slane %v6721_v7, %v8854_v59  ;;  %v7076_v46 = vcombine.low %v7068_v26, %v7075_v53 }
 0x254   : > { %7438 = vperm.xlu1 %8353, %v6957_v55   ;;  %v6754_v41 = vcombine.low %v4375_v28, %v4382_v62  ;;  %v6755_v8 = vcombine.low %v4389_v50, %v4396_v16  ;;  %v4403_v47 = vrot.slane %v12198_v51, %v8812_v18  ;;  %v4410_v14 = vrot.slane %v12198_v51, %v8815_v19 }
 0x255   : > { %7456 = vperm.xlu0 %8352, %v7059_v21   ;;  %v7743_v12 = vsel %vm7479_vm1, %v7742_v35, %v7738_v2  ;;  %v4417_v48 = vrot.slane %v12198_v51, %v8824_v30  ;;  %v4424_v0 = vrot.slane %v12198_v51, %v8827_v31  ;;  %v7757_v15 = vrot.slane %v11226_v42, %v10955_v44 }
 0x256   : > { %v7235_v40 = vpop.permute.xlu1 %7234  ;;  %v7748_v22 = vsel %vm7486_vm2, %v7747_v34, %v7743_v12  ;;  %v11340_v38 = vpop.permute.xlu0 %7267  ;;  %v6736_v49 = vcombine.low %v6728_v58, %v6735_v17  ;;  %v6745_v7 = vrot.slane %v6737_v45, %v8854_v59  ;;  %v6752_v55 = vrot.slane %v6738_v13, %v8854_v59 }
 0x257   : > { %v7752_v33 = vrot.slane %v7235_v40, %v10940_v10  ;;  %v4431_v2 = vrot.slane %v12199_v36, %v8812_v18  ;;  %v4438_v21 = vrot.slane %v12199_v36, %v8815_v19  ;;  %v4445_v26 = vrot.slane %v12199_v36, %v8824_v30 }
 0x258   : > { %7396 = vperm.xlu1 %8353, %v6719_v63   ;;  %v4452_v28 = vrot.slane %v12199_v36, %v8827_v31  ;;  %v6771_v62 = vcombine.low %v4403_v47, %v4410_v14  ;;  %v6772_v50 = vcombine.low %v4417_v48, %v4424_v0  ;;  %v7767_v18 = vrot.slane %v11251_v20, %v10983_v4 }
 0x259   : > { %7459 = vperm.xlu0 %8352, %v7076_v46   ;;  %v7753_v61 = vsel %vm7493_vm3, %v7752_v33, %v7748_v22  ;;  %v6753_v39 = vcombine.low %v6745_v7, %v6752_v55  ;;  %v6762_v19 = vrot.slane %v6754_v41, %v8854_v59  ;;  %v6769_v30 = vrot.slane %v6755_v8, %v8854_v59 }
 0x25a   : > { %v7241_v53 = vpop.permute.xlu1 %7240  ;;  %v7758_v29 = vsel %vm7500_vm4, %v7757_v15, %v7753_v61  ;;  %v7274_v42 = vpop.permute.xlu0 %7273  ;;  %v6788_v31 = vcombine.low %v4431_v2, %v4438_v21  ;;  %v6789_v63 = vcombine.low %v4445_v26, %v4452_v28  ;;  %v7777_v17 = vrot.slane %v11276_v60, %v11001_v9 }
 0x25b   : > { %v7762_v16 = vrot.slane %v7241_v53, %v10962_v43  ;;  %v6770_v20 = vcombine.low %v6762_v19, %v6769_v30  ;;  %v6779_v12 = vrot.slane %v6771_v62, %v8854_v59  ;;  %v6786_v46 = vrot.slane %v6772_v50, %v8854_v59 }
 0x25c   : > { %7399 = vperm.xlu1 %8353, %v6736_v49   ;;  %v7787_v22 = vrot.slane %v11307_v23, %v11024_v54  ;;  %v6796_v60 = vrot.slane %v6788_v31, %v8854_v59  ;;  %v6803_v48 = vrot.slane %v6789_v63, %v8854_v59  ;;  %v7797_v55 = vrot.slane %v11329_v6, %v11049_v32 }
 0x25d   : > { %v7763_v45 = vsel %vm7507_vm5, %v7762_v16, %v7758_v29  ;;  %v6787_v14 = vcombine.low %v6779_v12, %v6786_v46  ;;  %v7807_v53 = vrot.slane %v11340_v38, %v11073_v1  ;;  %v7816_v50 = vrot.slane %v7274_v42, %v10792_v5 }
 0x25e   : > { %v7247_v13 = vpop.permute.xlu1 %7246  ;;  %v7768_v35 = vsel %vm7514_vm6, %v7767_v18, %v7763_v45  ;;  %v7280_v34 = vpop.permute.xlu0 %7279  ;;  %v6804_v61 = vcombine.low %v6796_v60, %v6803_v48 }
 0x25f   : > { %v7772_v58 = vrot.slane %v7247_v13, %v10986_v3  ;;  %v7826_v45 = vrot.slane %v7280_v34, %v10937_v57 }
 0x260   : > { %7402 = vperm.xlu1 %8353, %v6753_v39  }
 0x261   : > { %v7773_v41 = vsel %vm7521_vm7, %v7772_v58, %v7768_v35 }
 0x262   : > { %v7253_v8 = vpop.permute.xlu1 %7252  ;;  %v7778_v51 = vsel %vm7528_vm8, %v7777_v17, %v7773_v41  ;;  %v7286_v47 = vpop.permute.xlu0 %7285 }
 0x263   : > { %v7782_v40 = vrot.slane %v7253_v8, %v11009_v37  ;;  %v7836_v42 = vrot.slane %v7286_v47, %v10955_v44 }
 0x264   : > { %7405 = vperm.xlu1 %8353, %v6770_v20  }
 0x265   : > { %v7783_v0 = vsel %vm7535_vm9, %v7782_v40, %v7778_v51 }
 0x266   : > { %v7259_v33 = vpop.permute.xlu1 %7258  ;;  %v7788_v15 = vsel %vm7542_vm10, %v7787_v22, %v7783_v0 }
 0x267   : > { %v7292_v49 = vpop.permute.xlu0 %7291  ;;  %v7792_v7 = vrot.slane %v7259_v33, %v11032_v24 }
 0x268   : > { %7408 = vperm.xlu1 %8353, %v6787_v14   ;;  %v7846_v34 = vrot.slane %v7292_v49, %v10983_v4 }
 0x269   : > { %v7793_v23 = vsel %vm7549_vm11, %v7792_v7, %v7788_v15 }
 0x26a   : > { %v7265_v36 = vpop.permute.xlu1 %7264  ;;  %v7798_v2 = vsel %vm7556_vm12, %v7797_v55, %v7793_v23 }
 0x26b   : > { %v7298_v21 = vpop.permute.xlu0 %7297  ;;  %v7802_v26 = vrot.slane %v7265_v36, %v11062_v52 }
 0x26c   : > { %7411 = vperm.xlu1 %8353, %v6804_v61   ;;  %v7856_v47 = vrot.slane %v7298_v21, %v11001_v9 }
 0x26d   : > { %v7803_v29 = vsel %vm7563_vm13, %v7802_v26, %v7798_v2 }
 0x26e   : > { %v11394_v28 = vsel %vm7570_vm14, %v7807_v53, %v7803_v29  ;;  %v7271_v62 = vpop.permute.xlu1 %7270 }
 0x26f   : > { %v7304_v6 = vpop.permute.xlu0 %7303  ;;  %v7812_v16 = vrot.slane %v7271_v62, %v10908_v56 }
 0x270   : > { %v7866_v15 = vrot.slane %v7304_v6, %v11024_v54 }
 0x271   : > { %v7817_v18 = vsel %vm7472_vm0, %v7816_v50, %v7812_v16 }
 0x272   : > { %v7277_v39 = vpop.permute.xlu1 %7276 }
 0x273   : > { %v7821_v30 = vrot.slane %v7277_v39, %v10876_v11 }
 0x274   : > { %v7310_v19 = vpop.permute.xlu0 %7309 }
 0x275   : > { %v7822_v38 = vsel %vm7479_vm1, %v7821_v30, %v7817_v18  ;;  %v7876_v36 = vrot.slane %v7310_v19, %v11049_v32 }
 0x276   : > { %v7283_v13 = vpop.permute.xlu1 %7282  ;;  %v7827_v35 = vsel %vm7486_vm2, %v7826_v45, %v7822_v38  ;;  %v12200_v45 = vld [vmem:[#allocation12_spill] sm:$0xff] }
 0x277   : > { %v7831_v63 = vrot.slane %v7283_v13, %v10940_v10  ;;  %v7466_v38 = vrot.slane %v12200_v45, %v10908_v56 }
 0x278   : > { %v7316_v31 = vpop.permute.xlu0 %7315 }
 0x279   : > { %v7832_v58 = vsel %vm7493_vm3, %v7831_v63, %v7827_v35  ;;  %v7886_v62 = vrot.slane %v7316_v31, %v11073_v1  ;;  %v12201_v63 = vld [vmem:[#allocation20_spill] sm:$0xff] }
 0x27a   : > { %v7289_v17 = vpop.permute.xlu1 %7288  ;;  %v7837_v20 = vsel %vm7500_vm4, %v7836_v42, %v7832_v58  ;;  %v7471_v42 = vrot.slane %v12201_v63, %v10792_v5 }
 0x27b   : > { %v7841_v46 = vrot.slane %v7289_v17, %v10962_v43  ;;  %v12202_v17 = vld [vmem:[#allocation48_spill] sm:$0xff] }
 0x27c   : > { %v7322_v12 = vpop.permute.xlu0 %7321 }
 0x27d   : > { %v7842_v41 = vsel %vm7507_vm5, %v7841_v46, %v7837_v20  ;;  %v7895_v39 = vrot.slane %v7322_v12, %v10792_v5  ;;  %v7478_v20 = vrot.slane %v12202_v17, %v10876_v11  ;;  %v7473_v46 = vsel %vm7472_vm0, %v7471_v42, %v7466_v38 }
 0x27e   : > { %v7295_v8 = vpop.permute.xlu1 %7294  ;;  %v7847_v51 = vsel %vm7514_vm6, %v7846_v34, %v7842_v41  ;;  %v12203_v34 = vld [vmem:[#allocation22_spill] sm:$0xff] }
 0x27f   : > { %v7851_v22 = vrot.slane %v7295_v8, %v10986_v3  ;;  %v7485_v41 = vrot.slane %v12203_v34, %v10937_v57 }
 0x280   : > { %v7328_v40 = vpop.permute.xlu0 %7327 }
 0x281   : > { %v7852_v14 = vsel %vm7521_vm7, %v7851_v22, %v7847_v51  ;;  %v7905_v58 = vrot.slane %v7328_v40, %v10937_v57 }
 0x282   : > { %v7301_v60 = vpop.permute.xlu1 %7300  ;;  %v7857_v48 = vsel %vm7528_vm8, %v7856_v47, %v7852_v14  ;;  %v12204_v47 = vld [vmem:[#allocation13_spill] sm:$0xff] }
 0x283   : > { %v7861_v33 = vrot.slane %v7301_v60, %v11009_v37  ;;  %v7492_v14 = vrot.slane %v12204_v47, %v10940_v10  ;;  %v12205_v60 = vld [vmem:[#allocation27_spill] sm:$0xff] }
 0x284   : > { %v7334_v0 = vpop.permute.xlu0 %7333 }
 0x285   : > { %v7862_v49 = vsel %vm7535_vm9, %v7861_v33, %v7857_v48  ;;  %v7499_v48 = vrot.slane %v12205_v60, %v10955_v44  ;;  %v7915_v33 = vrot.slane %v7334_v0, %v10955_v44  ;;  %v12208_v0 = vld [vmem:[#allocation69_spill] sm:$0xff] }
 0x286   : > { %v7307_v7 = vpop.permute.xlu1 %7306  ;;  %v7867_v55 = vsel %vm7542_vm10, %v7866_v15, %v7862_v49  ;;  %v7480_v15 = vsel %vm7479_vm1, %v7478_v20, %v7473_v46  ;;  %v12206_v49 = vld [vmem:[#allocation50_spill] sm:$0xff] }
 0x287   : > { %v7871_v23 = vrot.slane %v7307_v7, %v11032_v24  ;;  %v7506_v7 = vrot.slane %v12206_v49, %v10962_v43 }
 0x288   : > { %v7340_v61 = vpop.permute.xlu0 %7339 }
 0x289   : > { %v7872_v2 = vsel %vm7549_vm11, %v7871_v23, %v7867_v55  ;;  %v7487_v23 = vsel %vm7486_vm2, %v7485_v41, %v7480_v15 }
 0x28a   : > { %v7877_v26 = vsel %vm7556_vm12, %v7876_v36, %v7872_v2  ;;  %v12207_v36 = vld [vmem:[#allocation67_spill] sm:$0xff] }
 0x28b   : > { %v7313_v21 = vpop.permute.xlu1 %7312  ;;  %v7513_v2 = vrot.slane %v12207_v36, %v10983_v4 }
 0x28c   : > { %v7346_v53 = vpop.permute.xlu0 %7345  ;;  %v7881_v29 = vrot.slane %v7313_v21, %v11062_v52 }
 0x28d   : > { %v7935_v46 = vrot.slane %v7346_v53, %v11001_v9 }
 0x28e   : > { %v7882_v6 = vsel %vm7563_vm13, %v7881_v29, %v7877_v26 }
 0x28f   : > { %v11427_v50 = vsel %vm7570_vm14, %v7886_v62, %v7882_v6  ;;  %v7319_v16 = vpop.permute.xlu1 %7318  ;;  %v7494_v62 = vsel %vm7493_vm3, %v7492_v14, %v7487_v23  ;;  %v7520_v6 = vrot.slane %v12208_v0, %v10986_v3  ;;  %v12214_v0 = vld [vmem:[#allocation59_spill] sm:$0xff] }
 0x290   : > { %v7352_v18 = vpop.permute.xlu0 %7351  ;;  %v7891_v19 = vrot.slane %v7319_v16, %v10908_v56 }
 0x291   : > { %v7945_v53 = vrot.slane %v7352_v18, %v11024_v54 }
 0x292   : > { %v7896_v30 = vsel %vm7472_vm0, %v7895_v39, %v7891_v19  ;;  %v7501_v39 = vsel %vm7500_vm4, %v7499_v48, %v7494_v62  ;;  %v7925_v19 = vrot.slane %v7340_v61, %v10983_v4  ;;  %v12210_v61 = vld [vmem:[#allocation57_spill] sm:$0xff] }
 0x293   : > { %v7325_v13 = vpop.permute.xlu1 %7324 }
 0x294   : > { %v11434_v35 = vpop.permute.xlu0 %7357  ;;  %v7900_v31 = vrot.slane %v7325_v13, %v10876_v11 }
 0x295   : > { %v7955_v18 = vrot.slane %v11434_v35, %v11049_v32 }
 0x296   : > { %v7901_v12 = vsel %vm7479_vm1, %v7900_v31, %v7896_v30  ;;  %v7508_v30 = vsel %vm7507_vm5, %v7506_v7, %v7501_v39 }
 0x297   : > { %v7331_v8 = vpop.permute.xlu1 %7330  ;;  %v7906_v51 = vsel %vm7486_vm2, %v7905_v58, %v7901_v12  ;;  %v7515_v38 = vsel %vm7514_vm6, %v7513_v2, %v7508_v30  ;;  %v12209_v58 = vld [vmem:[#allocation84_spill] sm:$0xff]  ;;  %v7527_v12 = vrot.slane %v12210_v61, %v11001_v9 }
 0x298   : > { %v11447_v22 = vpop.permute.xlu0 %7363  ;;  %v7910_v40 = vrot.slane %v7331_v8, %v10940_v10  ;;  %v7522_v42 = vsel %vm7521_vm7, %v7520_v6, %v7515_v38  ;;  %v7534_v17 = vrot.slane %v12209_v58, %v11009_v37  ;;  %v7555_v6 = vrot.slane %v12214_v0, %v11049_v32 }
 0x299   : > { %v7529_v41 = vsel %vm7528_vm8, %v7527_v12, %v7522_v42  ;;  %v7965_v35 = vrot.slane %v11447_v22, %v11073_v1 }
 0x29a   : > { %v7911_v55 = vsel %vm7493_vm3, %v7910_v40, %v7906_v51  ;;  %v7536_v14 = vsel %vm7535_vm9, %v7534_v17, %v7529_v41  ;;  %v12211_v40 = vld [vmem:[#allocation80_spill] sm:$0xff] }
 0x29b   : > { %v7337_v21 = vpop.permute.xlu1 %7336  ;;  %v7916_v26 = vsel %vm7500_vm4, %v7915_v33, %v7911_v55  ;;  %v7548_v60 = vrot.slane %v12211_v40, %v11032_v24  ;;  %v12212_v33 = vld [vmem:[#allocation49_spill] sm:$0xff] }
 0x29c   : > { %v11463_v29 = vpop.permute.xlu0 %7369  ;;  %v7920_v16 = vrot.slane %v7337_v21, %v10962_v43  ;;  %v7541_v15 = vrot.slane %v12212_v33, %v11024_v54  ;;  %v12213_v21 = vld [vmem:[#allocation58_spill] sm:$0xff] }
 0x29e   : > { %v7921_v45 = vsel %vm7507_vm5, %v7920_v16, %v7916_v26  ;;  %v7543_v7 = vsel %vm7542_vm10, %v7541_v15, %v7536_v14  ;;  %v7562_v26 = vrot.slane %v12213_v21, %v11062_v52 }
 0x29f   : > { %v7343_v13 = vpop.permute.xlu1 %7342  ;;  %v7926_v31 = vsel %vm7514_vm6, %v7925_v19, %v7921_v45  ;;  %v7550_v2 = vsel %vm7549_vm11, %v7548_v60, %v7543_v7 }
 0x2a0   : > { %v11475_v63 = vpop.permute.xlu0 %7375  ;;  %v7930_v20 = vrot.slane %v7343_v13, %v10986_v3  ;;  %v7557_v39 = vsel %vm7556_vm12, %v7555_v6, %v7550_v2 }
 0x2a1   : > { %v7564_v38 = vsel %vm7563_vm13, %v7562_v26, %v7557_v39 }
 0x2a2   : > { %v7931_v34 = vsel %vm7521_vm7, %v7930_v20, %v7926_v31  ;;  %v12215_v31 = vld [vmem:[#allocation52_spill] sm:$0xff] }
 0x2a3   : > { %v7349_v8 = vpop.permute.xlu1 %7348  ;;  %v7936_v51 = vsel %vm7528_vm8, %v7935_v46, %v7931_v34  ;;  %v7569_v42 = vrot.slane %v12215_v31, %v11073_v1 }
 0x2a4   : > { %v11487_v47 = vpop.permute.xlu0 %7381  ;;  %v7940_v48 = vrot.slane %v7349_v8, %v11009_v37 }
 0x2a5   : > { %v7571_v17 = vsel %vm7570_vm14, %v7569_v42, %v7564_v38 }
 0x2a6   : > { %v7941_v49 = vsel %vm7535_vm9, %v7940_v48, %v7936_v51  ;;  %v11525_v46 = vsel %vm8125_vm15, %v11427_v50, %v7571_v17  ;;  %v7974_v17 = vrot.slane %v11463_v29, %v10792_v5 }
 0x2a7   : > { %v7355_v55 = vpop.permute.xlu1 %7354  ;;  %v7946_v23 = vsel %vm7542_vm10, %v7945_v53, %v7941_v49 }
 0x2a8   : > { %v11499_v36 = vpop.permute.xlu0 %7387  ;;  %v7950_v62 = vrot.slane %v7355_v55, %v11032_v24 }
 0x2aa   : > { %v7951_v16 = vsel %vm7549_vm11, %v7950_v62, %v7946_v23 }
 0x2ab   : > { %v7361_v19 = vpop.permute.xlu1 %7360  ;;  %v7956_v30 = vsel %vm7556_vm12, %v7955_v18, %v7951_v16 }
 0x2ac   : > { %v11512_v45 = vpop.permute.xlu0 %7393  ;;  %v7960_v13 = vrot.slane %v7361_v19, %v11062_v52 }
 0x2ae   : > { %v7961_v58 = vsel %vm7563_vm13, %v7960_v13, %v7956_v30 }
 0x2af   : > { %v7966_v20 = vsel %vm7570_vm14, %v7965_v35, %v7961_v58  ;;  %v7367_v61 = vpop.permute.xlu1 %7366 }
 0x2b0   : > { %v7418_v12 = vpop.permute.xlu0 %7417  ;;  %v11529_v34 = vsel %vm8125_vm15, %v7966_v20, %v11099_v27  ;;  %v7970_v13 = vrot.slane %v7367_v61, %v10908_v56 }
 0x2b1   : > { %v8130_v41 = vcombine.low %v11525_v46, %v11529_v34  ;;  %v8053_v49 = vrot.slane %v7418_v12, %v10792_v5 }
 0x2b3   : > { %v7373_v22 = vpop.permute.xlu1 %7372 }
 0x2b4   : > { %v7424_v8 = vpop.permute.xlu0 %7423  ;;  %v7979_v35 = vrot.slane %v7373_v22, %v10876_v11 }
 0x2b5   : > { %v8063_v21 = vrot.slane %v7424_v8, %v10937_v57 }
 0x2b7   : > { %v7379_v51 = vpop.permute.xlu1 %7378 }
 0x2b8   : > { %v7430_v14 = vpop.permute.xlu0 %7429  ;;  %v7989_v61 = vrot.slane %v7379_v51, %v10940_v10 }
 0x2b9   : > { %v8073_v16 = vrot.slane %v7430_v14, %v10955_v44  ;;  %v7975_v14 = vsel %vm7472_vm0, %v7974_v17, %v7970_v13 }
 0x2bb   : > { %v7385_v40 = vpop.permute.xlu1 %7384 }
 0x2bc   : > { %v7436_v60 = vpop.permute.xlu0 %7435 }
 0x2bd   : > { %v8083_v31 = vrot.slane %v7436_v60, %v10983_v4 }
 0x2bf   : > { %v7391_v48 = vpop.permute.xlu1 %7390 }
 0x2c0   : > { %v7442_v33 = vpop.permute.xlu0 %7441 }
 0x2c3   : > { %v7415_v15 = vpop.permute.xlu1 %7414 }
 0x2c4   : > { %v8049_v53 = vrot.slane %v7415_v15, %v10908_v56  ;;  %v7445_v7 = vpop.permute.xlu0 %7444  ;;  %v8093_v15 = vrot.slane %v7442_v33, %v11001_v9  ;;  %v7980_v56 = vsel %vm7479_vm1, %v7979_v35, %v7975_v14 }
 0x2c5   : > { %v8098_v5 = vrot.slane %v7445_v7, %v11009_v37 }
 0x2c6   : > { %v8054_v55 = vsel %vm7472_vm0, %v8053_v49, %v8049_v53  ;;  %v7999_v49 = vrot.slane %v7385_v40, %v10962_v43 }
 0x2c7   : > { %v7421_v50 = vpop.permute.xlu1 %7420 }
 0x2c8   : > { %v8058_v27 = vrot.slane %v7421_v50, %v10876_v11  ;;  %v7448_v0 = vpop.permute.xlu0 %7447  ;;  %v7984_v11 = vrot.slane %v11475_v63, %v10937_v57 }
 0x2c9   : > { %v8103_v51 = vrot.slane %v7448_v0, %v11024_v54 }
 0x2ca   : > { %v8059_v23 = vsel %vm7479_vm1, %v8058_v27, %v8054_v55  ;;  %v7985_v53 = vsel %vm7486_vm2, %v7984_v11, %v7980_v56  ;;  %v8009_v55 = vrot.slane %v7391_v48, %v10986_v3 }
 0x2cb   : > { %v7427_v2 = vpop.permute.xlu1 %7426  ;;  %v8064_v62 = vsel %vm7486_vm2, %v8063_v21, %v8059_v23  ;;  %v7990_v50 = vsel %vm7493_vm3, %v7989_v61, %v7985_v53 }
 0x2cc   : > { %v8068_v26 = vrot.slane %v7427_v2, %v10940_v10  ;;  %v7451_v58 = vpop.permute.xlu0 %7450  ;;  %v7994_v10 = vrot.slane %v11487_v47, %v10955_v44 }
 0x2cd   : > { %v8108_v23 = vrot.slane %v7451_v58, %v11032_v24 }
 0x2ce   : > { %v8069_v6 = vsel %vm7493_vm3, %v8068_v26, %v8064_v62  ;;  %v7995_v63 = vsel %vm7500_vm4, %v7994_v10, %v7990_v50 }
 0x2cf   : > { %v7433_v18 = vpop.permute.xlu1 %7432  ;;  %v8074_v19 = vsel %vm7500_vm4, %v8073_v16, %v8069_v6  ;;  %v8000_v7 = vsel %vm7507_vm5, %v7999_v49, %v7995_v63 }
 0x2d0   : > { %v8078_v39 = vrot.slane %v7433_v18, %v10962_v43  ;;  %v7454_v29 = vpop.permute.xlu0 %7453  ;;  %v8004_v43 = vrot.slane %v11499_v36, %v10983_v4 }
 0x2d1   : > { %v8113_v21 = vrot.slane %v7454_v29, %v11049_v32 }
 0x2d2   : > { %v8079_v30 = vsel %vm7507_vm5, %v8078_v39, %v8074_v19  ;;  %v8005_v40 = vsel %vm7514_vm6, %v8004_v43, %v8000_v7 }
 0x2d3   : > { %v7439_v38 = vpop.permute.xlu1 %7438  ;;  %v8084_v20 = vsel %vm7514_vm6, %v8083_v31, %v8079_v30  ;;  %v8010_v26 = vsel %vm7521_vm7, %v8009_v55, %v8005_v40 }
 0x2d4   : > { %v8088_v42 = vrot.slane %v7439_v38, %v10986_v3  ;;  %v7457_v2 = vpop.permute.xlu0 %7456  ;;  %v8014_v3 = vrot.slane %v11512_v45, %v11001_v9 }
 0x2d5   : > { %v8118_v4 = vrot.slane %v7457_v2, %v11062_v52 }
 0x2d6   : > { %v8089_v12 = vsel %vm7521_vm7, %v8088_v42, %v8084_v20  ;;  %v8015_v16 = vsel %vm7528_vm8, %v8014_v3, %v8010_v26 }
 0x2d7   : > { %v7397_v8 = vpop.permute.xlu1 %7396  ;;  %v8094_v22 = vsel %vm7528_vm8, %v8093_v15, %v8089_v12 }
 0x2d8   : > { %v8099_v33 = vsel %vm7535_vm9, %v8098_v5, %v8094_v22  ;;  %v8019_v62 = vrot.slane %v7397_v8, %v11009_v37  ;;  %v7460_v36 = vpop.permute.xlu0 %7459 }
 0x2d9   : > { %v8104_v27 = vsel %vm7542_vm10, %v8103_v51, %v8099_v33 }
 0x2da   : > { %v8109_v44 = vsel %vm7549_vm11, %v8108_v23, %v8104_v27  ;;  %v8020_v9 = vsel %vm7535_vm9, %v8019_v62, %v8015_v16 }
 0x2db   : > { %v7400_v60 = vpop.permute.xlu1 %7399  ;;  %v8114_v48 = vsel %vm7556_vm12, %v8113_v21, %v8109_v44 }
 0x2dc   : > { %v8024_v0 = vrot.slane %v7400_v60, %v11024_v54  ;;  %v8119_v37 = vsel %vm7563_vm13, %v8118_v4, %v8114_v48  ;;  %v8123_v54 = vrot.slane %v7460_v36, %v11073_v1 }
 0x2de   : > { %v8025_v19 = vsel %vm7542_vm10, %v8024_v0, %v8020_v9  ;;  %v8124_v38 = vsel %vm7570_vm14, %v8123_v54, %v8119_v37 }
 0x2df   : > { %v7403_v57 = vpop.permute.xlu1 %7402 }
 0x2e0   : > { %v8029_v6 = vrot.slane %v7403_v57, %v11032_v24 }
 0x2e2   : > { %v8030_v30 = vsel %vm7549_vm11, %v8029_v6, %v8025_v19 }
 0x2e3   : > { %v7406_v47 = vpop.permute.xlu1 %7405 }
 0x2e4   : > { %v8034_v39 = vrot.slane %v7406_v47, %v11049_v32 }
 0x2e6   : > { %v8035_v32 = vsel %vm7556_vm12, %v8034_v39, %v8030_v30 }
 0x2e7   : > { %v7409_v18 = vpop.permute.xlu1 %7408 }
 0x2e8   : > { %v8039_v45 = vrot.slane %v7409_v18, %v11062_v52  ;;  %v8129_v52 = vsel %vm8125_vm15, %v8124_v38, %v11394_v28 }
 0x2ea   : > { %v8040_v31 = vsel %vm7563_vm13, %v8039_v45, %v8035_v32 }
 0x2eb   : > { %v7412_v24 = vpop.permute.xlu1 %7411 }
 0x2ec   : > { %v8044_v13 = vrot.slane %v7412_v24, %v11073_v1  ;;  %v8138_v1 = vrot.slane %v8130_v41, %v8854_v59 }
 0x2ee   : > { %v8045_v42 = vsel %vm7570_vm14, %v8044_v13, %v8040_v31 }
 0x2ef   : > { %v8128_v35 = vsel %vm8125_vm15, %v8045_v42, %v11305_v25 }
 0x2f0   : > { %v8131_v58 = vcombine.low %v8128_v35, %v8129_v52 }
 0x2f2   : > { %v8145_v17 = vrot.slane %v8131_v58, %v8854_v59 }
 0x2f4   : > { %v8146_v20 = vcombine.low %v8138_v1, %v8145_v17 }
 0x2f6   : > { %8148 = vst [vmem:[%s154_s18] sm:$0xff] %v8146_v20 }
 0x2f7   : > { %8397 = shalt.err (!%p8394_p11)
}
 0x2f8   : > { %s8398_s23 = scalar_lea.hbm %s11614_s4, 128  ;;  %s8402_s2 = scalar_lea.hbm %s11672_s1, 256 }
 0x2f9   : > { %p8399_p6 = scmp.ne.s32.totalorder %s11614_s4, %s8398_s23  ;;  %p8403_p2 = scmp.lt.u32.totalorder %s11614_s4, %s11672_s1 }
 0x2fa   : > { %p8404_p7 = scmp.lt.u32.totalorder %s8402_s2, %s8398_s23  ;;  %p8406_p8 = scmp.lt.u32.totalorder %s8398_s23, %s11614_s4 }
 0x2fb   : > { %p8400_p13 = pnand %p8399_p6, %p12216_p1 }
 0x2fc   : > { %p8405_p10 = por %p8404_p7, %p8403_p2 }
 0x2fd   : > { %p8401_p0 = pneg %p8400_p13 }
 0x2fe   : > { %p8407_p3 = por %p8406_p8, %p8405_p10 }
 0x300   : > { %p8408_p5 = pnand %p8407_p3, %p8401_p0 }
 0x302   : > { %8411 = shalt.err (!%p8408_p5)
}
 0x303   : > { %8259 = dma.vmem_to_hbm [thread:$0]  (%p12216_p1), %s11616_s19, 128, %s11614_s4, %s8150_s12  }
 0x304 PF: > { %s8176_s16 = sand.u32 1, %s8458_s6   ;;  %p12217_p12 = scmp.ne.s32.totalorder %s11758_s29, 0 }
 0x305   : > { %p12218_p4 = scmp.ge.s32.totalorder %s8490_s14, 2  ;;  %s8177_s18 = scalar_lea.sflag [#allocation5], %s8176_s16 }
 0x307   : > { %p8266_p9 = pnand %p12218_p4, %p12217_p12 }
 0x309   : > { %8453 = dma.done.wait (!%p8266_p9), %s8177_s18, 128  }
 0x30a   : > { %8455 = vsyncadd (!%p8266_p9), %s8177_s18, 4294967168  ;;  %s17_s14 = sadd.s32 1, %s8490_s14   ;;  %s12219_s6 = smov %s8462_s7 }
 0x30b   : > { %p14_p11 = scmp.ge.s32.totalorder %s17_s14, 4   ;;  %s12220_s7 = smov %s8466_s8 }
 0x30c   : > { %s12221_s8 = smov %s8585_s26  ;;  %s12222_s9 = smov %s8474_s10 }
 0x30d   : > { %s12223_s10 = smov %s8478_s11  ;;  %s12224_s11 = smov %s8588_s27 }
 0x30e   : > { %s12225_s12 = smov %s8486_s13  ;;  %s12226_s13 = smov %s12228_s17 }
 0x30f   :  { %16 = sbr.rel (!%p14_p11) target bundleno = 8 (0x8), region = 77 }
 0x316   :  { %8182 = vsyncpa [#allocation4], 1 }
 0x317   :  { %8184 = vsyncpa [#allocation4 + $0x1], 1 }
 0x318   :  { %8185 = vsyncpa [#allocation5], 1 }
 0x319   :  { %8187 = vsyncpa [#allocation5 + $0x1], 1 }

</bundles_post_ra>
